<compile_context>
chip_gen: v7x
topology: tpu7x:2x2x1
jax: 0.10.0
libtpu: 0.0.40
codegen_flags: <defaults>
</compile_context>

<pallas_src>
import functools

import jax
import jax.numpy as jnp
from jax.experimental import pallas as pl
from jax.experimental.pallas import tpu as pltpu

# Raw (PyTorch) and lane-padded feature sizes.
IN_RAW, HID_RAW, LAT_RAW = 784, 500, 20
IN_PAD, HID_PAD, LAT_PAD = 896, 512, 128   # 7*128, 4*128, 1*128


def _round_up(x, m):
    return (x + m - 1) // m * m


# ----------------------------- Pallas kernel ------------------------------ #
def _vae_forward_kernel(
    x_ref, eps_ref,
    w1_ref, b1_ref,
    w2_ref, b2_ref,          # fused fc21 || fc22 (mu | logvar)
    w3_ref, b3_ref,
    w4_ref, b4_ref,
    w5_ref, b5_ref,
    recon_ref, mu_ref, logvar_ref,
    *, negative_slope,
):
    def nonlin(v):
        # LeakyReLU(0.1) (plain ReLU if negative_slope == 0.0)
        return jnp.where(v > 0, v, negative_slope * v)

    def mm(a, w_ref):
        # bf16 x bf16 on the MXU, f32 accumulation.
        return jnp.dot(a.astype(jnp.bfloat16), w_ref[...],
                       preferred_element_type=jnp.float32)

    x = x_ref[...]                                        # (TB, 896) f32

    # ---- encode ----
    h1 = nonlin(mm(x, w1_ref) + b1_ref[...])              # (TB, 512)
    ml = mm(h1, w2_ref) + b2_ref[...]                     # (TB, 256) = [mu | logvar]
    mu = ml[:, :LAT_PAD]                                  # (TB, 128), lane-aligned slice
    logvar = ml[:, LAT_PAD:]                              # (TB, 128)

    # ---- reparameterize: z = eps * exp(0.5 * logvar) + mu ----
    std = jnp.exp(0.5 * logvar)
    z = eps_ref[...] * std + mu                           # (TB, 128)

    # ---- decode ----
    h3 = nonlin(mm(z, w3_ref) + b3_ref[...])              # (TB, 512)
    h4 = nonlin(mm(h3, w4_ref) + b4_ref[...])             # (TB, 512)
    logits = mm(h4, w5_ref) + b5_ref[...]                 # (TB, 896)

    recon_ref[...] = jax.nn.sigmoid(logits)
    mu_ref[...] = mu
    logvar_ref[...] = logvar


# ------------------------------ JAX wrapper -------------------------------- #
def mnist_vae_forward(x_nchw, packed, eps, *, leaky_relu=True, latent=False):
    """Mirror of MNISTVAE.forward.

    x_nchw: (B, 1, 28, 28) float32
    packed: dict of padded bf16 weights (in_pad, out_pad) and f32 biases (1, out_pad)
    eps:    (B, 20) float32 standard-normal sample (torch.randn_like(std))
    """
    B = x_nchw.shape[0]
    x = x_nchw.reshape(B, IN_RAW).astype(jnp.float32)     # == x.view(-1, 784)

    # Batch tile: 128 rows fills the MXU M dimension for realistic batches;
    # small batches are padded up to one sublane-aligned tile.
    TB = _round_up(B, 8) if B <= 128 else 128
    Bp = _round_up(B, TB)

    xp = jnp.zeros((Bp, IN_PAD), jnp.float32).at[:B, :IN_RAW].set(x)
    epsp = jnp.zeros((Bp, LAT_PAD), jnp.float32).at[:B, :LAT_RAW].set(
        eps.astype(jnp.float32))

    grid = (Bp // TB,)

    def batch_spec(feat):
        return pl.BlockSpec((TB, feat), lambda i: (i, 0))

    def resident_spec(shape):
        # Full-extent block + constant index_map: stays in VMEM across steps.
        return pl.BlockSpec(shape, lambda i: (0, 0))

    kernel = functools.partial(
        _vae_forward_kernel,
        negative_slope=0.1 if leaky_relu else 0.0,
    )

    weight_bytes = sum(int(v.size) * v.dtype.itemsize for v in packed.values())
    flops = 2 * Bp * (IN_PAD * HID_PAD + HID_PAD * 2 * LAT_PAD
                      + LAT_PAD * HID_PAD + HID_PAD * HID_PAD
                      + HID_PAD * IN_PAD)
    cost = pl.CostEstimate(
        flops=flops,
        transcendentals=Bp * (LAT_PAD + IN_PAD),                 # exp + sigmoid
        bytes_accessed=weight_bytes
        + 4 * Bp * (IN_PAD + LAT_PAD)                            # x, eps in
        + 4 * Bp * (IN_PAD + 2 * LAT_PAD),                       # recon, mu, logvar out
    )

    recon_p, mu_p, logvar_p = pl.pallas_call(
        kernel,
        grid=grid,
        out_shape=(
            jax.ShapeDtypeStruct((Bp, IN_PAD), jnp.float32),
            jax.ShapeDtypeStruct((Bp, LAT_PAD), jnp.float32),
            jax.ShapeDtypeStruct((Bp, LAT_PAD), jnp.float32),
        ),
        in_specs=[
            batch_spec(IN_PAD),                      # x
            batch_spec(LAT_PAD),                     # eps
            resident_spec((IN_PAD, HID_PAD)),        # w1
            resident_spec((1, HID_PAD)),             # b1
            resident_spec((HID_PAD, 2 * LAT_PAD)),   # w2 (fc21 || fc22)
            resident_spec((1, 2 * LAT_PAD)),         # b2
            resident_spec((LAT_PAD, HID_PAD)),       # w3
            resident_spec((1, HID_PAD)),             # b3
            resident_spec((HID_PAD, HID_PAD)),       # w4
            resident_spec((1, HID_PAD)),             # b4
            resident_spec((HID_PAD, IN_PAD)),        # w5
            resident_spec((1, IN_PAD)),              # b5
        ],
        out_specs=(
            batch_spec(IN_PAD),
            batch_spec(LAT_PAD),
            batch_spec(LAT_PAD),
        ),
        compiler_params=pltpu.CompilerParams(
            dimension_semantics=("parallel",),
            vmem_limit_bytes=32 << 20,
        ),
        cost_estimate=cost,
    )(
        xp, epsp,
        packed["w1"], packed["b1"],
        packed["w2"], packed["b2"],
        packed["w3"], packed["b3"],
        packed["w4"], packed["b4"],
        packed["w5"], packed["b5"],
    )

    recon = recon_p[:B, :IN_RAW].reshape(-1, 1, 28, 28)    # decode(..., square=True)
    mu = mu_p[:B, :LAT_RAW]
    logvar = logvar_p[:B, :LAT_RAW]
    if latent:
        return recon, mu, logvar
    return recon


# ------------------------- deterministic parameters ------------------------ #
def init_params(key):
    """PyTorch-default-style init: U(-1/sqrt(fan_in), 1/sqrt(fan_in)).

    Weights stored transposed vs torch, i.e. (in_features, out_features);
    biases as (out,)."""
    dims = {
        "1": (784, 500),
        "21": (500, 20),
        "22": (500, 20),
        "3": (20, 500),
        "4": (500, 500),
        "5": (500, 784),
    }
    params = {}
    keys = jax.random.split(key, 2 * len(dims))
    for i, (name, (fan_in, fan_out)) in enumerate(dims.items()):
        bound = 1.0 / (fan_in ** 0.5)
        params[f"w{name}"] = jax.random.uniform(
            keys[2 * i], (fan_in, fan_out), jnp.float32, -bound, bound)
        params[f"b{name}"] = jax.random.uniform(
            keys[2 * i + 1], (fan_out,), jnp.float32, -bound, bound)
    return params


def pack_params(params):
    """Pad to lane-friendly shapes, fuse fc21/fc22, cast weights to bf16."""
    def pad_w(w, rows, cols):
        out = jnp.zeros((rows, cols), jnp.float32)
        return out.at[:w.shape[0], :w.shape[1]].set(w).astype(jnp.bfloat16)

    def pad_b(b, cols):
        return jnp.zeros((1, cols), jnp.float32).at[0, :b.shape[0]].set(b)

    packed = {
        "w1": pad_w(params["w1"], IN_PAD, HID_PAD),
        "b1": pad_b(params["b1"], HID_PAD),
        "w3": pad_w(params["w3"], LAT_PAD, HID_PAD),
        "b3": pad_b(params["b3"], HID_PAD),
        "w4": pad_w(params["w4"], HID_PAD, HID_PAD),
        "b4": pad_b(params["b4"], HID_PAD),
        "w5": pad_w(params["w5"], HID_PAD, IN_PAD),
        "b5": pad_b(params["b5"], IN_PAD),
    }
    # Fused fc21 || fc22: mu in lanes [0:128), logvar in lanes [128:256).
    w2 = jnp.zeros((HID_PAD, 2 * LAT_PAD), jnp.float32)
    w2 = w2.at[:HID_RAW, :LAT_RAW].set(params["w21"])
    w2 = w2.at[:HID_RAW, LAT_PAD:LAT_PAD + LAT_RAW].set(params["w22"])
    b2 = jnp.zeros((1, 2 * LAT_PAD), jnp.float32)
    b2 = b2.at[0, :LAT_RAW].set(params["b21"])
    b2 = b2.at[0, LAT_PAD:LAT_PAD + LAT_RAW].set(params["b22"])
    packed["w2"] = w2.astype(jnp.bfloat16)
    packed["b2"] = b2
    return packed


# ------------------------------ pure-JAX ref -------------------------------- #
def mnist_vae_reference(x_nchw, params, eps, *, leaky_relu=True):
    slope = 0.1 if leaky_relu else 0.0
    nonlin = lambda v: jnp.where(v > 0, v, slope * v)
    x = x_nchw.reshape(-1, IN_RAW).astype(jnp.float32)
    h1 = nonlin(x @ params["w1"] + params["b1"])
    mu = h1 @ params["w21"] + params["b21"]
    logvar = h1 @ params["w22"] + params["b22"]
    z = eps * jnp.exp(0.5 * logvar) + mu
    h3 = nonlin(z @ params["w3"] + params["b3"])
    h4 = nonlin(h3 @ params["w4"] + params["b4"])
    recon = jax.nn.sigmoid(h4 @ params["w5"] + params["b5"])
    return recon.reshape(-1, 1, 28, 28), mu, logvar


# ---------------------------------- main ----------------------------------- #
if __name__ == "__main__":
    root = jax.random.PRNGKey(0)
    k_params, k_x, k_eps = jax.random.split(root, 3)

    B = 2
    params = init_params(k_params)
    packed = pack_params(params)
    x = jax.random.uniform(k_x, (B, 1, 28, 28), jnp.float32)   # MNIST-like input
    eps = jax.random.normal(k_eps, (B, LAT_RAW), jnp.float32)  # torch.randn_like(std)

    recon, mu, logvar = mnist_vae_forward(
        x, packed, eps, leaky_relu=True, latent=True
    )
    jax.block_until_ready((recon, mu, logvar))

    assert recon.shape == (B, 1, 28, 28)
    assert mu.shape == (B, LAT_RAW) and logvar.shape == (B, LAT_RAW)
    assert bool(jnp.all((recon >= 0.0) & (recon <= 1.0)))

    # Loose tolerance: weights/activations are bf16 on the MXU inside the kernel.
    r_recon, r_mu, r_logvar = mnist_vae_reference(x, params, eps, leaky_relu=True)
    assert float(jnp.max(jnp.abs(recon - r_recon))) < 5e-2
    assert float(jnp.max(jnp.abs(mu - r_mu))) < 5e-2
    assert float(jnp.max(jnp.abs(logvar - r_logvar))) < 5e-2

    print("KERNEL_OK")
</pallas_src>

<mosaic_0001>
module attributes {stable_mosaic.version = 11 : i64} {
  func.func @_vae_forward_kernel(%arg0: i32, %arg1: memref<8x896xf32, #tpu.memory_space<vmem>>, %arg2: memref<8x128xf32, #tpu.memory_space<vmem>>, %arg3: memref<896x512xbf16, #tpu.memory_space<vmem>>, %arg4: memref<1x512xf32, #tpu.memory_space<vmem>>, %arg5: memref<512x256xbf16, #tpu.memory_space<vmem>>, %arg6: memref<1x256xf32, #tpu.memory_space<vmem>>, %arg7: memref<128x512xbf16, #tpu.memory_space<vmem>>, %arg8: memref<1x512xf32, #tpu.memory_space<vmem>>, %arg9: memref<512x512xbf16, #tpu.memory_space<vmem>>, %arg10: memref<1x512xf32, #tpu.memory_space<vmem>>, %arg11: memref<512x896xbf16, #tpu.memory_space<vmem>>, %arg12: memref<1x896xf32, #tpu.memory_space<vmem>>, %arg13: memref<8x896xf32, #tpu.memory_space<vmem>>, %arg14: memref<8x128xf32, #tpu.memory_space<vmem>>, %arg15: memref<8x128xf32, #tpu.memory_space<vmem>>) attributes {dimension_semantics = [#tpu.dimension_semantics<parallel>], iteration_bounds = array<i64: 1>, scalar_prefetch = 0 : i64, scratch_operands = 0 : i64, tpu.core_type = #tpu.core_type<tc>, window_params = [{transform_indices = @transform_0, window_bounds = array<i64: 8, 896>}, {transform_indices = @transform_1, window_bounds = array<i64: 8, 128>}, {pipeline_mode = #tpu.pipeline_mode<synchronous>, transform_indices = @transform_2, window_bounds = array<i64: 896, 512>}, {pipeline_mode = #tpu.pipeline_mode<synchronous>, transform_indices = @transform_3, window_bounds = array<i64: 1, 512>}, {pipeline_mode = #tpu.pipeline_mode<synchronous>, transform_indices = @transform_4, window_bounds = array<i64: 512, 256>}, {pipeline_mode = #tpu.pipeline_mode<synchronous>, transform_indices = @transform_5, window_bounds = array<i64: 1, 256>}, {pipeline_mode = #tpu.pipeline_mode<synchronous>, transform_indices = @transform_6, window_bounds = array<i64: 128, 512>}, {pipeline_mode = #tpu.pipeline_mode<synchronous>, transform_indices = @transform_7, window_bounds = array<i64: 1, 512>}, {pipeline_mode = #tpu.pipeline_mode<synchronous>, transform_indices = @transform_8, window_bounds = array<i64: 512, 512>}, {pipeline_mode = #tpu.pipeline_mode<synchronous>, transform_indices = @transform_9, window_bounds = array<i64: 1, 512>}, {pipeline_mode = #tpu.pipeline_mode<synchronous>, transform_indices = @transform_10, window_bounds = array<i64: 512, 896>}, {pipeline_mode = #tpu.pipeline_mode<synchronous>, transform_indices = @transform_11, window_bounds = array<i64: 1, 896>}, {transform_indices = @transform_12, window_bounds = array<i64: 8, 896>}, {transform_indices = @transform_13, window_bounds = array<i64: 8, 128>}, {transform_indices = @transform_14, window_bounds = array<i64: 8, 128>}]} {
    %c0 = arith.constant 0 : index
    %c0_0 = arith.constant 0 : index
    %0 = vector.load %arg1[%c0, %c0_0] : memref<8x896xf32, #tpu.memory_space<vmem>>, vector<8x896xf32>
    %1 = arith.truncf %0 : vector<8x896xf32> to vector<8x896xbf16>
    %c0_1 = arith.constant 0 : index
    %c0_2 = arith.constant 0 : index
    %2 = vector.load %arg3[%c0_1, %c0_2] : memref<896x512xbf16, #tpu.memory_space<vmem>>, vector<896x512xbf16>
    %cst = arith.constant dense<0.000000e+00> : vector<8x512xf32>
    %3 = tpu.matmul %1, %2, %cst {dimension_numbers = #tpu.dot_dimension_numbers<[1], [0], [0], [1], [0, 0, 1, 1], [], []>} : vector<8x896xbf16>, vector<896x512xbf16>, vector<8x512xf32> -> vector<8x512xf32>
    %c0_3 = arith.constant 0 : index
    %c0_4 = arith.constant 0 : index
    %4 = vector.load %arg4[%c0_3, %c0_4] : memref<1x512xf32, #tpu.memory_space<vmem>>, vector<1x512xf32>
    %5 = vector.broadcast %4 : vector<1x512xf32> to vector<8x512xf32>
    %6 = arith.addf %3, %5 : vector<8x512xf32>
    %cst_5 = arith.constant 0.000000e+00 : f32
    %7 = vector.broadcast %cst_5 : f32 to vector<8x512xf32>
    %8 = arith.cmpf ogt, %6, %7 : vector<8x512xf32>
    %cst_6 = arith.constant 1.000000e-01 : f32
    %9 = vector.broadcast %cst_6 : f32 to vector<8x512xf32>
    %10 = arith.mulf %9, %6 : vector<8x512xf32>
    %11 = arith.select %8, %6, %10 : vector<8x512xi1>, vector<8x512xf32>
    %12 = arith.truncf %11 : vector<8x512xf32> to vector<8x512xbf16>
    %c0_7 = arith.constant 0 : index
    %c0_8 = arith.constant 0 : index
    %13 = vector.load %arg5[%c0_7, %c0_8] : memref<512x256xbf16, #tpu.memory_space<vmem>>, vector<512x256xbf16>
    %cst_9 = arith.constant dense<0.000000e+00> : vector<8x256xf32>
    %14 = tpu.matmul %12, %13, %cst_9 {dimension_numbers = #tpu.dot_dimension_numbers<[1], [0], [0], [1], [0, 0, 1, 1], [], []>} : vector<8x512xbf16>, vector<512x256xbf16>, vector<8x256xf32> -> vector<8x256xf32>
    %c0_10 = arith.constant 0 : index
    %c0_11 = arith.constant 0 : index
    %15 = vector.load %arg6[%c0_10, %c0_11] : memref<1x256xf32, #tpu.memory_space<vmem>>, vector<1x256xf32>
    %16 = vector.broadcast %15 : vector<1x256xf32> to vector<8x256xf32>
    %17 = arith.addf %14, %16 : vector<8x256xf32>
    %18 = vector.extract_strided_slice %17 {offsets = [0, 0], sizes = [8, 128], strides = [1, 1]} : vector<8x256xf32> to vector<8x128xf32>
    %19 = vector.extract_strided_slice %17 {offsets = [0, 128], sizes = [8, 128], strides = [1, 1]} : vector<8x256xf32> to vector<8x128xf32>
    %cst_12 = arith.constant 5.000000e-01 : f32
    %20 = vector.broadcast %cst_12 : f32 to vector<8x128xf32>
    %21 = arith.mulf %20, %19 : vector<8x128xf32>
    %22 = math.exp %21 : vector<8x128xf32>
    %c0_13 = arith.constant 0 : index
    %c0_14 = arith.constant 0 : index
    %23 = vector.load %arg2[%c0_13, %c0_14] : memref<8x128xf32, #tpu.memory_space<vmem>>, vector<8x128xf32>
    %24 = arith.mulf %23, %22 : vector<8x128xf32>
    %25 = arith.addf %24, %18 : vector<8x128xf32>
    %26 = arith.truncf %25 : vector<8x128xf32> to vector<8x128xbf16>
    %c0_15 = arith.constant 0 : index
    %c0_16 = arith.constant 0 : index
    %27 = vector.load %arg7[%c0_15, %c0_16] : memref<128x512xbf16, #tpu.memory_space<vmem>>, vector<128x512xbf16>
    %cst_17 = arith.constant dense<0.000000e+00> : vector<8x512xf32>
    %28 = tpu.matmul %26, %27, %cst_17 {dimension_numbers = #tpu.dot_dimension_numbers<[1], [0], [0], [1], [0, 0, 1, 1], [], []>} : vector<8x128xbf16>, vector<128x512xbf16>, vector<8x512xf32> -> vector<8x512xf32>
    %c0_18 = arith.constant 0 : index
    %c0_19 = arith.constant 0 : index
    %29 = vector.load %arg8[%c0_18, %c0_19] : memref<1x512xf32, #tpu.memory_space<vmem>>, vector<1x512xf32>
    %30 = vector.broadcast %29 : vector<1x512xf32> to vector<8x512xf32>
    %31 = arith.addf %28, %30 : vector<8x512xf32>
    %cst_20 = arith.constant 0.000000e+00 : f32
    %32 = vector.broadcast %cst_20 : f32 to vector<8x512xf32>
    %33 = arith.cmpf ogt, %31, %32 : vector<8x512xf32>
    %cst_21 = arith.constant 1.000000e-01 : f32
    %34 = vector.broadcast %cst_21 : f32 to vector<8x512xf32>
    %35 = arith.mulf %34, %31 : vector<8x512xf32>
    %36 = arith.select %33, %31, %35 : vector<8x512xi1>, vector<8x512xf32>
    %37 = arith.truncf %36 : vector<8x512xf32> to vector<8x512xbf16>
    %c0_22 = arith.constant 0 : index
    %c0_23 = arith.constant 0 : index
    %38 = vector.load %arg9[%c0_22, %c0_23] : memref<512x512xbf16, #tpu.memory_space<vmem>>, vector<512x512xbf16>
    %cst_24 = arith.constant dense<0.000000e+00> : vector<8x512xf32>
    %39 = tpu.matmul %37, %38, %cst_24 {dimension_numbers = #tpu.dot_dimension_numbers<[1], [0], [0], [1], [0, 0, 1, 1], [], []>} : vector<8x512xbf16>, vector<512x512xbf16>, vector<8x512xf32> -> vector<8x512xf32>
    %c0_25 = arith.constant 0 : index
    %c0_26 = arith.constant 0 : index
    %40 = vector.load %arg10[%c0_25, %c0_26] : memref<1x512xf32, #tpu.memory_space<vmem>>, vector<1x512xf32>
    %41 = vector.broadcast %40 : vector<1x512xf32> to vector<8x512xf32>
    %42 = arith.addf %39, %41 : vector<8x512xf32>
    %cst_27 = arith.constant 0.000000e+00 : f32
    %43 = vector.broadcast %cst_27 : f32 to vector<8x512xf32>
    %44 = arith.cmpf ogt, %42, %43 : vector<8x512xf32>
    %cst_28 = arith.constant 1.000000e-01 : f32
    %45 = vector.broadcast %cst_28 : f32 to vector<8x512xf32>
    %46 = arith.mulf %45, %42 : vector<8x512xf32>
    %47 = arith.select %44, %42, %46 : vector<8x512xi1>, vector<8x512xf32>
    %48 = arith.truncf %47 : vector<8x512xf32> to vector<8x512xbf16>
    %c0_29 = arith.constant 0 : index
    %c0_30 = arith.constant 0 : index
    %49 = vector.load %arg11[%c0_29, %c0_30] : memref<512x896xbf16, #tpu.memory_space<vmem>>, vector<512x896xbf16>
    %cst_31 = arith.constant dense<0.000000e+00> : vector<8x896xf32>
    %50 = tpu.matmul %48, %49, %cst_31 {dimension_numbers = #tpu.dot_dimension_numbers<[1], [0], [0], [1], [0, 0, 1, 1], [], []>} : vector<8x512xbf16>, vector<512x896xbf16>, vector<8x896xf32> -> vector<8x896xf32>
    %c0_32 = arith.constant 0 : index
    %c0_33 = arith.constant 0 : index
    %51 = vector.load %arg12[%c0_32, %c0_33] : memref<1x896xf32, #tpu.memory_space<vmem>>, vector<1x896xf32>
    %52 = vector.broadcast %51 : vector<1x896xf32> to vector<8x896xf32>
    %53 = arith.addf %50, %52 : vector<8x896xf32>
    %54 = arith.negf %53 : vector<8x896xf32>
    %55 = math.exp %54 : vector<8x896xf32>
    %cst_34 = arith.constant 1.000000e+00 : f32
    %56 = vector.broadcast %cst_34 : f32 to vector<8x896xf32>
    %57 = arith.addf %56, %55 : vector<8x896xf32>
    %58 = arith.divf %56, %57 : vector<8x896xf32>
    %c0_35 = arith.constant 0 : index
    %c0_36 = arith.constant 0 : index
    %59 = vector.load %arg13[%c0_35, %c0_36] : memref<8x896xf32, #tpu.memory_space<vmem>>, vector<8x896xf32>
    tpu.vector_store %arg13[%c0_35, %c0_36], %58 {strides = array<i32>} : memref<8x896xf32, #tpu.memory_space<vmem>>, vector<8x896xf32>,
    %c0_37 = arith.constant 0 : index
    %c0_38 = arith.constant 0 : index
    %60 = vector.load %arg14[%c0_37, %c0_38] : memref<8x128xf32, #tpu.memory_space<vmem>>, vector<8x128xf32>
    tpu.vector_store %arg14[%c0_37, %c0_38], %18 {strides = array<i32>} : memref<8x128xf32, #tpu.memory_space<vmem>>, vector<8x128xf32>,
    %c0_39 = arith.constant 0 : index
    %c0_40 = arith.constant 0 : index
    %61 = vector.load %arg15[%c0_39, %c0_40] : memref<8x128xf32, #tpu.memory_space<vmem>>, vector<8x128xf32>
    tpu.vector_store %arg15[%c0_39, %c0_40], %19 {strides = array<i32>} : memref<8x128xf32, #tpu.memory_space<vmem>>, vector<8x128xf32>,
    return
  }
  func.func @transform_0(%arg0: i32) -> (i32, i32) {
    %c0_i32 = arith.constant 0 : i32
    %c0_i32_0 = arith.constant 0 : i32
    return %arg0, %c0_i32 : i32, i32
  }
  func.func @transform_1(%arg0: i32) -> (i32, i32) {
    %c0_i32 = arith.constant 0 : i32
    %c0_i32_0 = arith.constant 0 : i32
    return %arg0, %c0_i32 : i32, i32
  }
  func.func @transform_2(%arg0: i32) -> (i32, i32) {
    %c0_i32 = arith.constant 0 : i32
    %c0_i32_0 = arith.constant 0 : i32
    %c0_i32_1 = arith.constant 0 : i32
    return %c0_i32, %c0_i32_0 : i32, i32
  }
  func.func @transform_3(%arg0: i32) -> (i32, i32) {
    %c0_i32 = arith.constant 0 : i32
    %c0_i32_0 = arith.constant 0 : i32
    %c0_i32_1 = arith.constant 0 : i32
    return %c0_i32, %c0_i32_0 : i32, i32
  }
  func.func @transform_4(%arg0: i32) -> (i32, i32) {
    %c0_i32 = arith.constant 0 : i32
    %c0_i32_0 = arith.constant 0 : i32
    %c0_i32_1 = arith.constant 0 : i32
    return %c0_i32, %c0_i32_0 : i32, i32
  }
  func.func @transform_5(%arg0: i32) -> (i32, i32) {
    %c0_i32 = arith.constant 0 : i32
    %c0_i32_0 = arith.constant 0 : i32
    %c0_i32_1 = arith.constant 0 : i32
    return %c0_i32, %c0_i32_0 : i32, i32
  }
  func.func @transform_6(%arg0: i32) -> (i32, i32) {
    %c0_i32 = arith.constant 0 : i32
    %c0_i32_0 = arith.constant 0 : i32
    %c0_i32_1 = arith.constant 0 : i32
    return %c0_i32, %c0_i32_0 : i32, i32
  }
  func.func @transform_7(%arg0: i32) -> (i32, i32) {
    %c0_i32 = arith.constant 0 : i32
    %c0_i32_0 = arith.constant 0 : i32
    %c0_i32_1 = arith.constant 0 : i32
    return %c0_i32, %c0_i32_0 : i32, i32
  }
  func.func @transform_8(%arg0: i32) -> (i32, i32) {
    %c0_i32 = arith.constant 0 : i32
    %c0_i32_0 = arith.constant 0 : i32
    %c0_i32_1 = arith.constant 0 : i32
    return %c0_i32, %c0_i32_0 : i32, i32
  }
  func.func @transform_9(%arg0: i32) -> (i32, i32) {
    %c0_i32 = arith.constant 0 : i32
    %c0_i32_0 = arith.constant 0 : i32
    %c0_i32_1 = arith.constant 0 : i32
    return %c0_i32, %c0_i32_0 : i32, i32
  }
  func.func @transform_10(%arg0: i32) -> (i32, i32) {
    %c0_i32 = arith.constant 0 : i32
    %c0_i32_0 = arith.constant 0 : i32
    %c0_i32_1 = arith.constant 0 : i32
    return %c0_i32, %c0_i32_0 : i32, i32
  }
  func.func @transform_11(%arg0: i32) -> (i32, i32) {
    %c0_i32 = arith.constant 0 : i32
    %c0_i32_0 = arith.constant 0 : i32
    %c0_i32_1 = arith.constant 0 : i32
    return %c0_i32, %c0_i32_0 : i32, i32
  }
  func.func @transform_12(%arg0: i32) -> (i32, i32) {
    %c0_i32 = arith.constant 0 : i32
    %c0_i32_0 = arith.constant 0 : i32
    return %arg0, %c0_i32 : i32, i32
  }
  func.func @transform_13(%arg0: i32) -> (i32, i32) {
    %c0_i32 = arith.constant 0 : i32
    %c0_i32_0 = arith.constant 0 : i32
    return %arg0, %c0_i32 : i32, i32
  }
  func.func @transform_14(%arg0: i32) -> (i32, i32) {
    %c0_i32 = arith.constant 0 : i32
    %c0_i32_0 = arith.constant 0 : i32
    return %arg0, %c0_i32 : i32, i32
  }
}

</mosaic_0001>

<bundles_post_ra>
// kernel: tpu_custom_call.1
= control target key start
LH: loop header
LB: loop body
LE: loop exit
PB: predicated region body
PF: predicated region fallthrough
CT: control target
= control target key end

     0   :  { %20 = vsyncpa [#allocation3], 0  ;;  %s7903_s0 = inlined_call_operand.hbm [shape: f32[8,896], index: 0, kind: input, shape index: {}]   ;;  %s7904_s1 = inlined_call_operand.hbm [shape: f32[8,128], index: 1, kind: input, shape index: {}]   ;;  %s7905_s2 = inlined_call_operand.hbm [shape: bf16[896,512], index: 2, kind: input, shape index: {}]   ;;  %s7906_s3 = inlined_call_operand.vmem [shape: f32[1,512], index: 3, kind: input, shape index: {}]   ;;  %s7907_s4 = inlined_call_operand.hbm [shape: bf16[512,256], index: 4, kind: input, shape index: {}]   ;;  %s7908_s5 = inlined_call_operand.vmem [shape: f32[1,256], index: 5, kind: input, shape index: {}]   ;;  %s7909_s6 = inlined_call_operand.hbm [shape: bf16[128,512], index: 6, kind: input, shape index: {}]   ;;  %s7910_s7 = inlined_call_operand.vmem [shape: f32[1,512], index: 7, kind: input, shape index: {}]   ;;  %s7911_s8 = inlined_call_operand.hbm [shape: bf16[512,512], index: 8, kind: input, shape index: {}]   ;;  %s7912_s9 = inlined_call_operand.vmem [shape: f32[1,512], index: 9, kind: input, shape index: {}]   ;;  %s7913_s10 = inlined_call_operand.hbm [shape: bf16[512,896], index: 10, kind: input, shape index: {}]   ;;  %s7914_s11 = inlined_call_operand.vmem [shape: f32[1,896], index: 11, kind: input, shape index: {}]   ;;  %s7915_s12 = inlined_call_operand.hbm [shape: f32[8,896], index: 12, kind: output, shape index: {0}]   ;;  %s7916_s13 = inlined_call_operand.hbm [shape: f32[8,128], index: 13, kind: output, shape index: {1}]   ;;  %s7917_s14 = inlined_call_operand.hbm [shape: f32[8,128], index: 14, kind: output, shape index: {2}]  }
   0x1   :  { %21 = vsyncpa [#allocation6], 0 }
   0x2   :  { %22 = vsyncpa [#allocation9], 0 }
   0x3   :  { %23 = vsyncpa [#allocation12], 0 }
   0x4   :  { %24 = vsyncpa [#allocation4], 0 }
   0x5   :  { %25 = vsyncpa [#allocation16], 0  ;;  %s7554_s29 = smov [#allocation5]   ;;  %s7555_s15 = smov [#allocation8]  }
   0x6   :  { %s42_s30 = sshll.u32 %s7554_s29, 4  ;;  %s65_s16 = sshll.u32 %s7555_s15, 4  ;;  %s43_s30 = int_to_ptr.vmem [resolvable:$true] %s42_s30  ;;  %s7646_s16 = int_to_ptr.vmem [resolvable:$true] %s65_s16 }
   0x7   :  { %s7322_s19 = scalar_lea.hbm %s7904_s1, 128 }
   0x8   :  { %p7323_p0 = scmp.ne.s32.totalorder %s7904_s1, %s7322_s19  ;;  %p7326_p1 = scmp.lt.u32.totalorder %s7322_s19, %s7904_s1 }
   0xa   :  { %p7328_p2 = pnand %p7326_p1, %p7323_p0 }
   0xc   :  { %7331 = shalt.err (!%p7328_p2)
}
   0xd   :  { %s7332_s24 = scalar_lea.vmem %s43_s30, 128  ;;  %p7337_p4 = scmp.lt.s32.totalorder %s43_s30, %s43_s30 }
   0xe   :  { %p7333_p3 = scmp.ne.s32.totalorder %s43_s30, %s7332_s24  ;;  %p7338_p5 = scmp.lt.s32.totalorder %s7332_s24, %s7332_s24 }
  0x10   :  { %p7339_p6 = por %p7338_p5, %p7337_p4 }
  0x12   :  { %p7340_p7 = pnand %p7339_p6, %p7333_p3 }
  0x14   :  { %7343 = shalt.err (!%p7340_p7)
}
  0x15   :  { %45 = dma.hbm_to_vmem [thread:$0]  %s7904_s1, 128, %s43_s30, [#allocation6]  }
  0x16   :  { %s7344_s29 = scalar_lea.hbm %s7907_s4, 8192 }
  0x17   :  { %p7345_p8 = scmp.ne.s32.totalorder %s7907_s4, %s7344_s29  ;;  %p7348_p9 = scmp.lt.u32.totalorder %s7344_s29, %s7907_s4 }
  0x19   :  { %p7350_p10 = pnand %p7348_p9, %p7345_p8 }
  0x1b   :  { %7353 = shalt.err (!%p7350_p10)
}
  0x1c   :  { %s7354_s20 = scalar_lea.vmem %s7646_s16, 8192  ;;  %p7359_p12 = scmp.lt.s32.totalorder %s7646_s16, %s7646_s16 }
  0x1d   :  { %p7355_p11 = scmp.ne.s32.totalorder %s7646_s16, %s7354_s20  ;;  %p7360_p13 = scmp.lt.s32.totalorder %s7354_s20, %s7354_s20 }
  0x1f   :  { %p7361_p0 = por %p7360_p13, %p7359_p12 }
  0x21   :  { %p7362_p1 = pnand %p7361_p0, %p7355_p11 }
  0x23   :  { %7365 = shalt.err (!%p7362_p1)
}
  0x24   :  { %s7556_s1 = smov 128   ;;  %s7557_s30 = smov 8  }
  0x25   :  { %71 = dma.hbm_to_vmem [thread:$0]  %s7907_s4, 8192, %s7646_s16, [#allocation9], %s7556_s1, %s7556_s1, %s7557_s30  }
  0x26   :  { %s7558_s23 = smov [#allocation11]   ;;  %s7559_s25 = smov [#allocation2]  }
  0x27   :  { %s93_s24 = sshll.u32 %s7558_s23, 4  ;;  %s32_s26 = sshll.u32 %s7559_s25, 4  ;;  %s94_s24 = int_to_ptr.vmem [resolvable:$true] %s93_s24  ;;  %s33_s26 = int_to_ptr.vmem [resolvable:$true] %s32_s26 }
  0x28   :  { %s7366_s29 = scalar_lea.hbm %s7911_s8, 16384 }
  0x29   :  { %p7367_p2 = scmp.ne.s32.totalorder %s7911_s8, %s7366_s29  ;;  %p7370_p3 = scmp.lt.u32.totalorder %s7366_s29, %s7911_s8 }
  0x2b   :  { %p7372_p4 = pnand %p7370_p3, %p7367_p2 }
  0x2d   :  { %7375 = shalt.err (!%p7372_p4)
}
  0x2e   :  { %s7376_s4 = scalar_lea.vmem %s94_s24, 16384  ;;  %p7381_p6 = scmp.lt.s32.totalorder %s94_s24, %s94_s24 }
  0x2f   :  { %p7377_p5 = scmp.ne.s32.totalorder %s94_s24, %s7376_s4  ;;  %p7382_p7 = scmp.lt.s32.totalorder %s7376_s4, %s7376_s4 }
  0x31   :  { %p7383_p8 = por %p7382_p7, %p7381_p6 }
  0x33   :  { %p7384_p9 = pnand %p7383_p8, %p7377_p5 }
  0x35   :  { %7387 = shalt.err (!%p7384_p9)
}
  0x36   :  { %s7560_s16 = smov 256   ;;  %s7561_s20 = smov 16  }
  0x37   :  { %99 = dma.hbm_to_vmem [thread:$0]  %s7911_s8, 16384, %s94_s24, [#allocation12], %s7560_s16, %s7560_s16, %s7561_s20  }
  0x38   :  { %s7388_s23 = scalar_lea.hbm %s7903_s0, 896 }
  0x39   :  { %p7389_p10 = scmp.ne.s32.totalorder %s7903_s0, %s7388_s23  ;;  %p7392_p11 = scmp.lt.u32.totalorder %s7388_s23, %s7903_s0 }
  0x3b   :  { %p7394_p12 = pnand %p7392_p11, %p7389_p10 }
  0x3d   :  { %7397 = shalt.err (!%p7394_p12)
}
  0x3e   :  { %s7398_s15 = scalar_lea.vmem %s33_s26, 896  ;;  %p7403_p0 = scmp.lt.s32.totalorder %s33_s26, %s33_s26 }
  0x3f   :  { %p7399_p13 = scmp.ne.s32.totalorder %s33_s26, %s7398_s15  ;;  %p7404_p1 = scmp.lt.s32.totalorder %s7398_s15, %s7398_s15 }
  0x41   :  { %p7405_p2 = por %p7404_p1, %p7403_p0 }
  0x43   :  { %p7406_p3 = pnand %p7405_p2, %p7399_p13 }
  0x45   :  { %7409 = shalt.err (!%p7406_p3)
}
  0x46   :  { %35 = dma.hbm_to_vmem [thread:$0]  %s7903_s0, 896, %s33_s26, [#allocation3]  }
  0x47   :  { %s7562_s17 = smov [#allocation7]   ;;  %s7563_s19 = smov [#allocation10]  }
  0x48   :  { %s51_s18 = sshll.u32 %s7562_s17, 4  ;;  %s79_s4 = sshll.u32 %s7563_s19, 4  ;;  %s52_s18 = int_to_ptr.vmem [resolvable:$true] %s51_s18  ;;  %s7704_s4 = int_to_ptr.vmem [resolvable:$true] %s79_s4 }
  0x49   :  { %s7410_s21 = scalar_lea.hbm %s7905_s2, 28672 }
  0x4a   :  { %p7411_p4 = scmp.ne.s32.totalorder %s7905_s2, %s7410_s21  ;;  %p7414_p5 = scmp.lt.u32.totalorder %s7410_s21, %s7905_s2 }
  0x4c   :  { %p7416_p6 = pnand %p7414_p5, %p7411_p4 }
  0x4e   :  { %7419 = shalt.err (!%p7416_p6)
}
  0x4f   :  { %s7420_s0 = scalar_lea.vmem %s52_s18, 28672  ;;  %p7425_p8 = scmp.lt.s32.totalorder %s52_s18, %s52_s18 }
  0x50   :  { %p7421_p7 = scmp.ne.s32.totalorder %s52_s18, %s7420_s0  ;;  %p7426_p9 = scmp.lt.s32.totalorder %s7420_s0, %s7420_s0 }
  0x52   :  { %p7427_p10 = por %p7426_p9, %p7425_p8 }
  0x54   :  { %p7428_p11 = pnand %p7427_p10, %p7421_p7 }
  0x56   :  { %7431 = shalt.err (!%p7428_p11)
}
  0x57   :  { %57 = dma.hbm_to_vmem [thread:$0]  %s7905_s2, 28672, %s52_s18, [#allocation6], %s7560_s16, %s7560_s16, %s7561_s20  }
  0x58   :  { %s7432_s8 = scalar_lea.hbm %s7909_s6, 4096 }
  0x59   :  { %p7433_p12 = scmp.ne.s32.totalorder %s7909_s6, %s7432_s8  ;;  %p7436_p13 = scmp.lt.u32.totalorder %s7432_s8, %s7909_s6 }
  0x5b   :  { %p7438_p0 = pnand %p7436_p13, %p7433_p12 }
  0x5d   :  { %7441 = shalt.err (!%p7438_p0)
}
  0x5e   :  { %s7442_s30 = scalar_lea.vmem %s7704_s4, 4096  ;;  %p7447_p2 = scmp.lt.s32.totalorder %s7704_s4, %s7704_s4 }
  0x5f   :  { %p7443_p1 = scmp.ne.s32.totalorder %s7704_s4, %s7442_s30  ;;  %p7448_p3 = scmp.lt.s32.totalorder %s7442_s30, %s7442_s30 }
  0x61   :  { %p7449_p4 = por %p7448_p3, %p7447_p2 }
  0x63   :  { %p7450_p5 = pnand %p7449_p4, %p7443_p1 }
  0x65   :  { %7453 = shalt.err (!%p7450_p5)
}
  0x66   :  { %85 = dma.hbm_to_vmem [thread:$0]  %s7909_s6, 4096, %s7704_s4, [#allocation9], %s7560_s16, %s7560_s16, %s7561_s20  }
  0x67   :  { %s7564_s21 = smov [#allocation13]   ;;  %s7454_s27 = scalar_lea.hbm %s7913_s10, 28672 }
  0x68   :  { %s107_s22 = sshll.u32 %s7564_s21, 4  ;;  %p7455_p6 = scmp.ne.s32.totalorder %s7913_s10, %s7454_s27  ;;  %s108_s22 = int_to_ptr.vmem [resolvable:$true] %s107_s22 }
  0x69   :  { %p7458_p7 = scmp.lt.u32.totalorder %s7454_s27, %s7913_s10 }
  0x6b   :  { %p7460_p8 = pnand %p7458_p7, %p7455_p6 }
  0x6d   :  { %7463 = shalt.err (!%p7460_p8)
}
  0x6e   :  { %s7464_s15 = scalar_lea.vmem %s108_s22, 28672  ;;  %p7469_p10 = scmp.lt.s32.totalorder %s108_s22, %s108_s22 }
  0x6f   :  { %p7465_p9 = scmp.ne.s32.totalorder %s108_s22, %s7464_s15  ;;  %p7470_p11 = scmp.lt.s32.totalorder %s7464_s15, %s7464_s15 }
  0x71   :  { %p7471_p12 = por %p7470_p11, %p7469_p10 }
  0x73   :  { %p7472_p13 = pnand %p7471_p12, %p7465_p9 }
  0x75   :  { %7475 = shalt.err (!%p7472_p13)
}
  0x76   :  { %s7565_s6 = smov 448   ;;  %s7566_s16 = smov 28  }
  0x77   :  { %113 = dma.hbm_to_vmem [thread:$0]  %s7913_s10, 28672, %s108_s22, [#allocation12], %s7565_s6, %s7565_s6, %s7566_s16  }
  0x78   :  { %7542 = dma.done.wait [#allocation3], 896  }
  0x79   :  { %7543 = vsyncadd [#allocation3], 4294966400 }
  0x7a   :  { %7544 = dma.done.wait [#allocation6], 28800  }
  0x7b   :  { %7545 = vsyncadd [#allocation6], 4294938496 }
  0x7c   :  { %7546 = dma.done.wait [#allocation9], 12288  }
  0x7d   :  { %7547 = vsyncadd [#allocation9], 4294955008 }
  0x7e   :  { %7548 = dma.done.wait [#allocation12], 45056  }
  0x7f   :  { %7549 = vsyncadd [#allocation12], 4294922240  ;;  %v6300_v0 = vld [vmem:[#allocation7 + $0x4] ss:$16 sps:$4 sm:$0xff]   ;;  %v6302_v1 = vld [vmem:[#allocation7 + $0xc] ss:$16 sps:$4 sm:$0xff]  }
  0x80   :  { %1518 = vmatprep.subr.bf16.mxu0 %v6300_v0  ;;  %v6304_v2 = vld [vmem:[#allocation7] ss:$16 sps:$4 sm:$0xff]   ;;  %v6305_v3 = vld [vmem:[#allocation7 + $0x8] ss:$16 sps:$4 sm:$0xff]   ;;  %1682 = vmatprep.subr.bf16.mxu1 %v6302_v1  ;;  %v6306_v4 = vld [vmem:[#allocation7 + $0x24] ss:$16 sps:$4 sm:$0xff]  }
  0x81   :  { %1519 = vmatpush1.bf16.msra.mxu0 %v6304_v2  ;;  %1683 = vmatpush1.bf16.msra.mxu1 %v6305_v3  ;;  %v6308_v5 = vld [vmem:[#allocation7 + $0x2c] ss:$16 sps:$4 sm:$0xff]   ;;  %v6310_v6 = vld [vmem:[#allocation7 + $0x20] ss:$16 sps:$4 sm:$0xff]   ;;  %v6311_v7 = vld [vmem:[#allocation7 + $0x28] ss:$16 sps:$4 sm:$0xff]  }
  0x82   :  { %1520 = vmatprep.subr.bf16.mxu0 %v6306_v4  ;;  %1684 = vmatprep.subr.bf16.mxu1 %v6308_v5  ;;  %v6312_v8 = vld [vmem:[#allocation7 + $0x44] ss:$16 sps:$4 sm:$0xff]   ;;  %v6314_v9 = vld [vmem:[#allocation7 + $0x4c] ss:$16 sps:$4 sm:$0xff]   ;;  %v6316_v10 = vld [vmem:[#allocation7 + $0x40] ss:$16 sps:$4 sm:$0xff]  }
  0x83   :  { %v6317_v11 = vld [vmem:[#allocation7 + $0x48] ss:$16 sps:$4 sm:$0xff]   ;;  %v6318_v12 = vld [vmem:[#allocation7 + $0x64] ss:$16 sps:$4 sm:$0xff]   ;;  %v6320_v13 = vld [vmem:[#allocation7 + $0x6c] ss:$16 sps:$4 sm:$0xff]  }
  0x84   :  { %v6322_v14 = vld [vmem:[#allocation7 + $0x60] ss:$16 sps:$4 sm:$0xff]   ;;  %v6323_v15 = vld [vmem:[#allocation7 + $0x68] ss:$16 sps:$4 sm:$0xff]   ;;  %v6324_v16 = vld [vmem:[#allocation7 + $0x84] ss:$16 sps:$4 sm:$0xff]  }
  0x85   :  { %1521 = vmatpush1.bf16.msra.mxu0 %v6310_v6  ;;  %1685 = vmatpush1.bf16.msra.mxu1 %v6311_v7  ;;  %v6326_v17 = vld [vmem:[#allocation7 + $0x8c] ss:$16 sps:$4 sm:$0xff]   ;;  %v6328_v18 = vld [vmem:[#allocation7 + $0x80] ss:$16 sps:$4 sm:$0xff]   ;;  %v6329_v19 = vld [vmem:[#allocation7 + $0x88] ss:$16 sps:$4 sm:$0xff]  }
  0x86   :  { %1522 = vmatprep.subr.bf16.mxu0 %v6312_v8  ;;  %1686 = vmatprep.subr.bf16.mxu1 %v6314_v9  ;;  %v6330_v20 = vld [vmem:[#allocation7 + $0xa4] ss:$16 sps:$4 sm:$0xff]   ;;  %v6332_v21 = vld [vmem:[#allocation7 + $0xac] ss:$16 sps:$4 sm:$0xff]   ;;  %v6334_v22 = vld [vmem:[#allocation7 + $0xa0] ss:$16 sps:$4 sm:$0xff]  }
  0x87   :  { %v6335_v23 = vld [vmem:[#allocation7 + $0xa8] ss:$16 sps:$4 sm:$0xff]   ;;  %v6336_v24 = vld [vmem:[#allocation7 + $0xc4] ss:$16 sps:$4 sm:$0xff]   ;;  %v6338_v25 = vld [vmem:[#allocation7 + $0xcc] ss:$16 sps:$4 sm:$0xff]  }
  0x88   :  { %v6340_v26 = vld [vmem:[#allocation7 + $0xc0] ss:$16 sps:$4 sm:$0xff]   ;;  %v6341_v27 = vld [vmem:[#allocation7 + $0xc8] ss:$16 sps:$4 sm:$0xff]   ;;  %v6342_v28 = vld [vmem:[#allocation7 + $0xe4] ss:$16 sps:$4 sm:$0xff]  }
  0x89   :  { %1523 = vmatpush1.bf16.msra.mxu0 %v6316_v10  ;;  %1687 = vmatpush1.bf16.msra.mxu1 %v6317_v11  ;;  %v6344_v29 = vld [vmem:[#allocation7 + $0xec] ss:$16 sps:$4 sm:$0xff]   ;;  %v6346_v30 = vld [vmem:[#allocation7 + $0xe0] ss:$16 sps:$4 sm:$0xff]   ;;  %v6347_v31 = vld [vmem:[#allocation7 + $0xe8] ss:$16 sps:$4 sm:$0xff]  }
  0x8a   :  { %1524 = vmatprep.subr.bf16.mxu0 %v6318_v12  ;;  %1688 = vmatprep.subr.bf16.mxu1 %v6320_v13  ;;  %v6348_v32 = vld [vmem:[#allocation7 + $0x104] ss:$16 sps:$4 sm:$0xff]   ;;  %v6350_v33 = vld [vmem:[#allocation7 + $0x10c] ss:$16 sps:$4 sm:$0xff]   ;;  %v6352_v34 = vld [vmem:[#allocation7 + $0x100] ss:$16 sps:$4 sm:$0xff]  }
  0x8b   :  { %v6353_v35 = vld [vmem:[#allocation7 + $0x108] ss:$16 sps:$4 sm:$0xff]   ;;  %v6354_v36 = vld [vmem:[#allocation7 + $0x124] ss:$16 sps:$4 sm:$0xff]   ;;  %v6356_v37 = vld [vmem:[#allocation7 + $0x12c] ss:$16 sps:$4 sm:$0xff]  }
  0x8c   :  { %v6358_v38 = vld [vmem:[#allocation7 + $0x120] ss:$16 sps:$4 sm:$0xff]   ;;  %v6359_v39 = vld [vmem:[#allocation7 + $0x128] ss:$16 sps:$4 sm:$0xff]   ;;  %v6360_v40 = vld [vmem:[#allocation7 + $0x144] ss:$16 sps:$4 sm:$0xff]  }
  0x8d   :  { %1525 = vmatpush1.bf16.msra.mxu0 %v6322_v14  ;;  %1689 = vmatpush1.bf16.msra.mxu1 %v6323_v15  ;;  %v6362_v41 = vld [vmem:[#allocation7 + $0x14c] ss:$16 sps:$4 sm:$0xff]   ;;  %v6364_v42 = vld [vmem:[#allocation7 + $0x140] ss:$16 sps:$4 sm:$0xff]   ;;  %v6365_v43 = vld [vmem:[#allocation7 + $0x148] ss:$16 sps:$4 sm:$0xff]  }
  0x8e   :  { %1526 = vmatprep.subr.bf16.mxu0 %v6324_v16  ;;  %1690 = vmatprep.subr.bf16.mxu1 %v6326_v17  ;;  %v6366_v44 = vld [vmem:[#allocation7 + $0x164] ss:$16 sps:$4 sm:$0xff]   ;;  %v6368_v45 = vld [vmem:[#allocation7 + $0x16c] ss:$16 sps:$4 sm:$0xff]   ;;  %v6370_v47 = vld [vmem:[#allocation7 + $0x160] ss:$16 sps:$4 sm:$0xff]  }
  0x8f   :  { %v139_v46 = vld [vmem:[#allocation2 + $0x8] sm:$0xff]  ;;  %v6372_v50 = vld [vmem:[#allocation7 + $0x184] ss:$16 sps:$4 sm:$0xff]   ;;  %v6376_v52 = vld [vmem:[#allocation7 + $0x180] ss:$16 sps:$4 sm:$0xff]  }
  0x90   :  { %v146_v48 = vpack.c.bf16 %v139_v46, %v139_v46  ;;  %v6371_v49 = vld [vmem:[#allocation7 + $0x168] ss:$16 sps:$4 sm:$0xff]   ;;  %v6374_v51 = vld [vmem:[#allocation7 + $0x18c] ss:$16 sps:$4 sm:$0xff]   ;;  %v6378_v54 = vld [vmem:[#allocation7 + $0x1a4] ss:$16 sps:$4 sm:$0xff]  }
  0x91   :  { %1527 = vmatpush1.bf16.msra.mxu0 %v6328_v18  ;;  %1691 = vmatpush1.bf16.msra.mxu1 %v6329_v19  ;;  %v6377_v53 = vld [vmem:[#allocation7 + $0x188] ss:$16 sps:$4 sm:$0xff]   ;;  %v6380_v55 = vld [vmem:[#allocation7 + $0x1ac] ss:$16 sps:$4 sm:$0xff]   ;;  %v6382_v56 = vld [vmem:[#allocation7 + $0x1a0] ss:$16 sps:$4 sm:$0xff]  }
  0x92   :  { %1528 = vmatprep.subr.bf16.mxu0 %v6330_v20  ;;  %1692 = vmatprep.subr.bf16.mxu1 %v6332_v21  ;;  %v6383_v57 = vld [vmem:[#allocation7 + $0x1a8] ss:$16 sps:$4 sm:$0xff]   ;;  %v6384_v58 = vld [vmem:[#allocation7 + $0x1c4] ss:$16 sps:$4 sm:$0xff]   ;;  %v6386_v59 = vld [vmem:[#allocation7 + $0x1cc] ss:$16 sps:$4 sm:$0xff]  }
  0x93   :  { %1550 = vmatprep.mubr.bf16.mxu0 %v146_v48  ;;  %1714 = vmatprep.mubr.bf16.mxu1 %v146_v48  ;;  %v6388_v60 = vld [vmem:[#allocation7 + $0x1c0] ss:$16 sps:$4 sm:$0xff]   ;;  %v6389_v61 = vld [vmem:[#allocation7 + $0x1c8] ss:$16 sps:$4 sm:$0xff]   ;;  %v6390_v62 = vld [vmem:[#allocation7 + $0x1e4] ss:$16 sps:$4 sm:$0xff]  }
  0x94   :  { %v6392_v63 = vld [vmem:[#allocation7 + $0x1ec] ss:$16 sps:$4 sm:$0xff]   ;;  %v6394_v0 = vld [vmem:[#allocation7 + $0x1e0] ss:$16 sps:$4 sm:$0xff]   ;;  %v6395_v1 = vld [vmem:[#allocation7 + $0x1e8] ss:$16 sps:$4 sm:$0xff]  }
  0x95   :  { %1529 = vmatpush1.bf16.msra.mxu0 %v6334_v22  ;;  %1693 = vmatpush1.bf16.msra.mxu1 %v6335_v23  ;;  %v138_v2 = vld [vmem:[#allocation2] sm:$0xff]  ;;  %v6401_v4 = vld [vmem:[#allocation7 + $0x20c] ss:$16 sps:$4 sm:$0xff]   ;;  %v6399_v7 = vld [vmem:[#allocation7 + $0x208] ss:$16 sps:$4 sm:$0xff]  }
  0x96   :  { %1530 = vmatprep.subr.bf16.mxu0 %v6336_v24  ;;  %1694 = vmatprep.subr.bf16.mxu1 %v6338_v25  ;;  %v6398_v3 = vld [vmem:[#allocation7 + $0x204] ss:$16 sps:$4 sm:$0xff]   ;;  %v145_v5 = vpack.c.bf16 %v138_v2, %v138_v2  ;;  %v6396_v6 = vld [vmem:[#allocation7 + $0x200] ss:$16 sps:$4 sm:$0xff]   ;;  %v6407_v9 = vld [vmem:[#allocation7 + $0x22c] ss:$16 sps:$4 sm:$0xff]  }
  0x97   :  { %v6404_v8 = vld [vmem:[#allocation7 + $0x224] ss:$16 sps:$4 sm:$0xff]   ;;  %v6402_v10 = vld [vmem:[#allocation7 + $0x220] ss:$16 sps:$4 sm:$0xff]   ;;  %v6405_v11 = vld [vmem:[#allocation7 + $0x228] ss:$16 sps:$4 sm:$0xff]  }
  0x98   :  { %v6410_v12 = vld [vmem:[#allocation7 + $0x244] ss:$16 sps:$4 sm:$0xff]   ;;  %v6413_v13 = vld [vmem:[#allocation7 + $0x24c] ss:$16 sps:$4 sm:$0xff]   ;;  %v6408_v14 = vld [vmem:[#allocation7 + $0x240] ss:$16 sps:$4 sm:$0xff]  }
  0x99   :  { %1531 = vmatpush1.bf16.msra.mxu0 %v6340_v26  ;;  %1695 = vmatpush1.bf16.msra.mxu1 %v6341_v27  ;;  %v6411_v15 = vld [vmem:[#allocation7 + $0x248] ss:$16 sps:$4 sm:$0xff]   ;;  %v6416_v16 = vld [vmem:[#allocation7 + $0x264] ss:$16 sps:$4 sm:$0xff]   ;;  %v6419_v17 = vld [vmem:[#allocation7 + $0x26c] ss:$16 sps:$4 sm:$0xff]  }
  0x9a   :  { %1532 = vmatprep.subr.bf16.mxu0 %v6342_v28  ;;  %1696 = vmatprep.subr.bf16.mxu1 %v6344_v29  ;;  %v6414_v18 = vld [vmem:[#allocation7 + $0x260] ss:$16 sps:$4 sm:$0xff]   ;;  %v6417_v19 = vld [vmem:[#allocation7 + $0x268] ss:$16 sps:$4 sm:$0xff]   ;;  %v6422_v20 = vld [vmem:[#allocation7 + $0x284] ss:$16 sps:$4 sm:$0xff]  }
  0x9b   :  { %v6425_v21 = vld [vmem:[#allocation7 + $0x28c] ss:$16 sps:$4 sm:$0xff]   ;;  %v6420_v22 = vld [vmem:[#allocation7 + $0x280] ss:$16 sps:$4 sm:$0xff]   ;;  %v6423_v23 = vld [vmem:[#allocation7 + $0x288] ss:$16 sps:$4 sm:$0xff]  }
  0x9c   :  { %v6428_v24 = vld [vmem:[#allocation7 + $0x2a4] ss:$16 sps:$4 sm:$0xff]   ;;  %v6431_v25 = vld [vmem:[#allocation7 + $0x2ac] ss:$16 sps:$4 sm:$0xff]   ;;  %v6426_v26 = vld [vmem:[#allocation7 + $0x2a0] ss:$16 sps:$4 sm:$0xff]  }
  0x9d   :  { %1533 = vmatpush1.bf16.msra.mxu0 %v6346_v30  ;;  %1697 = vmatpush1.bf16.msra.mxu1 %v6347_v31  ;;  %v6429_v27 = vld [vmem:[#allocation7 + $0x2a8] ss:$16 sps:$4 sm:$0xff]   ;;  %v6434_v28 = vld [vmem:[#allocation7 + $0x2c4] ss:$16 sps:$4 sm:$0xff]   ;;  %v6437_v29 = vld [vmem:[#allocation7 + $0x2cc] ss:$16 sps:$4 sm:$0xff]  }
  0x9e   :  { %1534 = vmatprep.subr.bf16.mxu0 %v6348_v32  ;;  %1698 = vmatprep.subr.bf16.mxu1 %v6350_v33  ;;  %v141_v30 = vld [vmem:[#allocation2 + $0x18] sm:$0xff]  ;;  %v6432_v31 = vld [vmem:[#allocation7 + $0x2c0] ss:$16 sps:$4 sm:$0xff]   ;;  %v6458_v46 = vld [vmem:[#allocation7 + $0x344] ss:$16 sps:$4 sm:$0xff]  }
  0x9f   :  { %v148_v32 = vpack.c.bf16 %v141_v30, %v141_v30  ;;  %v6435_v33 = vld [vmem:[#allocation7 + $0x2c8] ss:$16 sps:$4 sm:$0xff]   ;;  %v6456_v48 = vld [vmem:[#allocation7 + $0x340] ss:$16 sps:$4 sm:$0xff]   ;;  %v6488_v2 = vld [vmem:[#allocation7 + $0x3e4] ss:$16 sps:$4 sm:$0xff]  }
  0xa0   :  { %v6524_v30 = vld [vmem:[#allocation7 + $0x4a4] ss:$16 sps:$4 sm:$0xff]  }
  0xa1   :  { %1535 = vmatpush1.bf16.msra.mxu0 %v6352_v34  ;;  %1699 = vmatpush1.bf16.msra.mxu1 %v6353_v35  ;;  %v6440_v34 = vld [vmem:[#allocation7 + $0x2e4] ss:$16 sps:$4 sm:$0xff]   ;;  %v6443_v35 = vld [vmem:[#allocation7 + $0x2ec] ss:$16 sps:$4 sm:$0xff]  }
  0xa2   :  { %1536 = vmatprep.subr.bf16.mxu0 %v6354_v36  ;;  %1700 = vmatprep.subr.bf16.mxu1 %v6356_v37  ;;  %v6438_v36 = vld [vmem:[#allocation7 + $0x2e0] ss:$16 sps:$4 sm:$0xff]   ;;  %v6441_v37 = vld [vmem:[#allocation7 + $0x2e8] ss:$16 sps:$4 sm:$0xff]  }
  0xa5   :  { %1537 = vmatpush1.bf16.msra.mxu0 %v6358_v38  ;;  %1701 = vmatpush1.bf16.msra.mxu1 %v6359_v39  ;;  %v6446_v38 = vld [vmem:[#allocation7 + $0x304] ss:$16 sps:$4 sm:$0xff]   ;;  %v6449_v39 = vld [vmem:[#allocation7 + $0x30c] ss:$16 sps:$4 sm:$0xff]  }
  0xa6   :  { %1538 = vmatprep.subr.bf16.mxu0 %v6360_v40  ;;  %1702 = vmatprep.subr.bf16.mxu1 %v6362_v41  ;;  %v6444_v40 = vld [vmem:[#allocation7 + $0x300] ss:$16 sps:$4 sm:$0xff]   ;;  %v6447_v41 = vld [vmem:[#allocation7 + $0x308] ss:$16 sps:$4 sm:$0xff]  }
  0xa9   :  { %1539 = vmatpush1.bf16.msra.mxu0 %v6364_v42  ;;  %1703 = vmatpush1.bf16.msra.mxu1 %v6365_v43  ;;  %v6452_v42 = vld [vmem:[#allocation7 + $0x324] ss:$16 sps:$4 sm:$0xff]   ;;  %v6455_v43 = vld [vmem:[#allocation7 + $0x32c] ss:$16 sps:$4 sm:$0xff]  }
  0xaa   :  { %1540 = vmatprep.subr.bf16.mxu0 %v6366_v44  ;;  %1704 = vmatprep.subr.bf16.mxu1 %v6368_v45  ;;  %v6450_v44 = vld [vmem:[#allocation7 + $0x320] ss:$16 sps:$4 sm:$0xff]   ;;  %v6453_v45 = vld [vmem:[#allocation7 + $0x328] ss:$16 sps:$4 sm:$0xff]  }
  0xad   :  { %1541 = vmatpush1.bf16.msra.mxu0 %v6370_v47  ;;  %1705 = vmatpush1.bf16.msra.mxu1 %v6371_v49  ;;  %v6461_v47 = vld [vmem:[#allocation7 + $0x34c] ss:$16 sps:$4 sm:$0xff]   ;;  %v6459_v49 = vld [vmem:[#allocation7 + $0x348] ss:$16 sps:$4 sm:$0xff]  }
  0xae   :  { %1542 = vmatprep.subr.bf16.mxu0 %v6372_v50  ;;  %1706 = vmatprep.subr.bf16.mxu1 %v6374_v51  ;;  %v6464_v50 = vld [vmem:[#allocation7 + $0x364] ss:$16 sps:$4 sm:$0xff]   ;;  %v6467_v51 = vld [vmem:[#allocation7 + $0x36c] ss:$16 sps:$4 sm:$0xff]  }
  0xb1   :  { %1543 = vmatpush1.bf16.msra.mxu0 %v6376_v52  ;;  %1707 = vmatpush1.bf16.msra.mxu1 %v6377_v53  ;;  %v6462_v52 = vld [vmem:[#allocation7 + $0x360] ss:$16 sps:$4 sm:$0xff]   ;;  %v6465_v53 = vld [vmem:[#allocation7 + $0x368] ss:$16 sps:$4 sm:$0xff]  }
  0xb2   :  { %1544 = vmatprep.subr.bf16.mxu0 %v6378_v54  ;;  %1708 = vmatprep.subr.bf16.mxu1 %v6380_v55  ;;  %v6470_v54 = vld [vmem:[#allocation7 + $0x384] ss:$16 sps:$4 sm:$0xff]   ;;  %v6473_v55 = vld [vmem:[#allocation7 + $0x38c] ss:$16 sps:$4 sm:$0xff]  }
  0xb5   :  { %1545 = vmatpush1.bf16.msra.mxu0 %v6382_v56  ;;  %1709 = vmatpush1.bf16.msra.mxu1 %v6383_v57  ;;  %v6468_v56 = vld [vmem:[#allocation7 + $0x380] ss:$16 sps:$4 sm:$0xff]   ;;  %v6471_v57 = vld [vmem:[#allocation7 + $0x388] ss:$16 sps:$4 sm:$0xff]  }
  0xb6   :  { %1546 = vmatprep.subr.bf16.mxu0 %v6384_v58  ;;  %1710 = vmatprep.subr.bf16.mxu1 %v6386_v59  ;;  %v6476_v58 = vld [vmem:[#allocation7 + $0x3a4] ss:$16 sps:$4 sm:$0xff]   ;;  %v6479_v59 = vld [vmem:[#allocation7 + $0x3ac] ss:$16 sps:$4 sm:$0xff]  }
  0xb9   :  { %1547 = vmatpush1.bf16.msra.mxu0 %v6388_v60  ;;  %1711 = vmatpush1.bf16.msra.mxu1 %v6389_v61  ;;  %v6474_v60 = vld [vmem:[#allocation7 + $0x3a0] ss:$16 sps:$4 sm:$0xff]   ;;  %v6477_v61 = vld [vmem:[#allocation7 + $0x3a8] ss:$16 sps:$4 sm:$0xff]  }
  0xba   :  { %1548 = vmatprep.subr.bf16.mxu0 %v6390_v62  ;;  %1712 = vmatprep.subr.bf16.mxu1 %v6392_v63  ;;  %v6482_v62 = vld [vmem:[#allocation7 + $0x3c4] ss:$16 sps:$4 sm:$0xff]   ;;  %v6485_v63 = vld [vmem:[#allocation7 + $0x3cc] ss:$16 sps:$4 sm:$0xff]  }
  0xbd   :  { %1549 = vmatpush1.bf16.msra.mxu0 %v6394_v0  ;;  %1713 = vmatpush1.bf16.msra.mxu1 %v6395_v1  ;;  %v6480_v0 = vld [vmem:[#allocation7 + $0x3c0] ss:$16 sps:$4 sm:$0xff]   ;;  %v6483_v1 = vld [vmem:[#allocation7 + $0x3c8] ss:$16 sps:$4 sm:$0xff]  }
  0xbe   :  { %1559 = vmatprep.subr.bf16.mxu0 %v6398_v3  ;;  %1723 = vmatprep.subr.bf16.mxu1 %v6401_v4  ;;  %v6491_v3 = vld [vmem:[#allocation7 + $0x3ec] ss:$16 sps:$4 sm:$0xff]   ;;  %v6486_v4 = vld [vmem:[#allocation7 + $0x3e0] ss:$16 sps:$4 sm:$0xff]  }
  0xc0   :  { %1551 = vmatmul.mubr.bf16.vlgmr.msra.gmra.mrb[0].mxu0 %v145_v5  ;;  %1715 = vmatmul.mubr.bf16.vlgmr.msra.gmra.mrb[0].mxu1 %v145_v5  ;;  %v6489_v5 = vld [vmem:[#allocation7 + $0x3e8] ss:$16 sps:$4 sm:$0xff]  }
  0xc1   :  { %1560 = vmatpush1.bf16.msra.mxu0 %v6396_v6  ;;  %1724 = vmatpush1.bf16.msra.mxu1 %v6399_v7  ;;  %v6494_v6 = vld [vmem:[#allocation7 + $0x404] ss:$16 sps:$4 sm:$0xff]  }
  0xc2   :  { %1561 = vmatprep.subr.bf16.mxu0 %v6404_v8  ;;  %1725 = vmatprep.subr.bf16.mxu1 %v6407_v9  ;;  %v140_v7 = vld [vmem:[#allocation2 + $0x10] sm:$0xff]  ;;  %v6497_v8 = vld [vmem:[#allocation7 + $0x40c] ss:$16 sps:$4 sm:$0xff]  }
  0xc3   :  { %1591 = vmatprep.mubr.bf16.mxu0 %v148_v32  ;;  %1755 = vmatprep.mubr.bf16.mxu1 %v148_v32  ;;  %v6492_v9 = vld [vmem:[#allocation7 + $0x400] ss:$16 sps:$4 sm:$0xff]  }
  0xc4   :  { %v6522_v32 = vld [vmem:[#allocation7 + $0x4a0] ss:$16 sps:$4 sm:$0xff]  }
  0xc5   :  { %1562 = vmatpush1.bf16.msra.mxu0 %v6402_v10  ;;  %1726 = vmatpush1.bf16.msra.mxu1 %v6405_v11  ;;  %v6495_v10 = vld [vmem:[#allocation7 + $0x408] ss:$16 sps:$4 sm:$0xff]   ;;  %v147_v11 = vpack.c.bf16 %v140_v7, %v140_v7  ;;  %v6587_v7 = vld [vmem:[#allocation7 + $0x5ec] ss:$16 sps:$4 sm:$0xff]  }
  0xc6   :  { %1563 = vmatprep.subr.bf16.mxu0 %v6410_v12  ;;  %1727 = vmatprep.subr.bf16.mxu1 %v6413_v13  ;;  %v6500_v12 = vld [vmem:[#allocation7 + $0x424] ss:$16 sps:$4 sm:$0xff]   ;;  %v6503_v13 = vld [vmem:[#allocation7 + $0x42c] ss:$16 sps:$4 sm:$0xff]  }
  0xc9   :  { %1564 = vmatpush1.bf16.msra.mxu0 %v6408_v14  ;;  %1728 = vmatpush1.bf16.msra.mxu1 %v6411_v15  ;;  %v143_v14 = vld [vmem:[#allocation2 + $0x28] sm:$0xff] }
  0xca   :  { %1565 = vmatprep.subr.bf16.mxu0 %v6416_v16  ;;  %1729 = vmatprep.subr.bf16.mxu1 %v6419_v17  ;;  %v150_v15 = vpack.c.bf16 %v143_v14, %v143_v14  ;;  %v6498_v16 = vld [vmem:[#allocation7 + $0x420] ss:$16 sps:$4 sm:$0xff]   ;;  %v6501_v17 = vld [vmem:[#allocation7 + $0x428] ss:$16 sps:$4 sm:$0xff]  }
  0xcb   :  { %v6591_v14 = vld [vmem:[#allocation7 + $0x608] ss:$16 sps:$4 sm:$0xff]  }
  0xcd   :  { %1566 = vmatpush1.bf16.msra.mxu0 %v6414_v18  ;;  %1730 = vmatpush1.bf16.msra.mxu1 %v6417_v19  ;;  %v6506_v18 = vld [vmem:[#allocation7 + $0x444] ss:$16 sps:$4 sm:$0xff]   ;;  %v6509_v19 = vld [vmem:[#allocation7 + $0x44c] ss:$16 sps:$4 sm:$0xff]  }
  0xce   :  { %1567 = vmatprep.subr.bf16.mxu0 %v6422_v20  ;;  %1731 = vmatprep.subr.bf16.mxu1 %v6425_v21  ;;  %v6504_v20 = vld [vmem:[#allocation7 + $0x440] ss:$16 sps:$4 sm:$0xff]   ;;  %v6507_v21 = vld [vmem:[#allocation7 + $0x448] ss:$16 sps:$4 sm:$0xff]  }
  0xd1   :  { %1568 = vmatpush1.bf16.msra.mxu0 %v6420_v22  ;;  %1732 = vmatpush1.bf16.msra.mxu1 %v6423_v23  ;;  %v6512_v22 = vld [vmem:[#allocation7 + $0x464] ss:$16 sps:$4 sm:$0xff]   ;;  %v6515_v23 = vld [vmem:[#allocation7 + $0x46c] ss:$16 sps:$4 sm:$0xff]  }
  0xd2   :  { %1569 = vmatprep.subr.bf16.mxu0 %v6428_v24  ;;  %1733 = vmatprep.subr.bf16.mxu1 %v6431_v25  ;;  %v6510_v24 = vld [vmem:[#allocation7 + $0x460] ss:$16 sps:$4 sm:$0xff]   ;;  %v6513_v25 = vld [vmem:[#allocation7 + $0x468] ss:$16 sps:$4 sm:$0xff]  }
  0xd5   :  { %1570 = vmatpush1.bf16.msra.mxu0 %v6426_v26  ;;  %1734 = vmatpush1.bf16.msra.mxu1 %v6429_v27  ;;  %v6518_v26 = vld [vmem:[#allocation7 + $0x484] ss:$16 sps:$4 sm:$0xff]   ;;  %v6521_v27 = vld [vmem:[#allocation7 + $0x48c] ss:$16 sps:$4 sm:$0xff]  }
  0xd6   :  { %1571 = vmatprep.subr.bf16.mxu0 %v6434_v28  ;;  %1735 = vmatprep.subr.bf16.mxu1 %v6437_v29  ;;  %v6516_v28 = vld [vmem:[#allocation7 + $0x480] ss:$16 sps:$4 sm:$0xff]   ;;  %v6519_v29 = vld [vmem:[#allocation7 + $0x488] ss:$16 sps:$4 sm:$0xff]  }
  0xd9   :  { %1572 = vmatpush1.bf16.msra.mxu0 %v6432_v31  ;;  %1736 = vmatpush1.bf16.msra.mxu1 %v6435_v33  ;;  %v6527_v31 = vld [vmem:[#allocation7 + $0x4ac] ss:$16 sps:$4 sm:$0xff]   ;;  %v6525_v33 = vld [vmem:[#allocation7 + $0x4a8] ss:$16 sps:$4 sm:$0xff]  }
  0xda   :  { %1573 = vmatprep.subr.bf16.mxu0 %v6440_v34  ;;  %1737 = vmatprep.subr.bf16.mxu1 %v6443_v35  ;;  %v6530_v34 = vld [vmem:[#allocation7 + $0x4c4] ss:$16 sps:$4 sm:$0xff]   ;;  %v6533_v35 = vld [vmem:[#allocation7 + $0x4cc] ss:$16 sps:$4 sm:$0xff]  }
  0xdd   :  { %1574 = vmatpush1.bf16.msra.mxu0 %v6438_v36  ;;  %1738 = vmatpush1.bf16.msra.mxu1 %v6441_v37  ;;  %v6528_v36 = vld [vmem:[#allocation7 + $0x4c0] ss:$16 sps:$4 sm:$0xff]   ;;  %v6531_v37 = vld [vmem:[#allocation7 + $0x4c8] ss:$16 sps:$4 sm:$0xff]  }
  0xde   :  { %1575 = vmatprep.subr.bf16.mxu0 %v6446_v38  ;;  %1739 = vmatprep.subr.bf16.mxu1 %v6449_v39  ;;  %v6536_v38 = vld [vmem:[#allocation7 + $0x4e4] ss:$16 sps:$4 sm:$0xff]   ;;  %v6539_v39 = vld [vmem:[#allocation7 + $0x4ec] ss:$16 sps:$4 sm:$0xff]  }
  0xe1   :  { %1576 = vmatpush1.bf16.msra.mxu0 %v6444_v40  ;;  %1740 = vmatpush1.bf16.msra.mxu1 %v6447_v41  ;;  %v6534_v40 = vld [vmem:[#allocation7 + $0x4e0] ss:$16 sps:$4 sm:$0xff]   ;;  %v6537_v41 = vld [vmem:[#allocation7 + $0x4e8] ss:$16 sps:$4 sm:$0xff]  }
  0xe2   :  { %1577 = vmatprep.subr.bf16.mxu0 %v6452_v42  ;;  %1741 = vmatprep.subr.bf16.mxu1 %v6455_v43  ;;  %v6542_v42 = vld [vmem:[#allocation7 + $0x504] ss:$16 sps:$4 sm:$0xff]   ;;  %v6545_v43 = vld [vmem:[#allocation7 + $0x50c] ss:$16 sps:$4 sm:$0xff]  }
  0xe5   :  { %1578 = vmatpush1.bf16.msra.mxu0 %v6450_v44  ;;  %1742 = vmatpush1.bf16.msra.mxu1 %v6453_v45  ;;  %v6540_v44 = vld [vmem:[#allocation7 + $0x500] ss:$16 sps:$4 sm:$0xff]   ;;  %v6543_v45 = vld [vmem:[#allocation7 + $0x508] ss:$16 sps:$4 sm:$0xff]  }
  0xe6   :  { %1579 = vmatprep.subr.bf16.mxu0 %v6458_v46  ;;  %1743 = vmatprep.subr.bf16.mxu1 %v6461_v47  ;;  %v6548_v46 = vld [vmem:[#allocation7 + $0x524] ss:$16 sps:$4 sm:$0xff]   ;;  %v6551_v47 = vld [vmem:[#allocation7 + $0x52c] ss:$16 sps:$4 sm:$0xff]  }
  0xe9   :  { %1580 = vmatpush1.bf16.msra.mxu0 %v6456_v48  ;;  %1744 = vmatpush1.bf16.msra.mxu1 %v6459_v49  ;;  %v6546_v48 = vld [vmem:[#allocation7 + $0x520] ss:$16 sps:$4 sm:$0xff]   ;;  %v6549_v49 = vld [vmem:[#allocation7 + $0x528] ss:$16 sps:$4 sm:$0xff]  }
  0xea   :  { %1581 = vmatprep.subr.bf16.mxu0 %v6464_v50  ;;  %1745 = vmatprep.subr.bf16.mxu1 %v6467_v51  ;;  %v6554_v50 = vld [vmem:[#allocation7 + $0x544] ss:$16 sps:$4 sm:$0xff]   ;;  %v6557_v51 = vld [vmem:[#allocation7 + $0x54c] ss:$16 sps:$4 sm:$0xff]  }
  0xed   :  { %1582 = vmatpush1.bf16.msra.mxu0 %v6462_v52  ;;  %1746 = vmatpush1.bf16.msra.mxu1 %v6465_v53  ;;  %v6552_v52 = vld [vmem:[#allocation7 + $0x540] ss:$16 sps:$4 sm:$0xff]   ;;  %v6555_v53 = vld [vmem:[#allocation7 + $0x548] ss:$16 sps:$4 sm:$0xff]  }
  0xee   :  { %1583 = vmatprep.subr.bf16.mxu0 %v6470_v54  ;;  %1747 = vmatprep.subr.bf16.mxu1 %v6473_v55  ;;  %v6560_v54 = vld [vmem:[#allocation7 + $0x564] ss:$16 sps:$4 sm:$0xff]   ;;  %v6563_v55 = vld [vmem:[#allocation7 + $0x56c] ss:$16 sps:$4 sm:$0xff]  }
  0xf1   :  { %1584 = vmatpush1.bf16.msra.mxu0 %v6468_v56  ;;  %1748 = vmatpush1.bf16.msra.mxu1 %v6471_v57  ;;  %v6558_v56 = vld [vmem:[#allocation7 + $0x560] ss:$16 sps:$4 sm:$0xff]   ;;  %v6561_v57 = vld [vmem:[#allocation7 + $0x568] ss:$16 sps:$4 sm:$0xff]  }
  0xf2   :  { %1585 = vmatprep.subr.bf16.mxu0 %v6476_v58  ;;  %1749 = vmatprep.subr.bf16.mxu1 %v6479_v59  ;;  %v6566_v58 = vld [vmem:[#allocation7 + $0x584] ss:$16 sps:$4 sm:$0xff]   ;;  %v6569_v59 = vld [vmem:[#allocation7 + $0x58c] ss:$16 sps:$4 sm:$0xff]  }
  0xf5   :  { %1586 = vmatpush1.bf16.msra.mxu0 %v6474_v60  ;;  %1750 = vmatpush1.bf16.msra.mxu1 %v6477_v61  ;;  %v6564_v60 = vld [vmem:[#allocation7 + $0x580] ss:$16 sps:$4 sm:$0xff]   ;;  %v6567_v61 = vld [vmem:[#allocation7 + $0x588] ss:$16 sps:$4 sm:$0xff]  }
  0xf6   :  { %1587 = vmatprep.subr.bf16.mxu0 %v6482_v62  ;;  %1751 = vmatprep.subr.bf16.mxu1 %v6485_v63  ;;  %v6572_v62 = vld [vmem:[#allocation7 + $0x5a4] ss:$16 sps:$4 sm:$0xff]   ;;  %v6575_v63 = vld [vmem:[#allocation7 + $0x5ac] ss:$16 sps:$4 sm:$0xff]  }
  0xf9   :  { %1588 = vmatpush1.bf16.msra.mxu0 %v6480_v0  ;;  %1752 = vmatpush1.bf16.msra.mxu1 %v6483_v1  ;;  %v6570_v0 = vld [vmem:[#allocation7 + $0x5a0] ss:$16 sps:$4 sm:$0xff]   ;;  %v6573_v1 = vld [vmem:[#allocation7 + $0x5a8] ss:$16 sps:$4 sm:$0xff]  }
  0xfa   :  { %1589 = vmatprep.subr.bf16.mxu0 %v6488_v2  ;;  %1753 = vmatprep.subr.bf16.mxu1 %v6491_v3  ;;  %v6578_v2 = vld [vmem:[#allocation7 + $0x5c4] ss:$16 sps:$4 sm:$0xff]   ;;  %v6581_v3 = vld [vmem:[#allocation7 + $0x5cc] ss:$16 sps:$4 sm:$0xff]  }
  0xfd   :  { %1590 = vmatpush1.bf16.msra.mxu0 %v6486_v4  ;;  %1754 = vmatpush1.bf16.msra.mxu1 %v6489_v5  ;;  %v6576_v4 = vld [vmem:[#allocation7 + $0x5c0] ss:$16 sps:$4 sm:$0xff]   ;;  %v6579_v5 = vld [vmem:[#allocation7 + $0x5c8] ss:$16 sps:$4 sm:$0xff]  }
  0xfe   :  { %1600 = vmatprep.subr.bf16.mxu0 %v6494_v6  ;;  %1764 = vmatprep.subr.bf16.mxu1 %v6497_v8  ;;  %v6584_v6 = vld [vmem:[#allocation7 + $0x5e4] ss:$16 sps:$4 sm:$0xff]   ;;  %v6582_v8 = vld [vmem:[#allocation7 + $0x5e0] ss:$16 sps:$4 sm:$0xff]  }
 0x100   :  { %1592 = vmatmul.mubr.bf16.vlgmr.msra.gmra.mrb[0].mxu0 %v147_v11  ;;  %1756 = vmatmul.mubr.bf16.vlgmr.msra.gmra.mrb[0].mxu1 %v147_v11  ;;  %v6590_v11 = vld [vmem:[#allocation7 + $0x604] ss:$16 sps:$4 sm:$0xff]  }
 0x101   :  { %1601 = vmatpush1.bf16.msra.mxu0 %v6492_v9  ;;  %1765 = vmatpush1.bf16.msra.mxu1 %v6495_v10  ;;  %v6585_v9 = vld [vmem:[#allocation7 + $0x5e8] ss:$16 sps:$4 sm:$0xff]   ;;  %v142_v10 = vld [vmem:[#allocation2 + $0x20] sm:$0xff] }
 0x102   :  { %1602 = vmatprep.subr.bf16.mxu0 %v6500_v12  ;;  %1766 = vmatprep.subr.bf16.mxu1 %v6503_v13  ;;  %v6593_v12 = vld [vmem:[#allocation7 + $0x60c] ss:$16 sps:$4 sm:$0xff]   ;;  %v6588_v13 = vld [vmem:[#allocation7 + $0x600] ss:$16 sps:$4 sm:$0xff]  }
 0x103   :  { %1632 = vmatprep.mubr.bf16.mxu0 %v150_v15  ;;  %1796 = vmatprep.mubr.bf16.mxu1 %v150_v15  ;;  %v149_v15 = vpack.c.bf16 %v142_v10, %v142_v10  ;;  %v6675_v10 = vld [vmem:[#allocation8 + $0xd0] ss:$8 sps:$4 sm:$0xff]  }
 0x105   :  { %1603 = vmatpush1.bf16.msra.mxu0 %v6498_v16  ;;  %1767 = vmatpush1.bf16.msra.mxu1 %v6501_v17  ;;  %v6596_v16 = vld [vmem:[#allocation7 + $0x624] ss:$16 sps:$4 sm:$0xff]   ;;  %v6599_v17 = vld [vmem:[#allocation7 + $0x62c] ss:$16 sps:$4 sm:$0xff]  }
 0x106   :  { %1604 = vmatprep.subr.bf16.mxu0 %v6506_v18  ;;  %1768 = vmatprep.subr.bf16.mxu1 %v6509_v19  ;;  %v6594_v18 = vld [vmem:[#allocation7 + $0x620] ss:$16 sps:$4 sm:$0xff]   ;;  %v6597_v19 = vld [vmem:[#allocation7 + $0x628] ss:$16 sps:$4 sm:$0xff]  }
 0x109   :  { %1605 = vmatpush1.bf16.msra.mxu0 %v6504_v20  ;;  %1769 = vmatpush1.bf16.msra.mxu1 %v6507_v21  ;;  %v6602_v20 = vld [vmem:[#allocation7 + $0x644] ss:$16 sps:$4 sm:$0xff]   ;;  %v6605_v21 = vld [vmem:[#allocation7 + $0x64c] ss:$16 sps:$4 sm:$0xff]  }
 0x10a   :  { %1606 = vmatprep.subr.bf16.mxu0 %v6512_v22  ;;  %1770 = vmatprep.subr.bf16.mxu1 %v6515_v23  ;;  %v6600_v22 = vld [vmem:[#allocation7 + $0x640] ss:$16 sps:$4 sm:$0xff]   ;;  %v6603_v23 = vld [vmem:[#allocation7 + $0x648] ss:$16 sps:$4 sm:$0xff]  }
 0x10d   :  { %1607 = vmatpush1.bf16.msra.mxu0 %v6510_v24  ;;  %1771 = vmatpush1.bf16.msra.mxu1 %v6513_v25  ;;  %v7567_v24 = vmov 0   ;;  %v6608_v25 = vld [vmem:[#allocation7 + $0x664] ss:$16 sps:$4 sm:$0xff]  }
 0x10e   :  { %1608 = vmatprep.subr.bf16.mxu0 %v6518_v26  ;;  %1772 = vmatprep.subr.bf16.mxu1 %v6521_v27  ;;  %v6611_v26 = vld [vmem:[#allocation7 + $0x66c] ss:$16 sps:$4 sm:$0xff]   ;;  %v6606_v27 = vld [vmem:[#allocation7 + $0x660] ss:$16 sps:$4 sm:$0xff]  }
 0x111   :  { %1609 = vmatpush1.bf16.msra.mxu0 %v6516_v28  ;;  %1773 = vmatpush1.bf16.msra.mxu1 %v6519_v29  ;;  %v6609_v28 = vld [vmem:[#allocation7 + $0x668] ss:$16 sps:$4 sm:$0xff]   ;;  %v6614_v29 = vld [vmem:[#allocation7 + $0x684] ss:$16 sps:$4 sm:$0xff]  }
 0x112   :  { %1610 = vmatprep.subr.bf16.mxu0 %v6524_v30  ;;  %1774 = vmatprep.subr.bf16.mxu1 %v6527_v31  ;;  %v6617_v30 = vld [vmem:[#allocation7 + $0x68c] ss:$16 sps:$4 sm:$0xff]   ;;  %v6612_v31 = vld [vmem:[#allocation7 + $0x680] ss:$16 sps:$4 sm:$0xff]  }
 0x115   :  { %1611 = vmatpush1.bf16.msra.mxu0 %v6522_v32  ;;  %1775 = vmatpush1.bf16.msra.mxu1 %v6525_v33  ;;  %v6615_v32 = vld [vmem:[#allocation7 + $0x688] ss:$16 sps:$4 sm:$0xff]   ;;  %v6620_v33 = vld [vmem:[#allocation7 + $0x6a4] ss:$16 sps:$4 sm:$0xff]  }
 0x116   :  { %1612 = vmatprep.subr.bf16.mxu0 %v6530_v34  ;;  %1776 = vmatprep.subr.bf16.mxu1 %v6533_v35  ;;  %v6623_v34 = vld [vmem:[#allocation7 + $0x6ac] ss:$16 sps:$4 sm:$0xff]   ;;  %v6618_v35 = vld [vmem:[#allocation7 + $0x6a0] ss:$16 sps:$4 sm:$0xff]  }
 0x119   :  { %1613 = vmatpush1.bf16.msra.mxu0 %v6528_v36  ;;  %1777 = vmatpush1.bf16.msra.mxu1 %v6531_v37  ;;  %v6621_v36 = vld [vmem:[#allocation7 + $0x6a8] ss:$16 sps:$4 sm:$0xff]   ;;  %v6626_v37 = vld [vmem:[#allocation7 + $0x6c4] ss:$16 sps:$4 sm:$0xff]  }
 0x11a   :  { %1614 = vmatprep.subr.bf16.mxu0 %v6536_v38  ;;  %1778 = vmatprep.subr.bf16.mxu1 %v6539_v39  ;;  %v6629_v38 = vld [vmem:[#allocation7 + $0x6cc] ss:$16 sps:$4 sm:$0xff]   ;;  %v6624_v39 = vld [vmem:[#allocation7 + $0x6c0] ss:$16 sps:$4 sm:$0xff]  }
 0x11d   :  { %1615 = vmatpush1.bf16.msra.mxu0 %v6534_v40  ;;  %1779 = vmatpush1.bf16.msra.mxu1 %v6537_v41  ;;  %v6627_v40 = vld [vmem:[#allocation7 + $0x6c8] ss:$16 sps:$4 sm:$0xff]   ;;  %v6632_v41 = vld [vmem:[#allocation7 + $0x6e4] ss:$16 sps:$4 sm:$0xff]  }
 0x11e   :  { %1616 = vmatprep.subr.bf16.mxu0 %v6542_v42  ;;  %1780 = vmatprep.subr.bf16.mxu1 %v6545_v43  ;;  %v6635_v42 = vld [vmem:[#allocation7 + $0x6ec] ss:$16 sps:$4 sm:$0xff]   ;;  %v6630_v43 = vld [vmem:[#allocation7 + $0x6e0] ss:$16 sps:$4 sm:$0xff]  }
 0x121   :  { %1617 = vmatpush1.bf16.msra.mxu0 %v6540_v44  ;;  %1781 = vmatpush1.bf16.msra.mxu1 %v6543_v45  ;;  %v6633_v44 = vld [vmem:[#allocation7 + $0x6e8] ss:$16 sps:$4 sm:$0xff]   ;;  %v144_v45 = vld [vmem:[#allocation2 + $0x30] sm:$0xff] }
 0x122   :  { %1618 = vmatprep.subr.bf16.mxu0 %v6548_v46  ;;  %1782 = vmatprep.subr.bf16.mxu1 %v6551_v47  ;;  %v6638_v46 = vld [vmem:[#allocation8 + $0x4] ss:$8 sps:$4 sm:$0xff]   ;;  %v6636_v47 = vld [vmem:[#allocation8] ss:$8 sps:$4 sm:$0xff]  }
 0x125   :  { %1619 = vmatpush1.bf16.msra.mxu0 %v6546_v48  ;;  %1783 = vmatpush1.bf16.msra.mxu1 %v6549_v49  ;;  %v151_v48 = vpack.c.bf16 %v144_v45, %v144_v45  ;;  %v6641_v49 = vld [vmem:[#allocation8 + $0x14] ss:$8 sps:$4 sm:$0xff]  }
 0x126   :  { %1620 = vmatprep.subr.bf16.mxu0 %v6554_v50  ;;  %1784 = vmatprep.subr.bf16.mxu1 %v6557_v51  ;;  %v6639_v50 = vld [vmem:[#allocation8 + $0x10] ss:$8 sps:$4 sm:$0xff]   ;;  %v6644_v51 = vld [vmem:[#allocation8 + $0x24] ss:$8 sps:$4 sm:$0xff]  }
 0x129   :  { %1621 = vmatpush1.bf16.msra.mxu0 %v6552_v52  ;;  %1785 = vmatpush1.bf16.msra.mxu1 %v6555_v53  ;;  %v6642_v52 = vld [vmem:[#allocation8 + $0x20] ss:$8 sps:$4 sm:$0xff]   ;;  %v6647_v53 = vld [vmem:[#allocation8 + $0x34] ss:$8 sps:$4 sm:$0xff]  }
 0x12a   :  { %1622 = vmatprep.subr.bf16.mxu0 %v6560_v54  ;;  %1786 = vmatprep.subr.bf16.mxu1 %v6563_v55  ;;  %v6645_v54 = vld [vmem:[#allocation8 + $0x30] ss:$8 sps:$4 sm:$0xff]   ;;  %v6650_v55 = vld [vmem:[#allocation8 + $0x44] ss:$8 sps:$4 sm:$0xff]  }
 0x12d   :  { %1623 = vmatpush1.bf16.msra.mxu0 %v6558_v56  ;;  %1787 = vmatpush1.bf16.msra.mxu1 %v6561_v57  ;;  %v6648_v56 = vld [vmem:[#allocation8 + $0x40] ss:$8 sps:$4 sm:$0xff]   ;;  %v6653_v57 = vld [vmem:[#allocation8 + $0x54] ss:$8 sps:$4 sm:$0xff]  }
 0x12e   :  { %1624 = vmatprep.subr.bf16.mxu0 %v6566_v58  ;;  %1788 = vmatprep.subr.bf16.mxu1 %v6569_v59  ;;  %v6651_v58 = vld [vmem:[#allocation8 + $0x50] ss:$8 sps:$4 sm:$0xff]   ;;  %v6656_v59 = vld [vmem:[#allocation8 + $0x64] ss:$8 sps:$4 sm:$0xff]  }
 0x131   :  { %1625 = vmatpush1.bf16.msra.mxu0 %v6564_v60  ;;  %1789 = vmatpush1.bf16.msra.mxu1 %v6567_v61  ;;  %v6654_v60 = vld [vmem:[#allocation8 + $0x60] ss:$8 sps:$4 sm:$0xff]   ;;  %v6659_v61 = vld [vmem:[#allocation8 + $0x74] ss:$8 sps:$4 sm:$0xff]  }
 0x132   :  { %1626 = vmatprep.subr.bf16.mxu0 %v6572_v62  ;;  %1790 = vmatprep.subr.bf16.mxu1 %v6575_v63  ;;  %v6657_v62 = vld [vmem:[#allocation8 + $0x70] ss:$8 sps:$4 sm:$0xff]   ;;  %v6662_v63 = vld [vmem:[#allocation8 + $0x84] ss:$8 sps:$4 sm:$0xff]  }
 0x135   :  { %1627 = vmatpush1.bf16.msra.mxu0 %v6570_v0  ;;  %1791 = vmatpush1.bf16.msra.mxu1 %v6573_v1  ;;  %v6660_v0 = vld [vmem:[#allocation8 + $0x80] ss:$8 sps:$4 sm:$0xff]   ;;  %v6665_v1 = vld [vmem:[#allocation8 + $0x94] ss:$8 sps:$4 sm:$0xff]  }
 0x136   :  { %1628 = vmatprep.subr.bf16.mxu0 %v6578_v2  ;;  %1792 = vmatprep.subr.bf16.mxu1 %v6581_v3  ;;  %v6663_v2 = vld [vmem:[#allocation8 + $0x90] ss:$8 sps:$4 sm:$0xff]   ;;  %v6668_v3 = vld [vmem:[#allocation8 + $0xa4] ss:$8 sps:$4 sm:$0xff]  }
 0x139   :  { %1629 = vmatpush1.bf16.msra.mxu0 %v6576_v4  ;;  %1793 = vmatpush1.bf16.msra.mxu1 %v6579_v5  ;;  %v6666_v4 = vld [vmem:[#allocation8 + $0xa0] ss:$8 sps:$4 sm:$0xff]   ;;  %v6671_v5 = vld [vmem:[#allocation8 + $0xb4] ss:$8 sps:$4 sm:$0xff]  }
 0x13a   :  { %1630 = vmatprep.subr.bf16.mxu0 %v6584_v6  ;;  %1794 = vmatprep.subr.bf16.mxu1 %v6587_v7  ;;  %v6669_v6 = vld [vmem:[#allocation8 + $0xb0] ss:$8 sps:$4 sm:$0xff]   ;;  %v6674_v7 = vld [vmem:[#allocation8 + $0xc4] ss:$8 sps:$4 sm:$0xff]  }
 0x13d   :  { %1631 = vmatpush1.bf16.msra.mxu0 %v6582_v8  ;;  %1795 = vmatpush1.bf16.msra.mxu1 %v6585_v9  ;;  %v6672_v8 = vld [vmem:[#allocation8 + $0xc0] ss:$8 sps:$4 sm:$0xff]   ;;  %v6677_v9 = vld [vmem:[#allocation8 + $0xd4] ss:$8 sps:$4 sm:$0xff]  }
 0x13e   :  { %1641 = vmatprep.subr.bf16.mxu0 %v6590_v11  ;;  %1805 = vmatprep.subr.bf16.mxu1 %v6593_v12  ;;  %v6680_v11 = vld [vmem:[#allocation8 + $0xe4] ss:$8 sps:$4 sm:$0xff]   ;;  %v6678_v12 = vld [vmem:[#allocation8 + $0xe0] ss:$8 sps:$4 sm:$0xff]  }
 0x140   :  { %1633 = vmatmul.mubr.bf16.vlgmr.msra.gmra.mrb[0].mxu0 %v149_v15  ;;  %1797 = vmatmul.mubr.bf16.vlgmr.msra.gmra.mrb[0].mxu1 %v149_v15  ;;  %v6686_v15 = vld [vmem:[#allocation8 + $0x104] ss:$8 sps:$4 sm:$0xff]  }
 0x141   :  { %1642 = vmatpush1.bf16.msra.mxu0 %v6588_v13  ;;  %1806 = vmatpush1.bf16.msra.mxu1 %v6591_v14  ;;  %v6683_v13 = vld [vmem:[#allocation8 + $0xf4] ss:$8 sps:$4 sm:$0xff]   ;;  %v6681_v14 = vld [vmem:[#allocation8 + $0xf0] ss:$8 sps:$4 sm:$0xff]  }
 0x142   :  { %1643 = vmatprep.subr.bf16.mxu0 %v6596_v16  ;;  %1807 = vmatprep.subr.bf16.mxu1 %v6599_v17  ;;  %v6732_v16 = vld [vmem:[#allocation10] ss:$16 sps:$4 sm:$0xff]   ;;  %v6734_v17 = vld [vmem:[#allocation10 + $0x4] ss:$16 sps:$4 sm:$0xff]  }
 0x143   :  { %1673 = vmatprep.mubr.bf16.mxu0 %v7567_v24  ;;  %1837 = vmatprep.mubr.bf16.mxu1 %v7567_v24 }
 0x145   :  { %1644 = vmatpush1.bf16.msra.mxu0 %v6594_v18  ;;  %1808 = vmatpush1.bf16.msra.mxu1 %v6597_v19  ;;  %v6737_v18 = vld [vmem:[#allocation10 + $0x24] ss:$16 sps:$4 sm:$0xff]   ;;  %v6735_v19 = vld [vmem:[#allocation10 + $0x20] ss:$16 sps:$4 sm:$0xff]  }
 0x146   :  { %1645 = vmatprep.subr.bf16.mxu0 %v6602_v20  ;;  %1809 = vmatprep.subr.bf16.mxu1 %v6605_v21  ;;  %v378_v20 = vlaneseq }
 0x148   :  { %v7756_v21 = vshrl.u32 %v378_v20, 7  ;;  %v6729_v20 = vld [vmem:[#allocation8 + $0x1f0] ss:$8 sps:$4 sm:$0xff]  }
 0x149   :  { %1646 = vmatpush1.bf16.msra.mxu0 %v6600_v22  ;;  %1810 = vmatpush1.bf16.msra.mxu1 %v6603_v23  ;;  %v7764_v23 = vld [vmem:[%s7906_s3] sm:$0xf] }
 0x14a   :  { %1647 = vmatprep.subr.bf16.mxu0 %v6608_v25  ;;  %1811 = vmatprep.subr.bf16.mxu1 %v6611_v26  ;;  %v7759_v22 = vsub.s32 0, %v7756_v21  ;;  %v7767_v25 = vsub.s32 1, %v7756_v21  ;;  %v7770_v26 = vsub.s32 3, %v7756_v21 }
 0x14d   :  { %1648 = vmatpush1.bf16.msra.mxu0 %v6606_v27  ;;  %1812 = vmatpush1.bf16.msra.mxu1 %v6609_v28  ;;  %v381_v27 = vrot.slane %v7764_v23, %v7759_v22  ;;  %v385_v28 = vrot.slane %v7764_v23, %v7767_v25 }
 0x14e   :  { %1649 = vmatprep.subr.bf16.mxu0 %v6614_v29  ;;  %1813 = vmatprep.subr.bf16.mxu1 %v6617_v30  ;;  %v393_v29 = vrot.slane %v7764_v23, %v7770_v26 }
 0x151   :  { %1650 = vmatpush1.bf16.msra.mxu0 %v6612_v31  ;;  %1814 = vmatpush1.bf16.msra.mxu1 %v6615_v32 }
 0x152   :  { %1651 = vmatprep.subr.bf16.mxu0 %v6620_v33  ;;  %1815 = vmatprep.subr.bf16.mxu1 %v6623_v34 }
 0x155   :  { %1652 = vmatpush1.bf16.msra.mxu0 %v6618_v35  ;;  %1816 = vmatpush1.bf16.msra.mxu1 %v6621_v36 }
 0x156   :  { %1653 = vmatprep.subr.bf16.mxu0 %v6626_v37  ;;  %1817 = vmatprep.subr.bf16.mxu1 %v6629_v38 }
 0x159   :  { %1654 = vmatpush1.bf16.msra.mxu0 %v6624_v39  ;;  %1818 = vmatpush1.bf16.msra.mxu1 %v6627_v40 }
 0x15a   :  { %1655 = vmatprep.subr.bf16.mxu0 %v6632_v41  ;;  %1819 = vmatprep.subr.bf16.mxu1 %v6635_v42 }
 0x15d   :  { %1656 = vmatpush1.bf16.msra.mxu0 %v6630_v43  ;;  %1820 = vmatpush1.bf16.msra.mxu1 %v6633_v44 }
 0x15e   :  { %2258 = vmatprep.subr.bf16.mxu0 %v6638_v46  ;;  %2561 = vmatprep.subr.bf16.mxu1 %v6734_v17  ;;  %v6726_v17 = vld [vmem:[#allocation8 + $0x1e0] ss:$8 sps:$4 sm:$0xff]  }
 0x160   :  { %1674 = vmatmul.mubr.bf16.vlgmr.msra.gmra.mrb[0].mxu0 %v151_v48  ;;  %1838 = vmatmul.mubr.bf16.vlgmr.msra.gmra.mrb[0].mxu1 %v151_v48  ;;  %v6684_v48 = vld [vmem:[#allocation8 + $0x100] ss:$8 sps:$4 sm:$0xff]  }
 0x161   :  { %2259 = vmatpush1.bf16.msra.mxu0 %v6636_v47  ;;  %2593 = vmatprep.mubr.bf16.mxu1 %v7567_v24 }
 0x162   :  { %2260 = vmatprep.subr.bf16.mxu0 %v6641_v49  ;;  %2562 = vmatpush1.bf16.msra.mxu1 %v6732_v16 }
 0x163   :  { %2563 = vmatprep.subr.bf16.mxu1 %v6737_v18  ;;  %v6731_v18 = vld [vmem:[#allocation8 + $0x1f4] ss:$8 sps:$4 sm:$0xff]  }
 0x165   :  { %2261 = vmatpush1.bf16.msra.mxu0 %v6639_v50  ;;  %v6689_v50 = vld [vmem:[#allocation8 + $0x114] ss:$8 sps:$4 sm:$0xff]  }
 0x166   :  { %2262 = vmatprep.subr.bf16.mxu0 %v6644_v51  ;;  %2564 = vmatpush1.bf16.msra.mxu1 %v6735_v19 }
 0x169   :  { %2263 = vmatpush1.bf16.msra.mxu0 %v6642_v52  ;;  %v6687_v52 = vld [vmem:[#allocation8 + $0x110] ss:$8 sps:$4 sm:$0xff]  }
 0x16a   :  { %2264 = vmatprep.subr.bf16.mxu0 %v6647_v53  ;;  %v6692_v53 = vld [vmem:[#allocation8 + $0x124] ss:$8 sps:$4 sm:$0xff]  }
 0x16d   :  { %2265 = vmatpush1.bf16.msra.mxu0 %v6645_v54  ;;  %v6690_v54 = vld [vmem:[#allocation8 + $0x120] ss:$8 sps:$4 sm:$0xff]  }
 0x16e   :  { %2266 = vmatprep.subr.bf16.mxu0 %v6650_v55  ;;  %v6695_v55 = vld [vmem:[#allocation8 + $0x134] ss:$8 sps:$4 sm:$0xff]  }
 0x171   :  { %2267 = vmatpush1.bf16.msra.mxu0 %v6648_v56  ;;  %v6693_v56 = vld [vmem:[#allocation8 + $0x130] ss:$8 sps:$4 sm:$0xff]  }
 0x172   :  { %2268 = vmatprep.subr.bf16.mxu0 %v6653_v57  ;;  %v6698_v57 = vld [vmem:[#allocation8 + $0x144] ss:$8 sps:$4 sm:$0xff]  }
 0x175   :  { %2269 = vmatpush1.bf16.msra.mxu0 %v6651_v58  ;;  %v6696_v58 = vld [vmem:[#allocation8 + $0x140] ss:$8 sps:$4 sm:$0xff]  }
 0x176   :  { %2270 = vmatprep.subr.bf16.mxu0 %v6656_v59  ;;  %v6701_v59 = vld [vmem:[#allocation8 + $0x154] ss:$8 sps:$4 sm:$0xff]  }
 0x179   :  { %2271 = vmatpush1.bf16.msra.mxu0 %v6654_v60  ;;  %v6699_v60 = vld [vmem:[#allocation8 + $0x150] ss:$8 sps:$4 sm:$0xff]  }
 0x17a   :  { %2272 = vmatprep.subr.bf16.mxu0 %v6659_v61  ;;  %v6704_v61 = vld [vmem:[#allocation8 + $0x164] ss:$8 sps:$4 sm:$0xff]  }
 0x17d   :  { %2273 = vmatpush1.bf16.msra.mxu0 %v6657_v62  ;;  %v6702_v62 = vld [vmem:[#allocation8 + $0x160] ss:$8 sps:$4 sm:$0xff]  }
 0x17e   :  { %2274 = vmatprep.subr.bf16.mxu0 %v6662_v63  ;;  %v6707_v63 = vld [vmem:[#allocation8 + $0x174] ss:$8 sps:$4 sm:$0xff]  }
 0x181   :  { %2275 = vmatpush1.bf16.msra.mxu0 %v6660_v0  ;;  %v6705_v0 = vld [vmem:[#allocation8 + $0x170] ss:$8 sps:$4 sm:$0xff]  }
 0x182   :  { %2276 = vmatprep.subr.bf16.mxu0 %v6665_v1  ;;  %v6710_v1 = vld [vmem:[#allocation8 + $0x184] ss:$8 sps:$4 sm:$0xff]  }
 0x185   :  { %2277 = vmatpush1.bf16.msra.mxu0 %v6663_v2  ;;  %v6708_v2 = vld [vmem:[#allocation8 + $0x180] ss:$8 sps:$4 sm:$0xff]  }
 0x186   :  { %2278 = vmatprep.subr.bf16.mxu0 %v6668_v3  ;;  %v6713_v3 = vld [vmem:[#allocation8 + $0x194] ss:$8 sps:$4 sm:$0xff]  }
 0x189   :  { %2279 = vmatpush1.bf16.msra.mxu0 %v6666_v4  ;;  %v6711_v4 = vld [vmem:[#allocation8 + $0x190] ss:$8 sps:$4 sm:$0xff]  }
 0x18a   :  { %2280 = vmatprep.subr.bf16.mxu0 %v6671_v5  ;;  %v6716_v5 = vld [vmem:[#allocation8 + $0x1a4] ss:$8 sps:$4 sm:$0xff]  }
 0x18d   :  { %2281 = vmatpush1.bf16.msra.mxu0 %v6669_v6  ;;  %v6714_v6 = vld [vmem:[#allocation8 + $0x1a0] ss:$8 sps:$4 sm:$0xff]  }
 0x18e   :  { %2282 = vmatprep.subr.bf16.mxu0 %v6674_v7  ;;  %v6719_v7 = vld [vmem:[#allocation8 + $0x1b4] ss:$8 sps:$4 sm:$0xff]  }
 0x191   :  { %2283 = vmatpush1.bf16.msra.mxu0 %v6672_v8  ;;  %v6717_v8 = vld [vmem:[#allocation8 + $0x1b0] ss:$8 sps:$4 sm:$0xff]  }
 0x192   :  { %2284 = vmatprep.subr.bf16.mxu0 %v6677_v9  ;;  %v6722_v9 = vld [vmem:[#allocation8 + $0x1c4] ss:$8 sps:$4 sm:$0xff]  }
 0x195   :  { %2285 = vmatpush1.bf16.msra.mxu0 %v6675_v10  ;;  %v7781_v10 = vsub.s32 2, %v7756_v21 }
 0x196   :  { %2286 = vmatprep.subr.bf16.mxu0 %v6680_v11  ;;  %v6720_v11 = vld [vmem:[#allocation8 + $0x1c0] ss:$8 sps:$4 sm:$0xff]  }
 0x199   :  { %2287 = vmatpush1.bf16.msra.mxu0 %v6678_v12  ;;  %v6725_v12 = vld [vmem:[#allocation8 + $0x1d4] ss:$8 sps:$4 sm:$0xff]  }
 0x19a   :  { %2288 = vmatprep.subr.bf16.mxu0 %v6683_v13  ;;  %v389_v13 = vrot.slane %v7764_v23, %v7781_v10  ;;  %v6740_v23 = vld [vmem:[#allocation10 + $0x44] ss:$16 sps:$4 sm:$0xff]  }
 0x19b   :  { %2565 = vmatprep.subr.bf16.mxu1 %v6740_v23  ;;  %v6761_v23 = vld [vmem:[#allocation10 + $0x2c] ss:$16 sps:$4 sm:$0xff]  }
 0x19d   :  { %2289 = vmatpush1.bf16.msra.mxu0 %v6681_v14  ;;  %v6723_v14 = vld [vmem:[#allocation8 + $0x1d0] ss:$8 sps:$4 sm:$0xff]  }
 0x19e   :  { %2299 = vmatprep.subr.bf16.mxu0 %v6686_v15  ;;  %v6728_v15 = vld [vmem:[#allocation8 + $0x1e4] ss:$8 sps:$4 sm:$0xff]  }
 0x233   :  { %v1675_v30 = vpop.f32.mrb[0].mxu0  ;;  %v7778_v31 = vpop.f32.mrb[0].mxu1 }
 0x234   :  { %v6219_v32 = vadd.f32 %v1675_v30, %v381_v27  ;;  %v1677_v33 = vpop.f32.mrb[1].mxu0  ;;  %v1841_v34 = vpop.f32.mrb[1].mxu1  ;;  %v6221_v16 = vadd.f32 %v7778_v31, %v389_v13  ;;  %v6743_v30 = vld [vmem:[#allocation10 + $0x64] ss:$16 sps:$4 sm:$0xff]  }
 0x235   :  { %v6220_v35 = vadd.f32 %v1677_v33, %v385_v28  ;;  %v6222_v36 = vadd.f32 %v1841_v34, %v393_v29  ;;  %v1679_v37 = vpop.f32.mrb[2].mxu0  ;;  %v1843_v38 = vpop.f32.mrb[2].mxu1  ;;  %v6738_v29 = vld [vmem:[#allocation10 + $0x40] ss:$16 sps:$4 sm:$0xff]   ;;  %v6746_v31 = vld [vmem:[#allocation10 + $0x84] ss:$16 sps:$4 sm:$0xff]  }
 0x236   :  { %vm1846_vm0 = vcmp.gt.f32.partialorder %v6219_v32, 0.0  ;;  %v1850_v39 = vmul.f32 0.1, %v6219_v32  ;;  %v1680_v43 = vpop.f32.mrb[3].mxu0  ;;  %v1844_v44 = vpop.f32.mrb[3].mxu1  ;;  %vm1848_vm3 = vcmp.gt.f32.partialorder %v6221_v16, 0.0  ;;  %2566 = vmatpush1.bf16.msra.mxu1 %v6738_v29 }
 0x237   :  { %vm1847_vm1 = vcmp.gt.f32.partialorder %v6220_v35, 0.0  ;;  %v1851_v40 = vmul.f32 0.1, %v6220_v35  ;;  %vm1849_vm2 = vcmp.gt.f32.partialorder %v6222_v36, 0.0  ;;  %v1853_v41 = vmul.f32 0.1, %v6222_v36  ;;  %2567 = vmatprep.subr.bf16.mxu1 %v6743_v30 }
 0x238   :  { %v1854_v42 = vsel %vm1846_vm0, %v6219_v32, %v1850_v39  ;;  %v1852_v19 = vmul.f32 0.1, %v6221_v16  ;;  %v6741_v32 = vld [vmem:[#allocation10 + $0x60] ss:$16 sps:$4 sm:$0xff]   ;;  %v6749_v34 = vld [vmem:[#allocation10 + $0xa4] ss:$16 sps:$4 sm:$0xff]  }
 0x239   :  { %v1855_v45 = vsel %vm1847_vm1, %v6220_v35, %v1851_v40  ;;  %v1857_v46 = vsel %vm1849_vm2, %v6222_v36, %v1853_v41  ;;  %v1858_v49 = vpack.c.bf16 %v1854_v42, %v1854_v42  ;;  %v6744_v33 = vld [vmem:[#allocation10 + $0x80] ss:$16 sps:$4 sm:$0xff]   ;;  %v6752_v36 = vld [vmem:[#allocation10 + $0xc4] ss:$16 sps:$4 sm:$0xff]   ;;  %v6758_v40 = vld [vmem:[#allocation10 + $0xc] ss:$16 sps:$4 sm:$0xff]  }
 0x23a   :  { %v1859_v47 = vpack.c.bf16 %v1855_v45, %v1855_v45  ;;  %v1861_v51 = vpack.c.bf16 %v1857_v46, %v1857_v46  ;;  %v1856_v27 = vsel %vm1848_vm3, %v6221_v16, %v1852_v19  ;;  %2568 = vmatpush1.bf16.msra.mxu1 %v6741_v32  ;;  %v6747_v35 = vld [vmem:[#allocation10 + $0xa0] ss:$16 sps:$4 sm:$0xff]   ;;  %v6755_v38 = vld [vmem:[#allocation10 + $0xe4] ss:$16 sps:$4 sm:$0xff]   ;;  %v6783_v41 = vld [vmem:[#allocation11 + $0x8] ss:$16 sps:$4 sm:$0xff]  }
 0x23b   :  { %v1860_v28 = vpack.c.bf16 %v1856_v27, %v1856_v27  ;;  %2569 = vmatprep.subr.bf16.mxu1 %v6746_v31  ;;  %v6750_v37 = vld [vmem:[#allocation10 + $0xc0] ss:$16 sps:$4 sm:$0xff]   ;;  %v6785_v42 = vld [vmem:[#allocation11 + $0xc] ss:$16 sps:$4 sm:$0xff]   ;;  %v6789_v44 = vld [vmem:[#allocation11 + $0x28] ss:$16 sps:$4 sm:$0xff]  }
 0x23c   :  { %2290 = vmatprep.mubr.bf16.mxu0 %v1859_v47  ;;  %v6753_v39 = vld [vmem:[#allocation10 + $0xe0] ss:$16 sps:$4 sm:$0xff]   ;;  %v6791_v43 = vld [vmem:[#allocation11 + $0x2c] ss:$16 sps:$4 sm:$0xff]   ;;  %v6795_v46 = vld [vmem:[#allocation11 + $0x48] ss:$16 sps:$4 sm:$0xff]  }
 0x23d   :  { %2291 = vmatmul.mubr.bf16.vlgmr.msra.gmra.mrb[4].mxu0 %v1858_v49  ;;  %v6797_v45 = vld [vmem:[#allocation11 + $0x4c] ss:$16 sps:$4 sm:$0xff]   ;;  %v6756_v27 = vld [vmem:[#allocation10 + $0x8] ss:$16 sps:$4 sm:$0xff]  }
 0x23e   :  { %2300 = vmatpush1.bf16.msra.mxu0 %v6684_v48  ;;  %2331 = vmatprep.mubr.bf16.mxu0 %v1861_v51  ;;  %v6803_v47 = vld [vmem:[#allocation11 + $0x6c] ss:$16 sps:$4 sm:$0xff]   ;;  %v6801_v48 = vld [vmem:[#allocation11 + $0x68] ss:$16 sps:$4 sm:$0xff]  }
 0x23f   :  { %2301 = vmatprep.subr.bf16.mxu0 %v6689_v50  ;;  %2570 = vmatpush1.bf16.msra.mxu1 %v6744_v33  ;;  %v6809_v49 = vld [vmem:[#allocation11 + $0x8c] ss:$16 sps:$4 sm:$0xff]   ;;  %v6807_v50 = vld [vmem:[#allocation11 + $0x88] ss:$16 sps:$4 sm:$0xff]  }
 0x240   :  { %2571 = vmatprep.subr.bf16.mxu1 %v6749_v34  ;;  %v6815_v51 = vld [vmem:[#allocation11 + $0xac] ss:$16 sps:$4 sm:$0xff]   ;;  %v6759_v29 = vld [vmem:[#allocation10 + $0x28] ss:$16 sps:$4 sm:$0xff]  }
 0x241   :  { %v6764_v30 = vld [vmem:[#allocation10 + $0x4c] ss:$16 sps:$4 sm:$0xff]   ;;  %v6762_v32 = vld [vmem:[#allocation10 + $0x48] ss:$16 sps:$4 sm:$0xff]  }
 0x242   :  { %2302 = vmatpush1.bf16.msra.mxu0 %v6687_v52  ;;  %v6813_v52 = vld [vmem:[#allocation11 + $0xa8] ss:$16 sps:$4 sm:$0xff]   ;;  %v6767_v31 = vld [vmem:[#allocation10 + $0x6c] ss:$16 sps:$4 sm:$0xff]  }
 0x243   :  { %2303 = vmatprep.subr.bf16.mxu0 %v6692_v53  ;;  %2572 = vmatpush1.bf16.msra.mxu1 %v6747_v35  ;;  %v6821_v53 = vld [vmem:[#allocation11 + $0xcc] ss:$16 sps:$4 sm:$0xff]   ;;  %v6765_v33 = vld [vmem:[#allocation10 + $0x68] ss:$16 sps:$4 sm:$0xff]  }
 0x244   :  { %2573 = vmatprep.subr.bf16.mxu1 %v6752_v36  ;;  %v6770_v34 = vld [vmem:[#allocation10 + $0x8c] ss:$16 sps:$4 sm:$0xff]   ;;  %v6768_v35 = vld [vmem:[#allocation10 + $0x88] ss:$16 sps:$4 sm:$0xff]  }
 0x245   :  { %v6773_v36 = vld [vmem:[#allocation10 + $0xac] ss:$16 sps:$4 sm:$0xff]  }
 0x246   :  { %2304 = vmatpush1.bf16.msra.mxu0 %v6690_v54  ;;  %v6819_v54 = vld [vmem:[#allocation11 + $0xc8] ss:$16 sps:$4 sm:$0xff]  }
 0x247   :  { %2305 = vmatprep.subr.bf16.mxu0 %v6695_v55  ;;  %2574 = vmatpush1.bf16.msra.mxu1 %v6750_v37  ;;  %v6827_v55 = vld [vmem:[#allocation11 + $0xec] ss:$16 sps:$4 sm:$0xff]   ;;  %v6771_v37 = vld [vmem:[#allocation10 + $0xa8] ss:$16 sps:$4 sm:$0xff]  }
 0x248   :  { %2575 = vmatprep.subr.bf16.mxu1 %v6755_v38  ;;  %v6776_v38 = vld [vmem:[#allocation10 + $0xcc] ss:$16 sps:$4 sm:$0xff]  }
 0x24a   :  { %2306 = vmatpush1.bf16.msra.mxu0 %v6693_v56  ;;  %v6825_v56 = vld [vmem:[#allocation11 + $0xe8] ss:$16 sps:$4 sm:$0xff]  }
 0x24b   :  { %2307 = vmatprep.subr.bf16.mxu0 %v6698_v57  ;;  %2576 = vmatpush1.bf16.msra.mxu1 %v6753_v39  ;;  %v6833_v57 = vld [vmem:[#allocation11 + $0x10c] ss:$16 sps:$4 sm:$0xff]  }
 0x24c   :  { %2602 = vmatprep.subr.bf16.mxu1 %v6758_v40  ;;  %v6779_v39 = vld [vmem:[#allocation10 + $0xec] ss:$16 sps:$4 sm:$0xff]   ;;  %v6777_v40 = vld [vmem:[#allocation10 + $0xe8] ss:$16 sps:$4 sm:$0xff]  }
 0x24e   :  { %2308 = vmatpush1.bf16.msra.mxu0 %v6696_v58  ;;  %v6831_v58 = vld [vmem:[#allocation11 + $0x108] ss:$16 sps:$4 sm:$0xff]  }
 0x24f   :  { %2309 = vmatprep.subr.bf16.mxu0 %v6701_v59  ;;  %v6839_v59 = vld [vmem:[#allocation11 + $0x12c] ss:$16 sps:$4 sm:$0xff]  }
 0x252   :  { %2310 = vmatpush1.bf16.msra.mxu0 %v6699_v60  ;;  %v6837_v60 = vld [vmem:[#allocation11 + $0x128] ss:$16 sps:$4 sm:$0xff]  }
 0x253   :  { %2311 = vmatprep.subr.bf16.mxu0 %v6704_v61  ;;  %v6845_v61 = vld [vmem:[#allocation11 + $0x14c] ss:$16 sps:$4 sm:$0xff]  }
 0x256   :  { %2312 = vmatpush1.bf16.msra.mxu0 %v6702_v62  ;;  %v6843_v62 = vld [vmem:[#allocation11 + $0x148] ss:$16 sps:$4 sm:$0xff]  }
 0x257   :  { %2313 = vmatprep.subr.bf16.mxu0 %v6707_v63  ;;  %v6851_v63 = vld [vmem:[#allocation11 + $0x16c] ss:$16 sps:$4 sm:$0xff]  }
 0x25a   :  { %2314 = vmatpush1.bf16.msra.mxu0 %v6705_v0  ;;  %v6849_v0 = vld [vmem:[#allocation11 + $0x168] ss:$16 sps:$4 sm:$0xff]  }
 0x25b   :  { %2315 = vmatprep.subr.bf16.mxu0 %v6710_v1  ;;  %v6857_v1 = vld [vmem:[#allocation11 + $0x18c] ss:$16 sps:$4 sm:$0xff]  }
 0x25e   :  { %2316 = vmatpush1.bf16.msra.mxu0 %v6708_v2  ;;  %v6855_v2 = vld [vmem:[#allocation11 + $0x188] ss:$16 sps:$4 sm:$0xff]  }
 0x25f   :  { %2317 = vmatprep.subr.bf16.mxu0 %v6713_v3  ;;  %v6863_v3 = vld [vmem:[#allocation11 + $0x1ac] ss:$16 sps:$4 sm:$0xff]  }
 0x262   :  { %2318 = vmatpush1.bf16.msra.mxu0 %v6711_v4  ;;  %v6861_v4 = vld [vmem:[#allocation11 + $0x1a8] ss:$16 sps:$4 sm:$0xff]  }
 0x263   :  { %2319 = vmatprep.subr.bf16.mxu0 %v6716_v5  ;;  %v1926_v5 = vld [vmem:[%s7908_s5] sm:$0x3] }
 0x266   :  { %2320 = vmatpush1.bf16.msra.mxu0 %v6714_v6  ;;  %v1931_v6 = vrot.slane %v1926_v5, %v7759_v22 }
 0x267   :  { %2321 = vmatprep.subr.bf16.mxu0 %v6719_v7  ;;  %v1935_v7 = vrot.slane %v1926_v5, %v7767_v25  ;;  %v6866_v5 = vld [vmem:[#allocation11 + $0x1c4] ss:$16 sps:$4 sm:$0xff]  }
 0x26a   :  { %2322 = vmatpush1.bf16.msra.mxu0 %v6717_v8 }
 0x26b   :  { %2323 = vmatprep.subr.bf16.mxu0 %v6722_v9 }
 0x26e   :  { %2324 = vmatpush1.bf16.msra.mxu0 %v6720_v11 }
 0x26f   :  { %2325 = vmatprep.subr.bf16.mxu0 %v6725_v12 }
 0x272   :  { %2326 = vmatpush1.bf16.msra.mxu0 %v6723_v14 }
 0x273   :  { %2327 = vmatprep.subr.bf16.mxu0 %v6728_v15 }
 0x276   :  { %2328 = vmatpush1.bf16.msra.mxu0 %v6726_v17  ;;  %v2343_v17 = vld [vmem:[#allocation5] sm:$0xff] }
 0x277   :  { %2329 = vmatprep.subr.bf16.mxu0 %v6731_v18 }
 0x27a   :  { %2330 = vmatpush1.bf16.msra.mxu0 %v6729_v20 }
 0x27b   :  { %3531 = vmatprep.subr.bf16.mxu0 %v6785_v42  ;;  %v6780_v42 = vld [vmem:[#allocation11] ss:$16 sps:$4 sm:$0xff]  }
 0x27d   :  { %2332 = vmatmul.mubr.bf16.vlgmr.msra.gmra.mrb[4].mxu0 %v1860_v28 }
 0x27e   :  { %3532 = vmatpush1.bf16.msra.mxu0 %v6783_v41  ;;  %v6782_v41 = vld [vmem:[#allocation11 + $0x4] ss:$16 sps:$4 sm:$0xff]  }
 0x27f   :  { %3533 = vmatprep.subr.bf16.mxu0 %v6791_v43  ;;  %v6788_v43 = vld [vmem:[#allocation11 + $0x24] ss:$16 sps:$4 sm:$0xff]  }
 0x282   :  { %3534 = vmatpush1.bf16.msra.mxu0 %v6789_v44  ;;  %v6786_v44 = vld [vmem:[#allocation11 + $0x20] ss:$16 sps:$4 sm:$0xff]  }
 0x283   :  { %3535 = vmatprep.subr.bf16.mxu0 %v6797_v45  ;;  %v6794_v45 = vld [vmem:[#allocation11 + $0x44] ss:$16 sps:$4 sm:$0xff]  }
 0x286   :  { %3536 = vmatpush1.bf16.msra.mxu0 %v6795_v46  ;;  %v6792_v46 = vld [vmem:[#allocation11 + $0x40] ss:$16 sps:$4 sm:$0xff]  }
 0x287   :  { %3537 = vmatprep.subr.bf16.mxu0 %v6803_v47  ;;  %v6800_v47 = vld [vmem:[#allocation11 + $0x64] ss:$16 sps:$4 sm:$0xff]  }
 0x28a   :  { %3538 = vmatpush1.bf16.msra.mxu0 %v6801_v48  ;;  %v6798_v48 = vld [vmem:[#allocation11 + $0x60] ss:$16 sps:$4 sm:$0xff]  }
 0x28b   :  { %3539 = vmatprep.subr.bf16.mxu0 %v6809_v49  ;;  %v6806_v49 = vld [vmem:[#allocation11 + $0x84] ss:$16 sps:$4 sm:$0xff]  }
 0x28e   :  { %3540 = vmatpush1.bf16.msra.mxu0 %v6807_v50  ;;  %v6804_v50 = vld [vmem:[#allocation11 + $0x80] ss:$16 sps:$4 sm:$0xff]  }
 0x28f   :  { %3541 = vmatprep.subr.bf16.mxu0 %v6815_v51  ;;  %v6812_v51 = vld [vmem:[#allocation11 + $0xa4] ss:$16 sps:$4 sm:$0xff]  }
 0x292   :  { %3542 = vmatpush1.bf16.msra.mxu0 %v6813_v52  ;;  %v6810_v52 = vld [vmem:[#allocation11 + $0xa0] ss:$16 sps:$4 sm:$0xff]  }
 0x293   :  { %3543 = vmatprep.subr.bf16.mxu0 %v6821_v53  ;;  %v6818_v53 = vld [vmem:[#allocation11 + $0xc4] ss:$16 sps:$4 sm:$0xff]  }
 0x296   :  { %3544 = vmatpush1.bf16.msra.mxu0 %v6819_v54  ;;  %v6816_v54 = vld [vmem:[#allocation11 + $0xc0] ss:$16 sps:$4 sm:$0xff]  }
 0x297   :  { %3545 = vmatprep.subr.bf16.mxu0 %v6827_v55  ;;  %v6824_v55 = vld [vmem:[#allocation11 + $0xe4] ss:$16 sps:$4 sm:$0xff]  }
 0x29a   :  { %3546 = vmatpush1.bf16.msra.mxu0 %v6825_v56  ;;  %v6822_v56 = vld [vmem:[#allocation11 + $0xe0] ss:$16 sps:$4 sm:$0xff]  }
 0x29b   :  { %3547 = vmatprep.subr.bf16.mxu0 %v6833_v57  ;;  %v6830_v57 = vld [vmem:[#allocation11 + $0x104] ss:$16 sps:$4 sm:$0xff]  }
 0x29e   :  { %3548 = vmatpush1.bf16.msra.mxu0 %v6831_v58  ;;  %v6828_v58 = vld [vmem:[#allocation11 + $0x100] ss:$16 sps:$4 sm:$0xff]  }
 0x29f   :  { %3549 = vmatprep.subr.bf16.mxu0 %v6839_v59  ;;  %v6836_v59 = vld [vmem:[#allocation11 + $0x124] ss:$16 sps:$4 sm:$0xff]  }
 0x2a2   :  { %3550 = vmatpush1.bf16.msra.mxu0 %v6837_v60  ;;  %v6834_v60 = vld [vmem:[#allocation11 + $0x120] ss:$16 sps:$4 sm:$0xff]  }
 0x2a3   :  { %3551 = vmatprep.subr.bf16.mxu0 %v6845_v61  ;;  %v6842_v61 = vld [vmem:[#allocation11 + $0x144] ss:$16 sps:$4 sm:$0xff]  }
 0x2a6   :  { %3552 = vmatpush1.bf16.msra.mxu0 %v6843_v62  ;;  %v6840_v62 = vld [vmem:[#allocation11 + $0x140] ss:$16 sps:$4 sm:$0xff]  }
 0x2a7   :  { %3553 = vmatprep.subr.bf16.mxu0 %v6851_v63  ;;  %v6848_v63 = vld [vmem:[#allocation11 + $0x164] ss:$16 sps:$4 sm:$0xff]  }
 0x2aa   :  { %3554 = vmatpush1.bf16.msra.mxu0 %v6849_v0  ;;  %v6846_v0 = vld [vmem:[#allocation11 + $0x160] ss:$16 sps:$4 sm:$0xff]  }
 0x2ab   :  { %3555 = vmatprep.subr.bf16.mxu0 %v6857_v1  ;;  %v6854_v1 = vld [vmem:[#allocation11 + $0x184] ss:$16 sps:$4 sm:$0xff]  }
 0x2ae   :  { %3556 = vmatpush1.bf16.msra.mxu0 %v6855_v2  ;;  %v6852_v2 = vld [vmem:[#allocation11 + $0x180] ss:$16 sps:$4 sm:$0xff]  }
 0x2af   :  { %3557 = vmatprep.subr.bf16.mxu0 %v6863_v3  ;;  %v6860_v3 = vld [vmem:[#allocation11 + $0x1a4] ss:$16 sps:$4 sm:$0xff]  }
 0x2b2   :  { %3558 = vmatpush1.bf16.msra.mxu0 %v6861_v4  ;;  %v6858_v4 = vld [vmem:[#allocation11 + $0x1a0] ss:$16 sps:$4 sm:$0xff]  }
 0x350   :  { %v2333_v8 = vpop.f32.mrb[4].mxu0 }
 0x351   :  { %v6223_v9 = vadd.f32 %v2333_v8, %v1931_v6  ;;  %v2335_v11 = vpop.f32.mrb[5].mxu0  ;;  %v6869_v6 = vld [vmem:[#allocation11 + $0x1cc] ss:$16 sps:$4 sm:$0xff]   ;;  %v6864_v8 = vld [vmem:[#allocation11 + $0x1c0] ss:$16 sps:$4 sm:$0xff]  }
 0x352   :  { %v6224_v12 = vadd.f32 %v2335_v11, %v1935_v7  ;;  %v2337_v13 = vpop.f32.mrb[6].mxu0  ;;  %v6867_v7 = vld [vmem:[#allocation11 + $0x1c8] ss:$16 sps:$4 sm:$0xff]   ;;  %3559 = vmatprep.subr.bf16.mxu0 %v6869_v6  ;;  %v6875_v11 = vld [vmem:[#allocation11 + $0x1ec] ss:$16 sps:$4 sm:$0xff]  }
 0x353   :  { %5449 = vst [vmem:[#allocation15] sm:$0xff] %v6223_v9  ;;  %v2338_v14 = vpop.f32.mrb[7].mxu0  ;;  %3560 = vmatpush1.bf16.msra.mxu0 %v6867_v7  ;;  %v6870_v13 = vld [vmem:[#allocation11 + $0x1e0] ss:$16 sps:$4 sm:$0xff]   ;;  %v6921_v6 = vld [vmem:[#allocation11 + $0x2e8] ss:$16 sps:$4 sm:$0xff]  }
 0x354   :  { %v2340_v15 = vmul.f32 0.5, %v6224_v12  ;;  %5450 = vst [vmem:[#allocation17] sm:$0xff] %v6224_v12  ;;  %v6873_v12 = vld [vmem:[#allocation11 + $0x1e8] ss:$16 sps:$4 sm:$0xff]   ;;  %3561 = vmatprep.subr.bf16.mxu0 %v6875_v11  ;;  %v6878_v14 = vld [vmem:[#allocation11 + $0x204] ss:$16 sps:$4 sm:$0xff]  }
 0x355   :  { %v6926_v7 = vld [vmem:[#allocation11 + $0x304] ss:$16 sps:$4 sm:$0xff]  }
 0x356   :  { %v2341_v16 = vmul.f32 1.442695, %v2340_v15  ;;  %v6881_v15 = vld [vmem:[#allocation11 + $0x20c] ss:$16 sps:$4 sm:$0xff]  }
 0x357   :  { %3562 = vmatpush1.bf16.msra.mxu0 %v6873_v12 }
 0x358   :  { %7292 = vpow2.f32 %v2341_v16  ;;  %3572 = vmatprep.subr.bf16.mxu0 %v6881_v15  ;;  %v7795_v16 = vld [vmem:[%s7910_s7] sm:$0xf]  ;;  %v6932_v15 = vld [vmem:[#allocation11 + $0x324] ss:$16 sps:$4 sm:$0xff]  }
 0x362   :  { %v7293_v18 = vpop.eup %7292 }
 0x363   :  { %v2344_v19 = vmul.f32 %v7293_v18, %v2343_v17  ;;  %v2384_v17 = vrot.slane %v7795_v16, %v7759_v22  ;;  %v2388_v18 = vrot.slane %v7795_v16, %v7767_v25 }
 0x365   :  { %v2345_v20 = vadd.f32 %v6223_v9, %v2344_v19  ;;  %v6872_v9 = vld [vmem:[#allocation11 + $0x1e4] ss:$16 sps:$4 sm:$0xff]  }
 0x367   :  { %v2346_v28 = vpack.c.bf16 %v2345_v20, %v2345_v20 }
 0x369   :  { %2594 = vmatmul.mubr.bf16.vlgmr.msra.gmra.mrb[4].mxu1 %v2346_v28 }
 0x36a   :  { %2603 = vmatpush1.bf16.msra.mxu1 %v6756_v27  ;;  %2634 = vmatprep.mubr.bf16.mxu1 %v7567_v24  ;;  %v6774_v24 = vld [vmem:[#allocation10 + $0xc8] ss:$16 sps:$4 sm:$0xff]  }
 0x36b   :  { %2604 = vmatprep.subr.bf16.mxu1 %v6761_v23 }
 0x36e   :  { %2605 = vmatpush1.bf16.msra.mxu1 %v6759_v29 }
 0x36f   :  { %2606 = vmatprep.subr.bf16.mxu1 %v6764_v30 }
 0x372   :  { %2607 = vmatpush1.bf16.msra.mxu1 %v6762_v32 }
 0x373   :  { %2608 = vmatprep.subr.bf16.mxu1 %v6767_v31 }
 0x376   :  { %2609 = vmatpush1.bf16.msra.mxu1 %v6765_v33 }
 0x377   :  { %2610 = vmatprep.subr.bf16.mxu1 %v6770_v34 }
 0x37a   :  { %2611 = vmatpush1.bf16.msra.mxu1 %v6768_v35  ;;  %v6876_v35 = vld [vmem:[#allocation11 + $0x200] ss:$16 sps:$4 sm:$0xff]  }
 0x37b   :  { %2612 = vmatprep.subr.bf16.mxu1 %v6773_v36  ;;  %v6879_v36 = vld [vmem:[#allocation11 + $0x208] ss:$16 sps:$4 sm:$0xff]  }
 0x37e   :  { %2613 = vmatpush1.bf16.msra.mxu1 %v6771_v37 }
 0x37f   :  { %2614 = vmatprep.subr.bf16.mxu1 %v6776_v38  ;;  %v6884_v38 = vld [vmem:[#allocation11 + $0x224] ss:$16 sps:$4 sm:$0xff]  }
 0x382   :  { %2615 = vmatpush1.bf16.msra.mxu1 %v6774_v24  ;;  %v6887_v24 = vld [vmem:[#allocation11 + $0x22c] ss:$16 sps:$4 sm:$0xff]  }
 0x383   :  { %2616 = vmatprep.subr.bf16.mxu1 %v6779_v39  ;;  %v6882_v39 = vld [vmem:[#allocation11 + $0x220] ss:$16 sps:$4 sm:$0xff]  }
 0x386   :  { %2617 = vmatpush1.bf16.msra.mxu1 %v6777_v40  ;;  %v6885_v40 = vld [vmem:[#allocation11 + $0x228] ss:$16 sps:$4 sm:$0xff]  }
 0x387   :  { %3449 = vmatprep.subr.bf16.mxu1 %v6782_v41  ;;  %v6890_v41 = vld [vmem:[#allocation11 + $0x244] ss:$16 sps:$4 sm:$0xff]  }
 0x389   :  { %2635 = vmatmul.mubr.bf16.vlgmr.msra.gmra.mrb[8].mxu1 %v2346_v28 }
 0x38a   :  { %3450 = vmatpush1.bf16.msra.mxu1 %v6780_v42  ;;  %v6893_v42 = vld [vmem:[#allocation11 + $0x24c] ss:$16 sps:$4 sm:$0xff]  }
 0x38b   :  { %3451 = vmatprep.subr.bf16.mxu1 %v6788_v43  ;;  %v6888_v43 = vld [vmem:[#allocation11 + $0x240] ss:$16 sps:$4 sm:$0xff]  }
 0x38e   :  { %3452 = vmatpush1.bf16.msra.mxu1 %v6786_v44  ;;  %v6891_v44 = vld [vmem:[#allocation11 + $0x248] ss:$16 sps:$4 sm:$0xff]  }
 0x38f   :  { %3453 = vmatprep.subr.bf16.mxu1 %v6794_v45  ;;  %v6896_v45 = vld [vmem:[#allocation11 + $0x264] ss:$16 sps:$4 sm:$0xff]  }
 0x392   :  { %3454 = vmatpush1.bf16.msra.mxu1 %v6792_v46  ;;  %v6899_v46 = vld [vmem:[#allocation11 + $0x26c] ss:$16 sps:$4 sm:$0xff]  }
 0x393   :  { %3455 = vmatprep.subr.bf16.mxu1 %v6800_v47  ;;  %v6894_v47 = vld [vmem:[#allocation11 + $0x260] ss:$16 sps:$4 sm:$0xff]  }
 0x396   :  { %3456 = vmatpush1.bf16.msra.mxu1 %v6798_v48  ;;  %v6897_v48 = vld [vmem:[#allocation11 + $0x268] ss:$16 sps:$4 sm:$0xff]  }
 0x397   :  { %3457 = vmatprep.subr.bf16.mxu1 %v6806_v49  ;;  %v6902_v49 = vld [vmem:[#allocation11 + $0x284] ss:$16 sps:$4 sm:$0xff]  }
 0x39a   :  { %3458 = vmatpush1.bf16.msra.mxu1 %v6804_v50  ;;  %v6905_v50 = vld [vmem:[#allocation11 + $0x28c] ss:$16 sps:$4 sm:$0xff]  }
 0x39b   :  { %3459 = vmatprep.subr.bf16.mxu1 %v6812_v51  ;;  %v6900_v51 = vld [vmem:[#allocation11 + $0x280] ss:$16 sps:$4 sm:$0xff]  }
 0x39e   :  { %3460 = vmatpush1.bf16.msra.mxu1 %v6810_v52  ;;  %v6903_v52 = vld [vmem:[#allocation11 + $0x288] ss:$16 sps:$4 sm:$0xff]  }
 0x39f   :  { %3461 = vmatprep.subr.bf16.mxu1 %v6818_v53  ;;  %v6908_v53 = vld [vmem:[#allocation11 + $0x2a4] ss:$16 sps:$4 sm:$0xff]  }
 0x3a2   :  { %3462 = vmatpush1.bf16.msra.mxu1 %v6816_v54  ;;  %v6911_v54 = vld [vmem:[#allocation11 + $0x2ac] ss:$16 sps:$4 sm:$0xff]  }
 0x3a3   :  { %3463 = vmatprep.subr.bf16.mxu1 %v6824_v55  ;;  %v6906_v55 = vld [vmem:[#allocation11 + $0x2a0] ss:$16 sps:$4 sm:$0xff]  }
 0x3a6   :  { %3464 = vmatpush1.bf16.msra.mxu1 %v6822_v56  ;;  %v6909_v56 = vld [vmem:[#allocation11 + $0x2a8] ss:$16 sps:$4 sm:$0xff]  }
 0x3a7   :  { %3465 = vmatprep.subr.bf16.mxu1 %v6830_v57  ;;  %v6914_v57 = vld [vmem:[#allocation11 + $0x2c4] ss:$16 sps:$4 sm:$0xff]  }
 0x3aa   :  { %3466 = vmatpush1.bf16.msra.mxu1 %v6828_v58  ;;  %v6917_v58 = vld [vmem:[#allocation11 + $0x2cc] ss:$16 sps:$4 sm:$0xff]  }
 0x3ab   :  { %3467 = vmatprep.subr.bf16.mxu1 %v6836_v59  ;;  %v2396_v59 = vrot.slane %v7795_v16, %v7770_v26 }
 0x3ae   :  { %3468 = vmatpush1.bf16.msra.mxu1 %v6834_v60  ;;  %v6912_v60 = vld [vmem:[#allocation11 + $0x2c0] ss:$16 sps:$4 sm:$0xff]  }
 0x3af   :  { %3469 = vmatprep.subr.bf16.mxu1 %v6842_v61  ;;  %v6915_v61 = vld [vmem:[#allocation11 + $0x2c8] ss:$16 sps:$4 sm:$0xff]  }
 0x3b2   :  { %3470 = vmatpush1.bf16.msra.mxu1 %v6840_v62 }
 0x3b3   :  { %3471 = vmatprep.subr.bf16.mxu1 %v6848_v63  ;;  %v6920_v63 = vld [vmem:[#allocation11 + $0x2e4] ss:$16 sps:$4 sm:$0xff]  }
 0x3b6   :  { %3472 = vmatpush1.bf16.msra.mxu1 %v6846_v0  ;;  %v6923_v0 = vld [vmem:[#allocation11 + $0x2ec] ss:$16 sps:$4 sm:$0xff]  }
 0x3b7   :  { %3473 = vmatprep.subr.bf16.mxu1 %v6854_v1 }
 0x3ba   :  { %3474 = vmatpush1.bf16.msra.mxu1 %v6852_v2 }
 0x3bb   :  { %3475 = vmatprep.subr.bf16.mxu1 %v6860_v3 }
 0x3be   :  { %3476 = vmatpush1.bf16.msra.mxu1 %v6858_v4  ;;  %v6918_v4 = vld [vmem:[#allocation11 + $0x2e0] ss:$16 sps:$4 sm:$0xff]  }
 0x3bf   :  { %3477 = vmatprep.subr.bf16.mxu1 %v6866_v5 }
 0x3c2   :  { %3478 = vmatpush1.bf16.msra.mxu1 %v6864_v8 }
 0x3c3   :  { %3479 = vmatprep.subr.bf16.mxu1 %v6872_v9  ;;  %v6929_v9 = vld [vmem:[#allocation11 + $0x30c] ss:$16 sps:$4 sm:$0xff]  }
 0x3c6   :  { %3480 = vmatpush1.bf16.msra.mxu1 %v6870_v13  ;;  %v6924_v13 = vld [vmem:[#allocation11 + $0x300] ss:$16 sps:$4 sm:$0xff]  }
 0x3c7   :  { %3490 = vmatprep.subr.bf16.mxu1 %v6878_v14  ;;  %v6927_v14 = vld [vmem:[#allocation11 + $0x308] ss:$16 sps:$4 sm:$0xff]  }
 0x43c   :  { %v2595_v19 = vpop.f32.mrb[4].mxu1 }
 0x43d   :  { %v2596_v20 = vadd.f32 %v2595_v19, %v2384_v17  ;;  %v2597_v27 = vpop.f32.mrb[5].mxu1  ;;  %v6935_v17 = vld [vmem:[#allocation11 + $0x32c] ss:$16 sps:$4 sm:$0xff]   ;;  %v6933_v19 = vld [vmem:[#allocation11 + $0x328] ss:$16 sps:$4 sm:$0xff]  }
 0x43e   :  { %v2598_v28 = vadd.f32 %v2597_v27, %v2388_v18  ;;  %v2599_v23 = vpop.f32.mrb[6].mxu1  ;;  %v6930_v18 = vld [vmem:[#allocation11 + $0x320] ss:$16 sps:$4 sm:$0xff]   ;;  %v6941_v27 = vld [vmem:[#allocation11 + $0x34c] ss:$16 sps:$4 sm:$0xff]  }
 0x43f   :  { %vm2643_vm4 = vcmp.gt.f32.partialorder %v2596_v20, 0.0  ;;  %v2647_v29 = vmul.f32 0.1, %v2596_v20  ;;  %v2600_v30 = vpop.f32.mrb[7].mxu1  ;;  %v6939_v23 = vld [vmem:[#allocation11 + $0x348] ss:$16 sps:$4 sm:$0xff]  }
 0x440   :  { %vm2644_vm5 = vcmp.gt.f32.partialorder %v2598_v28, 0.0  ;;  %v2648_v32 = vmul.f32 0.1, %v2598_v28  ;;  %v6947_v30 = vld [vmem:[#allocation11 + $0x36c] ss:$16 sps:$4 sm:$0xff]  }
 0x441   :  { %v2651_v31 = vsel %vm2643_vm4, %v2596_v20, %v2647_v29  ;;  %v6938_v20 = vld [vmem:[#allocation11 + $0x344] ss:$16 sps:$4 sm:$0xff]  }
 0x442   :  { %v2652_v33 = vsel %vm2644_vm5, %v2598_v28, %v2648_v32  ;;  %v2655_v37 = vpack.c.bf16 %v2651_v31, %v2651_v31  ;;  %v6936_v28 = vld [vmem:[#allocation11 + $0x340] ss:$16 sps:$4 sm:$0xff]   ;;  %v6944_v29 = vld [vmem:[#allocation11 + $0x364] ss:$16 sps:$4 sm:$0xff]   ;;  %v6945_v31 = vld [vmem:[#allocation11 + $0x368] ss:$16 sps:$4 sm:$0xff]  }
 0x443   :  { %v2656_v34 = vpack.c.bf16 %v2652_v33, %v2652_v33  ;;  %v6942_v32 = vld [vmem:[#allocation11 + $0x360] ss:$16 sps:$4 sm:$0xff]   ;;  %v6950_v33 = vld [vmem:[#allocation11 + $0x384] ss:$16 sps:$4 sm:$0xff]  }
 0x445   :  { %3481 = vmatprep.mubr.bf16.mxu1 %v2656_v34  ;;  %3563 = vmatprep.mubr.bf16.mxu0 %v2656_v34  ;;  %v6953_v34 = vld [vmem:[#allocation11 + $0x38c] ss:$16 sps:$4 sm:$0xff]  }
 0x446   :  { %3482 = vmatmul.mubr.bf16.vlgmr.msra.gmra.mrb[12].mxu1 %v2655_v37  ;;  %3564 = vmatmul.mubr.bf16.vlgmr.msra.gmra.mrb[8].mxu0 %v2655_v37  ;;  %v6956_v37 = vld [vmem:[#allocation11 + $0x3a4] ss:$16 sps:$4 sm:$0xff]  }
 0x447   :  { %3491 = vmatpush1.bf16.msra.mxu1 %v6876_v35  ;;  %3573 = vmatpush1.bf16.msra.mxu0 %v6879_v36  ;;  %v6948_v35 = vld [vmem:[#allocation11 + $0x380] ss:$16 sps:$4 sm:$0xff]   ;;  %v6951_v36 = vld [vmem:[#allocation11 + $0x388] ss:$16 sps:$4 sm:$0xff]  }
 0x448   :  { %3492 = vmatprep.subr.bf16.mxu1 %v6884_v38  ;;  %3574 = vmatprep.subr.bf16.mxu0 %v6887_v24  ;;  %v6959_v38 = vld [vmem:[#allocation11 + $0x3ac] ss:$16 sps:$4 sm:$0xff]   ;;  %v2392_v24 = vrot.slane %v7795_v16, %v7781_v10  ;;  %v6966_v16 = vld [vmem:[#allocation11 + $0x3e0] ss:$16 sps:$4 sm:$0xff]  }
 0x44b   :  { %3493 = vmatpush1.bf16.msra.mxu1 %v6882_v39  ;;  %3575 = vmatpush1.bf16.msra.mxu0 %v6885_v40  ;;  %v6954_v39 = vld [vmem:[#allocation11 + $0x3a0] ss:$16 sps:$4 sm:$0xff]   ;;  %v6957_v40 = vld [vmem:[#allocation11 + $0x3a8] ss:$16 sps:$4 sm:$0xff]  }
 0x44c   :  { %3494 = vmatprep.subr.bf16.mxu1 %v6890_v41  ;;  %3576 = vmatprep.subr.bf16.mxu0 %v6893_v42  ;;  %v6962_v41 = vld [vmem:[#allocation11 + $0x3c4] ss:$16 sps:$4 sm:$0xff]   ;;  %v6965_v42 = vld [vmem:[#allocation11 + $0x3cc] ss:$16 sps:$4 sm:$0xff]  }
 0x44f   :  { %3495 = vmatpush1.bf16.msra.mxu1 %v6888_v43  ;;  %3577 = vmatpush1.bf16.msra.mxu0 %v6891_v44  ;;  %v6960_v44 = vld [vmem:[#allocation11 + $0x3c0] ss:$16 sps:$4 sm:$0xff]  }
 0x450   :  { %3496 = vmatprep.subr.bf16.mxu1 %v6896_v45  ;;  %3578 = vmatprep.subr.bf16.mxu0 %v6899_v46  ;;  %v6963_v45 = vld [vmem:[#allocation11 + $0x3c8] ss:$16 sps:$4 sm:$0xff]   ;;  %v6968_v46 = vld [vmem:[#allocation11 + $0x3e4] ss:$16 sps:$4 sm:$0xff]  }
 0x453   :  { %3497 = vmatpush1.bf16.msra.mxu1 %v6894_v47  ;;  %3579 = vmatpush1.bf16.msra.mxu0 %v6897_v48  ;;  %v6971_v47 = vld [vmem:[#allocation11 + $0x3ec] ss:$16 sps:$4 sm:$0xff]  }
 0x454   :  { %3498 = vmatprep.subr.bf16.mxu1 %v6902_v49  ;;  %3580 = vmatprep.subr.bf16.mxu0 %v6905_v50  ;;  %v6969_v49 = vld [vmem:[#allocation11 + $0x3e8] ss:$16 sps:$4 sm:$0xff]   ;;  %v6974_v50 = vld [vmem:[#allocation13 + $0x4] ss:$28 sps:$4 sm:$0xff]  }
 0x457   :  { %3499 = vmatpush1.bf16.msra.mxu1 %v6900_v51  ;;  %3581 = vmatpush1.bf16.msra.mxu0 %v6903_v52  ;;  %v6977_v51 = vld [vmem:[#allocation13 + $0xc] ss:$28 sps:$4 sm:$0xff]  }
 0x458   :  { %3500 = vmatprep.subr.bf16.mxu1 %v6908_v53  ;;  %3582 = vmatprep.subr.bf16.mxu0 %v6911_v54  ;;  %v6972_v53 = vld [vmem:[#allocation13] ss:$28 sps:$4 sm:$0xff]   ;;  %v6975_v54 = vld [vmem:[#allocation13 + $0x8] ss:$28 sps:$4 sm:$0xff]  }
 0x45b   :  { %3501 = vmatpush1.bf16.msra.mxu1 %v6906_v55  ;;  %3583 = vmatpush1.bf16.msra.mxu0 %v6909_v56  ;;  %v6980_v56 = vld [vmem:[#allocation13 + $0x3c] ss:$28 sps:$4 sm:$0xff]  }
 0x45c   :  { %v7803_v62 = vpop.f32.mrb[8].mxu1  ;;  %3502 = vmatprep.subr.bf16.mxu1 %v6914_v57  ;;  %3584 = vmatprep.subr.bf16.mxu0 %v6917_v58  ;;  %v6983_v57 = vld [vmem:[#allocation13 + $0x44] ss:$28 sps:$4 sm:$0xff]   ;;  %v6978_v58 = vld [vmem:[#allocation13 + $0x38] ss:$28 sps:$4 sm:$0xff]  }
 0x45d   :  { %v2638_v1 = vpop.f32.mrb[9].mxu1  ;;  %v2637_v43 = vadd.f32 %v7803_v62, %v2392_v24  ;;  %v6984_v62 = vld [vmem:[#allocation13 + $0x70] ss:$28 sps:$4 sm:$0xff]  }
 0x45e   :  { %v2639_v2 = vadd.f32 %v2638_v1, %v2396_v59  ;;  %v2640_v3 = vpop.f32.mrb[10].mxu1  ;;  %v6981_v59 = vld [vmem:[#allocation13 + $0x40] ss:$28 sps:$4 sm:$0xff]   ;;  %v6995_v1 = vld [vmem:[#allocation13 + $0xb4] ss:$28 sps:$4 sm:$0xff]  }
 0x45f   :  { %v2641_v5 = vpop.f32.mrb[11].mxu1  ;;  %3503 = vmatpush1.bf16.msra.mxu1 %v6912_v60  ;;  %3585 = vmatpush1.bf16.msra.mxu0 %v6915_v61  ;;  %v2649_v48 = vmul.f32 0.1, %v2637_v43  ;;  %vm2645_vm7 = vcmp.gt.f32.partialorder %v2637_v43, 0.0  ;;  %v6986_v60 = vld [vmem:[#allocation13 + $0x74] ss:$28 sps:$4 sm:$0xff]  }
 0x460   :  { %vm2646_vm6 = vcmp.gt.f32.partialorder %v2639_v2, 0.0  ;;  %v2650_v8 = vmul.f32 0.1, %v2639_v2  ;;  %3504 = vmatprep.subr.bf16.mxu1 %v6920_v63  ;;  %3586 = vmatprep.subr.bf16.mxu0 %v6923_v0  ;;  %v6989_v61 = vld [vmem:[#allocation13 + $0x7c] ss:$28 sps:$4 sm:$0xff]  }
 0x461   :  { %v2653_v52 = vsel %vm2645_vm7, %v2637_v43, %v2649_v48  ;;  %v6987_v63 = vld [vmem:[#allocation13 + $0x78] ss:$28 sps:$4 sm:$0xff]   ;;  %v6992_v0 = vld [vmem:[#allocation13 + $0xac] ss:$28 sps:$4 sm:$0xff]  }
 0x462   :  { %v2654_v11 = vsel %vm2646_vm6, %v2639_v2, %v2650_v8  ;;  %v2657_v55 = vpack.c.bf16 %v2653_v52, %v2653_v52  ;;  %v6990_v2 = vld [vmem:[#allocation13 + $0xa8] ss:$28 sps:$4 sm:$0xff]   ;;  %v6993_v3 = vld [vmem:[#allocation13 + $0xb0] ss:$28 sps:$4 sm:$0xff]   ;;  %v7004_v8 = vld [vmem:[#allocation13 + $0x11c] ss:$28 sps:$4 sm:$0xff]  }
 0x463   :  { %3505 = vmatpush1.bf16.msra.mxu1 %v6918_v4  ;;  %3587 = vmatpush1.bf16.msra.mxu0 %v6921_v6  ;;  %v2658_v12 = vpack.c.bf16 %v2654_v11, %v2654_v11  ;;  %v6998_v4 = vld [vmem:[#allocation13 + $0xe4] ss:$28 sps:$4 sm:$0xff]   ;;  %v7001_v5 = vld [vmem:[#allocation13 + $0xec] ss:$28 sps:$4 sm:$0xff]   ;;  %v7002_v11 = vld [vmem:[#allocation13 + $0x118] ss:$28 sps:$4 sm:$0xff]  }
 0x464   :  { %3506 = vmatprep.subr.bf16.mxu1 %v6926_v7  ;;  %3588 = vmatprep.subr.bf16.mxu0 %v6929_v9  ;;  %v6996_v6 = vld [vmem:[#allocation13 + $0xe0] ss:$28 sps:$4 sm:$0xff]   ;;  %v6999_v7 = vld [vmem:[#allocation13 + $0xe8] ss:$28 sps:$4 sm:$0xff]   ;;  %v7050_v48 = vld [vmem:[#allocation13 + $0x2d8] ss:$28 sps:$4 sm:$0xff]  }
 0x465   :  { %3522 = vmatprep.mubr.bf16.mxu1 %v2658_v12  ;;  %3604 = vmatprep.mubr.bf16.mxu0 %v2658_v12  ;;  %v7007_v9 = vld [vmem:[#allocation13 + $0x124] ss:$28 sps:$4 sm:$0xff]   ;;  %v7040_v24 = vld [vmem:[#allocation13 + $0x26c] ss:$28 sps:$4 sm:$0xff]   ;;  %v7059_v52 = vld [vmem:[#allocation13 + $0x318] ss:$28 sps:$4 sm:$0xff]  }
 0x466   :  { %v7005_v12 = vld [vmem:[#allocation13 + $0x120] ss:$28 sps:$4 sm:$0xff]   ;;  %v7049_v43 = vld [vmem:[#allocation13 + $0x2ac] ss:$28 sps:$4 sm:$0xff]  }
 0x467   :  { %3507 = vmatpush1.bf16.msra.mxu1 %v6924_v13  ;;  %3589 = vmatpush1.bf16.msra.mxu0 %v6927_v14  ;;  %v7010_v13 = vld [vmem:[#allocation13 + $0x154] ss:$28 sps:$4 sm:$0xff]   ;;  %v7013_v14 = vld [vmem:[#allocation13 + $0x15c] ss:$28 sps:$4 sm:$0xff]  }
 0x468   :  { %3508 = vmatprep.subr.bf16.mxu1 %v6932_v15  ;;  %3590 = vmatprep.subr.bf16.mxu0 %v6935_v17  ;;  %v7008_v15 = vld [vmem:[#allocation13 + $0x150] ss:$28 sps:$4 sm:$0xff]   ;;  %v7011_v17 = vld [vmem:[#allocation13 + $0x158] ss:$28 sps:$4 sm:$0xff]  }
 0x46b   :  { %3509 = vmatpush1.bf16.msra.mxu1 %v6930_v18  ;;  %3591 = vmatpush1.bf16.msra.mxu0 %v6933_v19  ;;  %v7016_v18 = vld [vmem:[#allocation13 + $0x18c] ss:$28 sps:$4 sm:$0xff]   ;;  %v7019_v19 = vld [vmem:[#allocation13 + $0x194] ss:$28 sps:$4 sm:$0xff]  }
 0x46c   :  { %3510 = vmatprep.subr.bf16.mxu1 %v6938_v20  ;;  %3592 = vmatprep.subr.bf16.mxu0 %v6941_v27  ;;  %v7014_v20 = vld [vmem:[#allocation13 + $0x188] ss:$28 sps:$4 sm:$0xff]   ;;  %v7017_v27 = vld [vmem:[#allocation13 + $0x190] ss:$28 sps:$4 sm:$0xff]  }
 0x46f   :  { %3511 = vmatpush1.bf16.msra.mxu1 %v6936_v28  ;;  %3593 = vmatpush1.bf16.msra.mxu0 %v6939_v23  ;;  %v7022_v28 = vld [vmem:[#allocation13 + $0x1c4] ss:$28 sps:$4 sm:$0xff]   ;;  %v7025_v23 = vld [vmem:[#allocation13 + $0x1cc] ss:$28 sps:$4 sm:$0xff]  }
 0x470   :  { %3512 = vmatprep.subr.bf16.mxu1 %v6944_v29  ;;  %3594 = vmatprep.subr.bf16.mxu0 %v6947_v30  ;;  %v7020_v29 = vld [vmem:[#allocation13 + $0x1c0] ss:$28 sps:$4 sm:$0xff]   ;;  %v7023_v30 = vld [vmem:[#allocation13 + $0x1c8] ss:$28 sps:$4 sm:$0xff]  }
 0x473   :  { %3513 = vmatpush1.bf16.msra.mxu1 %v6942_v32  ;;  %3595 = vmatpush1.bf16.msra.mxu0 %v6945_v31  ;;  %v7028_v32 = vld [vmem:[#allocation13 + $0x1fc] ss:$28 sps:$4 sm:$0xff]   ;;  %v7031_v31 = vld [vmem:[#allocation13 + $0x204] ss:$28 sps:$4 sm:$0xff]  }
 0x474   :  { %3514 = vmatprep.subr.bf16.mxu1 %v6950_v33  ;;  %3596 = vmatprep.subr.bf16.mxu0 %v6953_v34  ;;  %v7026_v33 = vld [vmem:[#allocation13 + $0x1f8] ss:$28 sps:$4 sm:$0xff]   ;;  %v7029_v34 = vld [vmem:[#allocation13 + $0x200] ss:$28 sps:$4 sm:$0xff]  }
 0x477   :  { %3515 = vmatpush1.bf16.msra.mxu1 %v6948_v35  ;;  %3597 = vmatpush1.bf16.msra.mxu0 %v6951_v36  ;;  %v7034_v35 = vld [vmem:[#allocation13 + $0x234] ss:$28 sps:$4 sm:$0xff]   ;;  %v7037_v36 = vld [vmem:[#allocation13 + $0x23c] ss:$28 sps:$4 sm:$0xff]  }
 0x478   :  { %3516 = vmatprep.subr.bf16.mxu1 %v6956_v37  ;;  %3598 = vmatprep.subr.bf16.mxu0 %v6959_v38  ;;  %v7032_v37 = vld [vmem:[#allocation13 + $0x230] ss:$28 sps:$4 sm:$0xff]   ;;  %v7035_v38 = vld [vmem:[#allocation13 + $0x238] ss:$28 sps:$4 sm:$0xff]  }
 0x47b   :  { %3517 = vmatpush1.bf16.msra.mxu1 %v6954_v39  ;;  %3599 = vmatpush1.bf16.msra.mxu0 %v6957_v40  ;;  %v7043_v39 = vld [vmem:[#allocation13 + $0x274] ss:$28 sps:$4 sm:$0xff]   ;;  %v7038_v40 = vld [vmem:[#allocation13 + $0x268] ss:$28 sps:$4 sm:$0xff]  }
 0x47c   :  { %3518 = vmatprep.subr.bf16.mxu1 %v6962_v41  ;;  %3600 = vmatprep.subr.bf16.mxu0 %v6965_v42  ;;  %v7041_v41 = vld [vmem:[#allocation13 + $0x270] ss:$28 sps:$4 sm:$0xff]   ;;  %v7046_v42 = vld [vmem:[#allocation13 + $0x2a4] ss:$28 sps:$4 sm:$0xff]  }
 0x47f   :  { %3519 = vmatpush1.bf16.msra.mxu1 %v6960_v44  ;;  %3601 = vmatpush1.bf16.msra.mxu0 %v6963_v45  ;;  %v7044_v44 = vld [vmem:[#allocation13 + $0x2a0] ss:$28 sps:$4 sm:$0xff]   ;;  %v7047_v45 = vld [vmem:[#allocation13 + $0x2a8] ss:$28 sps:$4 sm:$0xff]  }
 0x480   :  { %3520 = vmatprep.subr.bf16.mxu1 %v6968_v46  ;;  %3602 = vmatprep.subr.bf16.mxu0 %v6971_v47  ;;  %v7052_v46 = vld [vmem:[#allocation13 + $0x2dc] ss:$28 sps:$4 sm:$0xff]   ;;  %v7055_v47 = vld [vmem:[#allocation13 + $0x2e4] ss:$28 sps:$4 sm:$0xff]  }
 0x483   :  { %3521 = vmatpush1.bf16.msra.mxu1 %v6966_v16  ;;  %3603 = vmatpush1.bf16.msra.mxu0 %v6969_v49  ;;  %v7053_v16 = vld [vmem:[#allocation13 + $0x2e0] ss:$28 sps:$4 sm:$0xff]   ;;  %v7058_v49 = vld [vmem:[#allocation13 + $0x314] ss:$28 sps:$4 sm:$0xff]  }
 0x484   :  { %5074 = vmatprep.subr.bf16.mxu1 %v6974_v50  ;;  %5156 = vmatprep.subr.bf16.mxu0 %v6977_v51  ;;  %v7061_v50 = vld [vmem:[#allocation13 + $0x31c] ss:$28 sps:$4 sm:$0xff]   ;;  %v7056_v51 = vld [vmem:[#allocation13 + $0x310] ss:$28 sps:$4 sm:$0xff]  }
 0x486   :  { %3523 = vmatmul.mubr.bf16.vlgmr.msra.gmra.mrb[12].mxu1 %v2657_v55  ;;  %3605 = vmatmul.mubr.bf16.vlgmr.msra.gmra.mrb[8].mxu0 %v2657_v55  ;;  %v7062_v55 = vld [vmem:[#allocation13 + $0x348] ss:$28 sps:$4 sm:$0xff]  }
 0x487   :  { %5075 = vmatpush1.bf16.msra.mxu1 %v6972_v53  ;;  %5157 = vmatpush1.bf16.msra.mxu0 %v6975_v54  ;;  %v7064_v53 = vld [vmem:[#allocation13 + $0x34c] ss:$28 sps:$4 sm:$0xff]   ;;  %v7067_v54 = vld [vmem:[#allocation13 + $0x354] ss:$28 sps:$4 sm:$0xff]  }
 0x488   :  { %5076 = vmatprep.subr.bf16.mxu1 %v6980_v56  ;;  %5158 = vmatprep.subr.bf16.mxu0 %v6983_v57  ;;  %v7065_v56 = vld [vmem:[#allocation13 + $0x350] ss:$28 sps:$4 sm:$0xff]   ;;  %v7070_v57 = vld [vmem:[#allocation13 + $0x384] ss:$28 sps:$4 sm:$0xff]  }
 0x48b   :  { %5077 = vmatpush1.bf16.msra.mxu1 %v6978_v58  ;;  %5159 = vmatpush1.bf16.msra.mxu0 %v6981_v59  ;;  %v7073_v58 = vld [vmem:[#allocation13 + $0x38c] ss:$28 sps:$4 sm:$0xff]   ;;  %v7811_v59 = vld [vmem:[%s7912_s9] sm:$0xf] }
 0x48c   :  { %5078 = vmatprep.subr.bf16.mxu1 %v6986_v60  ;;  %5160 = vmatprep.subr.bf16.mxu0 %v6989_v61  ;;  %v2792_v60 = vrot.slane %v7811_v59, %v7759_v22  ;;  %v2796_v61 = vrot.slane %v7811_v59, %v7767_v25 }
 0x48f   :  { %5079 = vmatpush1.bf16.msra.mxu1 %v6984_v62  ;;  %5161 = vmatpush1.bf16.msra.mxu0 %v6987_v63  ;;  %v2804_v62 = vrot.slane %v7811_v59, %v7770_v26 }
 0x490   :  { %5080 = vmatprep.subr.bf16.mxu1 %v6992_v0  ;;  %5162 = vmatprep.subr.bf16.mxu0 %v6995_v1 }
 0x493   :  { %5081 = vmatpush1.bf16.msra.mxu1 %v6990_v2  ;;  %5163 = vmatpush1.bf16.msra.mxu0 %v6993_v3 }
 0x494   :  { %5082 = vmatprep.subr.bf16.mxu1 %v6998_v4  ;;  %5164 = vmatprep.subr.bf16.mxu0 %v7001_v5 }
 0x497   :  { %5083 = vmatpush1.bf16.msra.mxu1 %v6996_v6  ;;  %5165 = vmatpush1.bf16.msra.mxu0 %v6999_v7 }
 0x498   :  { %5084 = vmatprep.subr.bf16.mxu1 %v7004_v8  ;;  %5166 = vmatprep.subr.bf16.mxu0 %v7007_v9 }
 0x49b   :  { %5085 = vmatpush1.bf16.msra.mxu1 %v7002_v11  ;;  %5167 = vmatpush1.bf16.msra.mxu0 %v7005_v12 }
 0x49c   :  { %5086 = vmatprep.subr.bf16.mxu1 %v7010_v13  ;;  %5168 = vmatprep.subr.bf16.mxu0 %v7013_v14 }
 0x49f   :  { %5087 = vmatpush1.bf16.msra.mxu1 %v7008_v15  ;;  %5169 = vmatpush1.bf16.msra.mxu0 %v7011_v17 }
 0x4a0   :  { %5088 = vmatprep.subr.bf16.mxu1 %v7016_v18  ;;  %5170 = vmatprep.subr.bf16.mxu0 %v7019_v19  ;;  %v7068_v19 = vld [vmem:[#allocation13 + $0x380] ss:$28 sps:$4 sm:$0xff]  }
 0x4a3   :  { %5089 = vmatpush1.bf16.msra.mxu1 %v7014_v20  ;;  %5171 = vmatpush1.bf16.msra.mxu0 %v7017_v27  ;;  %v7071_v20 = vld [vmem:[#allocation13 + $0x388] ss:$28 sps:$4 sm:$0xff]  }
 0x4a4   :  { %5090 = vmatprep.subr.bf16.mxu1 %v7022_v28  ;;  %5172 = vmatprep.subr.bf16.mxu0 %v7025_v23  ;;  %v7076_v28 = vld [vmem:[#allocation13 + $0x3bc] ss:$28 sps:$4 sm:$0xff]   ;;  %v7079_v23 = vld [vmem:[#allocation13 + $0x3c4] ss:$28 sps:$4 sm:$0xff]  }
 0x4a7   :  { %5091 = vmatpush1.bf16.msra.mxu1 %v7020_v29  ;;  %5173 = vmatpush1.bf16.msra.mxu0 %v7023_v30  ;;  %v7074_v30 = vld [vmem:[#allocation13 + $0x3b8] ss:$28 sps:$4 sm:$0xff]  }
 0x4a8   :  { %5092 = vmatprep.subr.bf16.mxu1 %v7028_v32  ;;  %5174 = vmatprep.subr.bf16.mxu0 %v7031_v31  ;;  %v7077_v32 = vld [vmem:[#allocation13 + $0x3c0] ss:$28 sps:$4 sm:$0xff]   ;;  %v7082_v31 = vld [vmem:[#allocation13 + $0x3f4] ss:$28 sps:$4 sm:$0xff]  }
 0x4ab   :  { %5093 = vmatpush1.bf16.msra.mxu1 %v7026_v33  ;;  %5175 = vmatpush1.bf16.msra.mxu0 %v7029_v34  ;;  %v7085_v33 = vld [vmem:[#allocation13 + $0x3fc] ss:$28 sps:$4 sm:$0xff]   ;;  %v7080_v34 = vld [vmem:[#allocation13 + $0x3f0] ss:$28 sps:$4 sm:$0xff]  }
 0x4ac   :  { %5094 = vmatprep.subr.bf16.mxu1 %v7034_v35  ;;  %5176 = vmatprep.subr.bf16.mxu0 %v7037_v36  ;;  %v7083_v35 = vld [vmem:[#allocation13 + $0x3f8] ss:$28 sps:$4 sm:$0xff]   ;;  %v7088_v36 = vld [vmem:[#allocation13 + $0x42c] ss:$28 sps:$4 sm:$0xff]  }
 0x4af   :  { %5095 = vmatpush1.bf16.msra.mxu1 %v7032_v37  ;;  %5177 = vmatpush1.bf16.msra.mxu0 %v7035_v38  ;;  %v7091_v37 = vld [vmem:[#allocation13 + $0x434] ss:$28 sps:$4 sm:$0xff]   ;;  %v7086_v38 = vld [vmem:[#allocation13 + $0x428] ss:$28 sps:$4 sm:$0xff]  }
 0x4b0   :  { %5096 = vmatprep.subr.bf16.mxu1 %v7040_v24  ;;  %5178 = vmatprep.subr.bf16.mxu0 %v7043_v39  ;;  %v7089_v24 = vld [vmem:[#allocation13 + $0x430] ss:$28 sps:$4 sm:$0xff]   ;;  %v7094_v39 = vld [vmem:[#allocation13 + $0x464] ss:$28 sps:$4 sm:$0xff]  }
 0x4b3   :  { %5097 = vmatpush1.bf16.msra.mxu1 %v7038_v40  ;;  %5179 = vmatpush1.bf16.msra.mxu0 %v7041_v41  ;;  %v7097_v40 = vld [vmem:[#allocation13 + $0x46c] ss:$28 sps:$4 sm:$0xff]   ;;  %v7092_v41 = vld [vmem:[#allocation13 + $0x460] ss:$28 sps:$4 sm:$0xff]  }
 0x4b4   :  { %5098 = vmatprep.subr.bf16.mxu1 %v7046_v42  ;;  %5180 = vmatprep.subr.bf16.mxu0 %v7049_v43  ;;  %v7095_v42 = vld [vmem:[#allocation13 + $0x468] ss:$28 sps:$4 sm:$0xff]   ;;  %v7100_v43 = vld [vmem:[#allocation13 + $0x49c] ss:$28 sps:$4 sm:$0xff]  }
 0x4b7   :  { %5099 = vmatpush1.bf16.msra.mxu1 %v7044_v44  ;;  %5181 = vmatpush1.bf16.msra.mxu0 %v7047_v45  ;;  %v7103_v44 = vld [vmem:[#allocation13 + $0x4a4] ss:$28 sps:$4 sm:$0xff]   ;;  %v7098_v45 = vld [vmem:[#allocation13 + $0x498] ss:$28 sps:$4 sm:$0xff]  }
 0x4b8   :  { %5100 = vmatprep.subr.bf16.mxu1 %v7052_v46  ;;  %5182 = vmatprep.subr.bf16.mxu0 %v7055_v47  ;;  %v7101_v46 = vld [vmem:[#allocation13 + $0x4a0] ss:$28 sps:$4 sm:$0xff]   ;;  %v7106_v47 = vld [vmem:[#allocation13 + $0x4d4] ss:$28 sps:$4 sm:$0xff]  }
 0x4bb   :  { %5101 = vmatpush1.bf16.msra.mxu1 %v7050_v48  ;;  %5183 = vmatpush1.bf16.msra.mxu0 %v7053_v16  ;;  %v7109_v48 = vld [vmem:[#allocation13 + $0x4dc] ss:$28 sps:$4 sm:$0xff]   ;;  %v7104_v16 = vld [vmem:[#allocation13 + $0x4d0] ss:$28 sps:$4 sm:$0xff]  }
 0x4bc   :  { %5102 = vmatprep.subr.bf16.mxu1 %v7058_v49  ;;  %5184 = vmatprep.subr.bf16.mxu0 %v7061_v50  ;;  %v7107_v49 = vld [vmem:[#allocation13 + $0x4d8] ss:$28 sps:$4 sm:$0xff]   ;;  %v7112_v50 = vld [vmem:[#allocation13 + $0x50c] ss:$28 sps:$4 sm:$0xff]  }
 0x4bf   :  { %5103 = vmatpush1.bf16.msra.mxu1 %v7056_v51  ;;  %5185 = vmatpush1.bf16.msra.mxu0 %v7059_v52  ;;  %v7115_v51 = vld [vmem:[#allocation13 + $0x514] ss:$28 sps:$4 sm:$0xff]   ;;  %v7110_v52 = vld [vmem:[#allocation13 + $0x508] ss:$28 sps:$4 sm:$0xff]  }
 0x4c0   :  { %5104 = vmatprep.subr.bf16.mxu1 %v7064_v53  ;;  %5186 = vmatprep.subr.bf16.mxu0 %v7067_v54  ;;  %v7113_v53 = vld [vmem:[#allocation13 + $0x510] ss:$28 sps:$4 sm:$0xff]   ;;  %v7118_v54 = vld [vmem:[#allocation13 + $0x544] ss:$28 sps:$4 sm:$0xff]  }
 0x4c3   :  { %5105 = vmatpush1.bf16.msra.mxu1 %v7062_v55  ;;  %5187 = vmatpush1.bf16.msra.mxu0 %v7065_v56  ;;  %v7121_v55 = vld [vmem:[#allocation13 + $0x54c] ss:$28 sps:$4 sm:$0xff]   ;;  %v7116_v56 = vld [vmem:[#allocation13 + $0x540] ss:$28 sps:$4 sm:$0xff]  }
 0x4c4   :  { %5115 = vmatprep.subr.bf16.mxu1 %v7070_v57  ;;  %5197 = vmatprep.subr.bf16.mxu0 %v7073_v58  ;;  %v7119_v57 = vld [vmem:[#allocation13 + $0x548] ss:$28 sps:$4 sm:$0xff]   ;;  %v7124_v58 = vld [vmem:[#allocation13 + $0x57c] ss:$28 sps:$4 sm:$0xff]  }
 0x559   :  { %v3524_v63 = vpop.f32.mrb[12].mxu1  ;;  %v7819_v0 = vpop.f32.mrb[8].mxu0 }
 0x55a   :  { %v6225_v1 = vadd.f32 %v3524_v63, %v2792_v60  ;;  %v3526_v2 = vpop.f32.mrb[13].mxu1  ;;  %v3608_v3 = vpop.f32.mrb[9].mxu0  ;;  %v7127_v60 = vld [vmem:[#allocation13 + $0x584] ss:$28 sps:$4 sm:$0xff]   ;;  %v7130_v63 = vld [vmem:[#allocation13 + $0x5b4] ss:$28 sps:$4 sm:$0xff]  }
 0x55b   :  { %v6226_v4 = vadd.f32 %v3526_v2, %v2796_v61  ;;  %v6228_v5 = vadd.f32 %v3608_v3, %v2804_v62  ;;  %v3528_v6 = vpop.f32.mrb[14].mxu1  ;;  %v3610_v7 = vpop.f32.mrb[10].mxu0  ;;  %v7122_v61 = vld [vmem:[#allocation13 + $0x578] ss:$28 sps:$4 sm:$0xff]   ;;  %v7125_v62 = vld [vmem:[#allocation13 + $0x580] ss:$28 sps:$4 sm:$0xff]  }
 0x55c   :  { %vm3613_vm8 = vcmp.gt.f32.partialorder %v6225_v1, 0.0  ;;  %v3617_v8 = vmul.f32 0.1, %v6225_v1  ;;  %v3529_v13 = vpop.f32.mrb[15].mxu1  ;;  %v3611_v14 = vpop.f32.mrb[11].mxu0 }
 0x55d   :  { %vm3614_vm9 = vcmp.gt.f32.partialorder %v6226_v4, 0.0  ;;  %v3618_v9 = vmul.f32 0.1, %v6226_v4  ;;  %vm3616_vm10 = vcmp.gt.f32.partialorder %v6228_v5, 0.0  ;;  %v3620_v11 = vmul.f32 0.1, %v6228_v5 }
 0x55e   :  { %v3621_v12 = vsel %vm3613_vm8, %v6225_v1, %v3617_v8  ;;  %v7133_v1 = vld [vmem:[#allocation13 + $0x5bc] ss:$28 sps:$4 sm:$0xff]   ;;  %v7128_v2 = vld [vmem:[#allocation13 + $0x5b0] ss:$28 sps:$4 sm:$0xff]   ;;  %v7134_v6 = vld [vmem:[#allocation13 + $0x5e8] ss:$28 sps:$4 sm:$0xff]  }
 0x55f   :  { %v3622_v15 = vsel %vm3614_vm9, %v6226_v4, %v3618_v9  ;;  %v3624_v18 = vsel %vm3616_vm10, %v6228_v5, %v3620_v11  ;;  %v7823_v27 = vpack.c.bf16 %v3621_v12, %v3621_v12  ;;  %v7131_v3 = vld [vmem:[#allocation13 + $0x5b8] ss:$28 sps:$4 sm:$0xff]   ;;  %v7136_v4 = vld [vmem:[#allocation13 + $0x5ec] ss:$28 sps:$4 sm:$0xff]   ;;  %v7142_v8 = vld [vmem:[#allocation13 + $0x624] ss:$28 sps:$4 sm:$0xff]  }
 0x560   :  { %v7821_v17 = vpack.c.bf16 %v3622_v15, %v3622_v15  ;;  %v7827_v29 = vpack.c.bf16 %v3624_v18, %v3624_v18  ;;  %v7139_v5 = vld [vmem:[#allocation13 + $0x5f4] ss:$28 sps:$4 sm:$0xff]   ;;  %v7145_v9 = vld [vmem:[#allocation13 + $0x62c] ss:$28 sps:$4 sm:$0xff]   ;;  %v7140_v11 = vld [vmem:[#allocation13 + $0x620] ss:$28 sps:$4 sm:$0xff]   ;;  %v2800_v15 = vrot.slane %v7811_v59, %v7781_v10 }
 0x561   :  { %v7137_v7 = vld [vmem:[#allocation13 + $0x5f0] ss:$28 sps:$4 sm:$0xff]   ;;  %v7143_v12 = vld [vmem:[#allocation13 + $0x628] ss:$28 sps:$4 sm:$0xff]   ;;  %v7148_v13 = vld [vmem:[#allocation13 + $0x65c] ss:$28 sps:$4 sm:$0xff]  }
 0x562   :  { %5106 = vmatprep.mubr.bf16.mxu1 %v7821_v17  ;;  %5188 = vmatprep.mubr.bf16.mxu0 %v7821_v17  ;;  %v7151_v14 = vld [vmem:[#allocation13 + $0x664] ss:$28 sps:$4 sm:$0xff]   ;;  %v7146_v18 = vld [vmem:[#allocation13 + $0x658] ss:$28 sps:$4 sm:$0xff]  }
 0x563   :  { %5107 = vmatmul.mubr.bf16.vlgmr.msra.gmra.mrb[16].mxu1 %v7823_v27  ;;  %5189 = vmatmul.mubr.bf16.vlgmr.msra.gmra.mrb[12].mxu0 %v7823_v27  ;;  %v7158_v59 = vld [vmem:[#allocation13 + $0x6c8] ss:$28 sps:$4 sm:$0xff]  }
 0x564   :  { %5116 = vmatpush1.bf16.msra.mxu1 %v7068_v19  ;;  %5198 = vmatpush1.bf16.msra.mxu0 %v7071_v20  ;;  %v7149_v19 = vld [vmem:[#allocation13 + $0x660] ss:$28 sps:$4 sm:$0xff]   ;;  %v7154_v20 = vld [vmem:[#allocation13 + $0x694] ss:$28 sps:$4 sm:$0xff]  }
 0x565   :  { %5147 = vmatprep.mubr.bf16.mxu1 %v7827_v29  ;;  %5229 = vmatprep.mubr.bf16.mxu0 %v7827_v29 }
 0x566   :  { %5117 = vmatprep.subr.bf16.mxu1 %v7076_v28  ;;  %5199 = vmatprep.subr.bf16.mxu0 %v7079_v23  ;;  %v7157_v28 = vld [vmem:[#allocation13 + $0x69c] ss:$28 sps:$4 sm:$0xff]   ;;  %v6227_v23 = vadd.f32 %v7819_v0, %v2800_v15  ;;  %v7164_v0 = vld [vmem:[#allocation13 + $0x10] ss:$28 sps:$4 sm:$0xff]  }
 0x567   :  { %v7214_v15 = vld [vmem:[#allocation13 + $0x240] ss:$28 sps:$4 sm:$0xff]  }
 0x568   :  { %5118 = vmatpush1.bf16.msra.mxu1 %v7074_v30  ;;  %5200 = vmatpush1.bf16.msra.mxu0 %v7077_v32  ;;  %v7152_v30 = vld [vmem:[#allocation13 + $0x690] ss:$28 sps:$4 sm:$0xff]   ;;  %v7155_v32 = vld [vmem:[#allocation13 + $0x698] ss:$28 sps:$4 sm:$0xff]   ;;  %vm3615_vm11 = vcmp.gt.f32.partialorder %v6227_v23, 0.0 }
 0x569   :  { %5119 = vmatprep.subr.bf16.mxu1 %v7082_v31  ;;  %5201 = vmatprep.subr.bf16.mxu0 %v7085_v33  ;;  %v7160_v31 = vld [vmem:[#allocation13 + $0x6cc] ss:$28 sps:$4 sm:$0xff]   ;;  %v7163_v33 = vld [vmem:[#allocation13 + $0x6d4] ss:$28 sps:$4 sm:$0xff]  }
 0x56c   :  { %5120 = vmatpush1.bf16.msra.mxu1 %v7080_v34  ;;  %5202 = vmatpush1.bf16.msra.mxu0 %v7083_v35  ;;  %v3619_v34 = vmul.f32 0.1, %v6227_v23  ;;  %v7161_v35 = vld [vmem:[#allocation13 + $0x6d0] ss:$28 sps:$4 sm:$0xff]  }
 0x56d   :  { %5121 = vmatprep.subr.bf16.mxu1 %v7088_v36  ;;  %5203 = vmatprep.subr.bf16.mxu0 %v7091_v37  ;;  %v7166_v36 = vld [vmem:[#allocation13 + $0x14] ss:$28 sps:$4 sm:$0xff]  }
 0x56e   :  { %v7167_v37 = vld [vmem:[#allocation13 + $0x1d8] ss:$28 sps:$4 sm:$0xff]  }
 0x570   :  { %5122 = vmatpush1.bf16.msra.mxu1 %v7086_v38  ;;  %5204 = vmatpush1.bf16.msra.mxu0 %v7089_v24  ;;  %v3623_v38 = vsel %vm3615_vm11, %v6227_v23, %v3619_v34  ;;  %v7223_v23 = vld [vmem:[#allocation13 + $0x440] ss:$28 sps:$4 sm:$0xff]   ;;  %v7231_v34 = vld [vmem:[#allocation13 + $0x2ec] ss:$28 sps:$4 sm:$0xff]  }
 0x571   :  { %5123 = vmatprep.subr.bf16.mxu1 %v7094_v39  ;;  %5205 = vmatprep.subr.bf16.mxu0 %v7097_v40  ;;  %v7836_v24 = vpack.c.bf16 %v3623_v38, %v3623_v38  ;;  %v7168_v39 = vld [vmem:[#allocation13 + $0x18] ss:$28 sps:$4 sm:$0xff]   ;;  %v7171_v40 = vld [vmem:[#allocation13 + $0x4c] ss:$28 sps:$4 sm:$0xff]  }
 0x572   :  { %v7237_v38 = vld [vmem:[#allocation13 + $0x6a8] ss:$28 sps:$4 sm:$0xff]  }
 0x574   :  { %5124 = vmatpush1.bf16.msra.mxu1 %v7092_v41  ;;  %5206 = vmatpush1.bf16.msra.mxu0 %v7095_v42  ;;  %v7172_v41 = vld [vmem:[#allocation13 + $0x210] ss:$28 sps:$4 sm:$0xff]   ;;  %v7169_v42 = vld [vmem:[#allocation13 + $0x48] ss:$28 sps:$4 sm:$0xff]  }
 0x575   :  { %5125 = vmatprep.subr.bf16.mxu1 %v7100_v43  ;;  %5207 = vmatprep.subr.bf16.mxu0 %v7103_v44  ;;  %v7173_v43 = vld [vmem:[#allocation13 + $0x50] ss:$28 sps:$4 sm:$0xff]   ;;  %v7176_v44 = vld [vmem:[#allocation13 + $0x84] ss:$28 sps:$4 sm:$0xff]  }
 0x578   :  { %5126 = vmatpush1.bf16.msra.mxu1 %v7098_v45  ;;  %5208 = vmatpush1.bf16.msra.mxu0 %v7101_v46  ;;  %v7177_v45 = vld [vmem:[#allocation13 + $0x248] ss:$28 sps:$4 sm:$0xff]   ;;  %v7174_v46 = vld [vmem:[#allocation13 + $0x80] ss:$28 sps:$4 sm:$0xff]  }
 0x579   :  { %5127 = vmatprep.subr.bf16.mxu1 %v7106_v47  ;;  %5209 = vmatprep.subr.bf16.mxu0 %v7109_v48  ;;  %v7178_v47 = vld [vmem:[#allocation13 + $0x88] ss:$28 sps:$4 sm:$0xff]   ;;  %v7181_v48 = vld [vmem:[#allocation13 + $0xbc] ss:$28 sps:$4 sm:$0xff]  }
 0x57c   :  { %5128 = vmatpush1.bf16.msra.mxu1 %v7104_v16  ;;  %5210 = vmatpush1.bf16.msra.mxu0 %v7107_v49  ;;  %v7182_v16 = vld [vmem:[#allocation13 + $0x280] ss:$28 sps:$4 sm:$0xff]   ;;  %v7179_v49 = vld [vmem:[#allocation13 + $0xb8] ss:$28 sps:$4 sm:$0xff]  }
 0x57d   :  { %5129 = vmatprep.subr.bf16.mxu1 %v7112_v50  ;;  %5211 = vmatprep.subr.bf16.mxu0 %v7115_v51  ;;  %v7183_v50 = vld [vmem:[#allocation13 + $0xc0] ss:$28 sps:$4 sm:$0xff]   ;;  %v7186_v51 = vld [vmem:[#allocation13 + $0xf4] ss:$28 sps:$4 sm:$0xff]  }
 0x580   :  { %5130 = vmatpush1.bf16.msra.mxu1 %v7110_v52  ;;  %5212 = vmatpush1.bf16.msra.mxu0 %v7113_v53  ;;  %v7184_v52 = vld [vmem:[#allocation13 + $0xf0] ss:$28 sps:$4 sm:$0xff]   ;;  %v7188_v53 = vld [vmem:[#allocation13 + $0xf8] ss:$28 sps:$4 sm:$0xff]  }
 0x581   :  { %5131 = vmatprep.subr.bf16.mxu1 %v7118_v54  ;;  %5213 = vmatprep.subr.bf16.mxu0 %v7121_v55  ;;  %v7191_v54 = vld [vmem:[#allocation13 + $0x12c] ss:$28 sps:$4 sm:$0xff]  }
 0x582   :  { %v7192_v55 = vld [vmem:[#allocation13 + $0x2f0] ss:$28 sps:$4 sm:$0xff]  }
 0x584   :  { %5132 = vmatpush1.bf16.msra.mxu1 %v7116_v56  ;;  %5214 = vmatpush1.bf16.msra.mxu0 %v7119_v57  ;;  %v7189_v56 = vld [vmem:[#allocation13 + $0x128] ss:$28 sps:$4 sm:$0xff]   ;;  %v7193_v57 = vld [vmem:[#allocation13 + $0x130] ss:$28 sps:$4 sm:$0xff]  }
 0x585   :  { %5133 = vmatprep.subr.bf16.mxu1 %v7124_v58  ;;  %5215 = vmatprep.subr.bf16.mxu0 %v7127_v60  ;;  %v7196_v58 = vld [vmem:[#allocation13 + $0x164] ss:$28 sps:$4 sm:$0xff]  }
 0x586   :  { %v7197_v60 = vld [vmem:[#allocation13 + $0x328] ss:$28 sps:$4 sm:$0xff]  }
 0x588   :  { %5134 = vmatpush1.bf16.msra.mxu1 %v7122_v61  ;;  %5216 = vmatpush1.bf16.msra.mxu0 %v7125_v62  ;;  %v7194_v61 = vld [vmem:[#allocation13 + $0x160] ss:$28 sps:$4 sm:$0xff]   ;;  %v7198_v62 = vld [vmem:[#allocation13 + $0x168] ss:$28 sps:$4 sm:$0xff]  }
 0x589   :  { %5135 = vmatprep.subr.bf16.mxu1 %v7130_v63  ;;  %5217 = vmatprep.subr.bf16.mxu0 %v7133_v1  ;;  %v7201_v63 = vld [vmem:[#allocation13 + $0x19c] ss:$28 sps:$4 sm:$0xff]  }
 0x58a   :  { %v7202_v1 = vld [vmem:[#allocation13 + $0x360] ss:$28 sps:$4 sm:$0xff]  }
 0x58c   :  { %5136 = vmatpush1.bf16.msra.mxu1 %v7128_v2  ;;  %5218 = vmatpush1.bf16.msra.mxu0 %v7131_v3  ;;  %v7199_v2 = vld [vmem:[#allocation13 + $0x198] ss:$28 sps:$4 sm:$0xff]   ;;  %v7203_v3 = vld [vmem:[#allocation13 + $0x1a0] ss:$28 sps:$4 sm:$0xff]  }
 0x58d   :  { %5137 = vmatprep.subr.bf16.mxu1 %v7136_v4  ;;  %5219 = vmatprep.subr.bf16.mxu0 %v7139_v5  ;;  %v7206_v4 = vld [vmem:[#allocation13 + $0x1d4] ss:$28 sps:$4 sm:$0xff]  }
 0x58e   :  { %v7207_v5 = vld [vmem:[#allocation13 + $0x558] ss:$28 sps:$4 sm:$0xff]  }
 0x590   :  { %5138 = vmatpush1.bf16.msra.mxu1 %v7134_v6  ;;  %5220 = vmatpush1.bf16.msra.mxu0 %v7137_v7  ;;  %v7204_v6 = vld [vmem:[#allocation13 + $0x1d0] ss:$28 sps:$4 sm:$0xff]   ;;  %v7208_v7 = vld [vmem:[#allocation13 + $0x398] ss:$28 sps:$4 sm:$0xff]  }
 0x591   :  { %5139 = vmatprep.subr.bf16.mxu1 %v7142_v8  ;;  %5221 = vmatprep.subr.bf16.mxu0 %v7145_v9  ;;  %v7211_v8 = vld [vmem:[#allocation13 + $0x20c] ss:$28 sps:$4 sm:$0xff]  }
 0x592   :  { %v7212_v9 = vld [vmem:[#allocation13 + $0x590] ss:$28 sps:$4 sm:$0xff]  }
 0x594   :  { %5140 = vmatpush1.bf16.msra.mxu1 %v7140_v11  ;;  %5222 = vmatpush1.bf16.msra.mxu0 %v7143_v12  ;;  %v7209_v11 = vld [vmem:[#allocation13 + $0x208] ss:$28 sps:$4 sm:$0xff]   ;;  %v7213_v12 = vld [vmem:[#allocation13 + $0x3d0] ss:$28 sps:$4 sm:$0xff]  }
 0x595   :  { %5141 = vmatprep.subr.bf16.mxu1 %v7148_v13  ;;  %5223 = vmatprep.subr.bf16.mxu0 %v7151_v14  ;;  %v7216_v13 = vld [vmem:[#allocation13 + $0x244] ss:$28 sps:$4 sm:$0xff]  }
 0x596   :  { %v7217_v14 = vld [vmem:[#allocation13 + $0x5c8] ss:$28 sps:$4 sm:$0xff]  }
 0x598   :  { %5142 = vmatpush1.bf16.msra.mxu1 %v7146_v18  ;;  %5224 = vmatpush1.bf16.msra.mxu0 %v7149_v19  ;;  %v7218_v18 = vld [vmem:[#allocation13 + $0x408] ss:$28 sps:$4 sm:$0xff]   ;;  %v7221_v19 = vld [vmem:[#allocation13 + $0x27c] ss:$28 sps:$4 sm:$0xff]  }
 0x599   :  { %5143 = vmatprep.subr.bf16.mxu1 %v7154_v20  ;;  %5225 = vmatprep.subr.bf16.mxu0 %v7157_v28  ;;  %v7222_v20 = vld [vmem:[#allocation13 + $0x600] ss:$28 sps:$4 sm:$0xff]   ;;  %v7219_v28 = vld [vmem:[#allocation13 + $0x278] ss:$28 sps:$4 sm:$0xff]  }
 0x59c   :  { %5144 = vmatpush1.bf16.msra.mxu1 %v7152_v30  ;;  %5226 = vmatpush1.bf16.msra.mxu0 %v7155_v32  ;;  %v7226_v30 = vld [vmem:[#allocation13 + $0x2b4] ss:$28 sps:$4 sm:$0xff]  }
 0x59d   :  { %5145 = vmatprep.subr.bf16.mxu1 %v7160_v31  ;;  %5227 = vmatprep.subr.bf16.mxu0 %v7163_v33  ;;  %v7227_v32 = vld [vmem:[#allocation13 + $0x638] ss:$28 sps:$4 sm:$0xff]   ;;  %v7224_v31 = vld [vmem:[#allocation13 + $0x2b0] ss:$28 sps:$4 sm:$0xff]  }
 0x59e   :  { %v7228_v33 = vld [vmem:[#allocation13 + $0x478] ss:$28 sps:$4 sm:$0xff]  }
 0x5a0   :  { %5146 = vmatpush1.bf16.msra.mxu1 %v7158_v59  ;;  %5228 = vmatpush1.bf16.msra.mxu0 %v7161_v35  ;;  %v7232_v59 = vld [vmem:[#allocation13 + $0x670] ss:$28 sps:$4 sm:$0xff]   ;;  %v7229_v35 = vld [vmem:[#allocation13 + $0x2e8] ss:$28 sps:$4 sm:$0xff]  }
 0x5a1   :  { %5238 = vmatprep.subr.bf16.mxu1 %v7166_v36  ;;  %6175 = vmatprep.subr.bf16.mxu0 %v7167_v37  ;;  %v7233_v36 = vld [vmem:[#allocation13 + $0x4b0] ss:$28 sps:$4 sm:$0xff]   ;;  %v7236_v37 = vld [vmem:[#allocation13 + $0x324] ss:$28 sps:$4 sm:$0xff]  }
 0x5a3   :  { %5148 = vmatmul.mubr.bf16.vlgmr.msra.gmra.mrb[16].mxu1 %v7836_v24  ;;  %5230 = vmatmul.mubr.bf16.vlgmr.msra.gmra.mrb[12].mxu0 %v7836_v24 }
 0x5a4   :  { %5239 = vmatpush1.bf16.msra.mxu1 %v7164_v0  ;;  %5270 = vmatprep.mubr.bf16.mxu1 %v7821_v17  ;;  %v7234_v0 = vld [vmem:[#allocation13 + $0x320] ss:$28 sps:$4 sm:$0xff]  }
 0x5a5   :  { %6176 = vmatpush3.bf16.msra.mxu0 %v7168_v39  ;;  %5352 = vmatprep.mubr.bf16.mxu0 %v7821_v17  ;;  %v7187_v17 = vld [vmem:[#allocation13 + $0x2b8] ss:$28 sps:$4 sm:$0xff]   ;;  %v7238_v39 = vld [vmem:[#allocation13 + $0x4e8] ss:$28 sps:$4 sm:$0xff]  }
 0x5a6   :  { %5240 = vmatprep.subr.bf16.mxu1 %v7171_v40  ;;  %6177 = vmatprep.subr.bf16.mxu0 %v7172_v41  ;;  %v7241_v40 = vld [vmem:[#allocation13 + $0x35c] ss:$28 sps:$4 sm:$0xff]  }
 0x5a7   :  { %v7242_v41 = vld [vmem:[#allocation13 + $0x6e0] ss:$28 sps:$4 sm:$0xff]  }
 0x5a8   :  { %5241 = vmatpush1.bf16.msra.mxu1 %v7169_v42  ;;  %v7239_v42 = vld [vmem:[#allocation13 + $0x358] ss:$28 sps:$4 sm:$0xff]  }
 0x5a9   :  { %6178 = vmatpush3.bf16.msra.mxu0 %v7173_v43  ;;  %5242 = vmatprep.subr.bf16.mxu1 %v7176_v44  ;;  %v7243_v43 = vld [vmem:[#allocation13 + $0x520] ss:$28 sps:$4 sm:$0xff]   ;;  %v7246_v44 = vld [vmem:[#allocation13 + $0x394] ss:$28 sps:$4 sm:$0xff]  }
 0x5aa   :  { %6179 = vmatprep.subr.bf16.mxu0 %v7177_v45  ;;  %v7244_v45 = vld [vmem:[#allocation13 + $0x390] ss:$28 sps:$4 sm:$0xff]  }
 0x5ac   :  { %5243 = vmatpush1.bf16.msra.mxu1 %v7174_v46  ;;  %v7249_v46 = vld [vmem:[#allocation13 + $0x3cc] ss:$28 sps:$4 sm:$0xff]  }
 0x5ad   :  { %6180 = vmatpush3.bf16.msra.mxu0 %v7178_v47  ;;  %5244 = vmatprep.subr.bf16.mxu1 %v7181_v48  ;;  %v7247_v47 = vld [vmem:[#allocation13 + $0x3c8] ss:$28 sps:$4 sm:$0xff]  }
 0x5ae   :  { %6181 = vmatprep.subr.bf16.mxu0 %v7182_v16  ;;  %v7252_v48 = vld [vmem:[#allocation13 + $0x404] ss:$28 sps:$4 sm:$0xff]  }
 0x5af   :  { %v7250_v16 = vld [vmem:[#allocation13 + $0x400] ss:$28 sps:$4 sm:$0xff]  }
 0x5b0   :  { %5245 = vmatpush1.bf16.msra.mxu1 %v7179_v49  ;;  %v7255_v49 = vld [vmem:[#allocation13 + $0x43c] ss:$28 sps:$4 sm:$0xff]  }
 0x5b1   :  { %6182 = vmatpush3.bf16.msra.mxu0 %v7183_v50  ;;  %5246 = vmatprep.subr.bf16.mxu1 %v7186_v51  ;;  %v7253_v50 = vld [vmem:[#allocation13 + $0x438] ss:$28 sps:$4 sm:$0xff]  }
 0x5b2   :  { %6183 = vmatprep.subr.bf16.mxu0 %v7187_v17  ;;  %v7258_v51 = vld [vmem:[#allocation13 + $0x474] ss:$28 sps:$4 sm:$0xff]  }
 0x5b3   :  { %v7256_v17 = vld [vmem:[#allocation13 + $0x470] ss:$28 sps:$4 sm:$0xff]  }
 0x5b4   :  { %5247 = vmatpush1.bf16.msra.mxu1 %v7184_v52  ;;  %v7259_v52 = vld [vmem:[#allocation13 + $0x4a8] ss:$28 sps:$4 sm:$0xff]  }
 0x5b5   :  { %6184 = vmatpush3.bf16.msra.mxu0 %v7188_v53  ;;  %5248 = vmatprep.subr.bf16.mxu1 %v7191_v54  ;;  %v7264_v53 = vld [vmem:[#allocation13 + $0x4e4] ss:$28 sps:$4 sm:$0xff]   ;;  %v7267_v54 = vld [vmem:[#allocation13 + $0x51c] ss:$28 sps:$4 sm:$0xff]  }
 0x5b6   :  { %6185 = vmatprep.subr.bf16.mxu0 %v7192_v55  ;;  %v7265_v55 = vld [vmem:[#allocation13 + $0x518] ss:$28 sps:$4 sm:$0xff]  }
 0x5b8   :  { %5249 = vmatpush1.bf16.msra.mxu1 %v7189_v56  ;;  %v7270_v56 = vld [vmem:[#allocation13 + $0x554] ss:$28 sps:$4 sm:$0xff]  }
 0x5b9   :  { %6186 = vmatpush3.bf16.msra.mxu0 %v7193_v57  ;;  %5250 = vmatprep.subr.bf16.mxu1 %v7196_v58  ;;  %v7268_v57 = vld [vmem:[#allocation13 + $0x550] ss:$28 sps:$4 sm:$0xff]  }
 0x5ba   :  { %6187 = vmatprep.subr.bf16.mxu0 %v7197_v60  ;;  %v7273_v58 = vld [vmem:[#allocation13 + $0x58c] ss:$28 sps:$4 sm:$0xff]  }
 0x5bb   :  { %v7271_v60 = vld [vmem:[#allocation13 + $0x588] ss:$28 sps:$4 sm:$0xff]  }
 0x5bc   :  { %5251 = vmatpush1.bf16.msra.mxu1 %v7194_v61  ;;  %v7276_v61 = vld [vmem:[#allocation13 + $0x5c4] ss:$28 sps:$4 sm:$0xff]  }
 0x5bd   :  { %6188 = vmatpush3.bf16.msra.mxu0 %v7198_v62  ;;  %5252 = vmatprep.subr.bf16.mxu1 %v7201_v63  ;;  %v7274_v62 = vld [vmem:[#allocation13 + $0x5c0] ss:$28 sps:$4 sm:$0xff]  }
 0x5be   :  { %6189 = vmatprep.subr.bf16.mxu0 %v7202_v1  ;;  %v7279_v63 = vld [vmem:[#allocation13 + $0x5fc] ss:$28 sps:$4 sm:$0xff]  }
 0x5bf   :  { %v7277_v1 = vld [vmem:[#allocation13 + $0x5f8] ss:$28 sps:$4 sm:$0xff]  }
 0x5c0   :  { %5253 = vmatpush1.bf16.msra.mxu1 %v7199_v2  ;;  %v7282_v2 = vld [vmem:[#allocation13 + $0x634] ss:$28 sps:$4 sm:$0xff]  }
 0x5c1   :  { %6190 = vmatpush3.bf16.msra.mxu0 %v7203_v3  ;;  %5254 = vmatprep.subr.bf16.mxu1 %v7206_v4  ;;  %v7280_v3 = vld [vmem:[#allocation13 + $0x630] ss:$28 sps:$4 sm:$0xff]  }
 0x5c2   :  { %6197 = vmatprep.subr.bf16.mxu0 %v7207_v5  ;;  %v7285_v4 = vld [vmem:[#allocation13 + $0x66c] ss:$28 sps:$4 sm:$0xff]  }
 0x5c3   :  { %v7283_v5 = vld [vmem:[#allocation13 + $0x668] ss:$28 sps:$4 sm:$0xff]  }
 0x5c4   :  { %5353 = vmatmul.mubr.bf16.vlgmr.msra.gmra.mrb[16].mxu0 %v7823_v27  ;;  %5255 = vmatpush1.bf16.msra.mxu1 %v7204_v6  ;;  %v7288_v6 = vld [vmem:[#allocation13 + $0x6a4] ss:$28 sps:$4 sm:$0xff]  }
 0x5c5   :  { %6198 = vmatpush3.bf16.msra.mxu0 %v7208_v7  ;;  %5392 = vmatprep.mubr.bf16.mxu0 %v7827_v29  ;;  %v7286_v7 = vld [vmem:[#allocation13 + $0x6a0] ss:$28 sps:$4 sm:$0xff]  }
 0x5c6   :  { %5256 = vmatprep.subr.bf16.mxu1 %v7211_v8  ;;  %6199 = vmatprep.subr.bf16.mxu0 %v7212_v9  ;;  %v7291_v8 = vld [vmem:[#allocation13 + $0x6dc] ss:$28 sps:$4 sm:$0xff]  }
 0x5c7   :  { %v7289_v9 = vld [vmem:[#allocation13 + $0x6d8] ss:$28 sps:$4 sm:$0xff]  }
 0x5c8   :  { %5257 = vmatpush1.bf16.msra.mxu1 %v7209_v11  ;;  %v7851_v11 = vld [vmem:[%s7914_s11] sm:$0xff]  ;;  %s7568_s11 = smov [#allocation15]  }
 0x5c9   :  { %6200 = vmatpush3.bf16.msra.mxu0 %v7213_v12  ;;  %5258 = vmatprep.subr.bf16.mxu1 %v7216_v13  ;;  %v3890_v12 = vrot.slane %v7851_v11, %v7759_v22  ;;  %v3898_v13 = vrot.slane %v7851_v11, %v7781_v10  ;;  %s5467_s30 = sshll.u32 %s7568_s11, 4  ;;  %s5468_s30 = int_to_ptr.vmem [resolvable:$true] %s5467_s30 }
 0x5ca   :  { %6201 = vmatprep.subr.bf16.mxu0 %v7217_v14  ;;  %v3894_v14 = vrot.slane %v7851_v11, %v7767_v25  ;;  %s7476_s2 = scalar_lea.vmem %s5468_s30, 128  ;;  %p7481_p1 = scmp.lt.s32.totalorder %s5468_s30, %s5468_s30 }
 0x5cb   :  { %p7477_p0 = scmp.ne.s32.totalorder %s5468_s30, %s7476_s2  ;;  %p7482_p2 = scmp.lt.s32.totalorder %s7476_s2, %s7476_s2 }
 0x5cc   :  { %5259 = vmatpush1.bf16.msra.mxu1 %v7214_v15  ;;  %v3902_v15 = vrot.slane %v7851_v11, %v7770_v26 }
 0x5cd   :  { %6202 = vmatpush3.bf16.msra.mxu0 %v7218_v18  ;;  %5260 = vmatprep.subr.bf16.mxu1 %v7221_v19  ;;  %p7483_p3 = por %p7482_p2, %p7481_p1 }
 0x5ce   :  { %6203 = vmatprep.subr.bf16.mxu0 %v7222_v20 }
 0x5cf   :  { %p7484_p4 = pnand %p7483_p3, %p7477_p0 }
 0x5d0   :  { %5261 = vmatpush1.bf16.msra.mxu1 %v7219_v28 }
 0x5d1   :  { %6204 = vmatpush3.bf16.msra.mxu0 %v7223_v23  ;;  %5262 = vmatprep.subr.bf16.mxu1 %v7226_v30 }
 0x5d2   :  { %6205 = vmatprep.subr.bf16.mxu0 %v7227_v32 }
 0x5d4   :  { %5263 = vmatpush1.bf16.msra.mxu1 %v7224_v31 }
 0x5d5   :  { %6206 = vmatpush3.bf16.msra.mxu0 %v7228_v33  ;;  %5264 = vmatprep.subr.bf16.mxu1 %v7231_v34 }
 0x5d6   :  { %6207 = vmatprep.subr.bf16.mxu0 %v7232_v59 }
 0x5d8   :  { %5265 = vmatpush1.bf16.msra.mxu1 %v7229_v35 }
 0x5d9   :  { %6208 = vmatpush3.bf16.msra.mxu0 %v7233_v36  ;;  %5266 = vmatprep.subr.bf16.mxu1 %v7236_v37 }
 0x5da   :  { %6209 = vmatprep.subr.bf16.mxu0 %v7237_v38 }
 0x5dc   :  { %5267 = vmatpush1.bf16.msra.mxu1 %v7234_v0 }
 0x5dd   :  { %6210 = vmatpush3.bf16.msra.mxu0 %v7238_v39  ;;  %5268 = vmatprep.subr.bf16.mxu1 %v7241_v40 }
 0x5de   :  { %6211 = vmatprep.subr.bf16.mxu0 %v7242_v41 }
 0x5e0   :  { %5269 = vmatpush1.bf16.msra.mxu1 %v7239_v42 }
 0x5e1   :  { %6212 = vmatpush3.bf16.msra.mxu0 %v7243_v43  ;;  %5279 = vmatprep.subr.bf16.mxu1 %v7246_v44 }
 0x5e3   :  { %5271 = vmatmul.mubr.bf16.vlgmr.msra.gmra.mrb[20].mxu1 %v7823_v27  ;;  %v7261_v27 = vld [vmem:[#allocation13 + $0x4ac] ss:$28 sps:$4 sm:$0xff]  }
 0x5e4   :  { %5393 = vmatmul.mubr.bf16.vlgmr.msra.gmra.mrb[20].mxu0 %v7836_v24  ;;  %5280 = vmatpush1.bf16.msra.mxu1 %v7244_v45 }
 0x5e5   :  { %5311 = vmatprep.mubr.bf16.mxu1 %v7827_v29  ;;  %5281 = vmatprep.subr.bf16.mxu1 %v7249_v46  ;;  %v7262_v29 = vld [vmem:[#allocation13 + $0x4e0] ss:$28 sps:$4 sm:$0xff]  }
 0x5e8   :  { %5282 = vmatpush1.bf16.msra.mxu1 %v7247_v47 }
 0x5e9   :  { %5283 = vmatprep.subr.bf16.mxu1 %v7252_v48 }
 0x5ec   :  { %5284 = vmatpush1.bf16.msra.mxu1 %v7250_v16 }
 0x5ed   :  { %5285 = vmatprep.subr.bf16.mxu1 %v7255_v49 }
 0x5f0   :  { %5286 = vmatpush1.bf16.msra.mxu1 %v7253_v50 }
 0x5f1   :  { %5287 = vmatprep.subr.bf16.mxu1 %v7258_v51 }
 0x5f4   :  { %5288 = vmatpush1.bf16.msra.mxu1 %v7256_v17 }
 0x5f5   :  { %5289 = vmatprep.subr.bf16.mxu1 %v7261_v27 }
 0x5f8   :  { %5290 = vmatpush1.bf16.msra.mxu1 %v7259_v52 }
 0x5f9   :  { %5291 = vmatprep.subr.bf16.mxu1 %v7264_v53 }
 0x5fc   :  { %5292 = vmatpush1.bf16.msra.mxu1 %v7262_v29 }
 0x5fd   :  { %5293 = vmatprep.subr.bf16.mxu1 %v7267_v54 }
 0x600   :  { %5294 = vmatpush1.bf16.msra.mxu1 %v7265_v55 }
 0x601   :  { %5295 = vmatprep.subr.bf16.mxu1 %v7270_v56 }
 0x604   :  { %5296 = vmatpush1.bf16.msra.mxu1 %v7268_v57 }
 0x605   :  { %5297 = vmatprep.subr.bf16.mxu1 %v7273_v58 }
 0x608   :  { %5298 = vmatpush1.bf16.msra.mxu1 %v7271_v60 }
 0x609   :  { %5299 = vmatprep.subr.bf16.mxu1 %v7276_v61 }
 0x60c   :  { %5300 = vmatpush1.bf16.msra.mxu1 %v7274_v62 }
 0x60d   :  { %5301 = vmatprep.subr.bf16.mxu1 %v7279_v63 }
 0x610   :  { %5302 = vmatpush1.bf16.msra.mxu1 %v7277_v1 }
 0x611   :  { %5303 = vmatprep.subr.bf16.mxu1 %v7282_v2 }
 0x614   :  { %5304 = vmatpush1.bf16.msra.mxu1 %v7280_v3 }
 0x615   :  { %5305 = vmatprep.subr.bf16.mxu1 %v7285_v4 }
 0x618   :  { %5306 = vmatpush1.bf16.msra.mxu1 %v7283_v5 }
 0x619   :  { %5307 = vmatprep.subr.bf16.mxu1 %v7288_v6 }
 0x61c   :  { %5308 = vmatpush1.bf16.msra.mxu1 %v7286_v7 }
 0x61d   :  { %5309 = vmatprep.subr.bf16.mxu1 %v7291_v8 }
 0x620   :  { %5310 = vmatpush1.bf16.msra.mxu1 %v7289_v9 }
 0x623   :  { %5312 = vmatmul.mubr.bf16.vlgmr.msra.gmra.mrb[20].mxu1 %v7836_v24 }
 0x676   :  { %v5149_v18 = vpop.f32.mrb[16].mxu1  ;;  %v5231_v19 = vpop.f32.mrb[12].mxu0 }
 0x677   :  { %v6229_v24 = vadd.f32 %v5149_v18, %v3890_v12  ;;  %v6231_v20 = vadd.f32 %v5231_v19, %v3898_v13  ;;  %v5151_v28 = vpop.f32.mrb[17].mxu1  ;;  %v5233_v23 = vpop.f32.mrb[13].mxu0 }
 0x678   :  { %v6230_v30 = vadd.f32 %v5151_v28, %v3894_v14  ;;  %v6232_v32 = vadd.f32 %v5233_v23, %v3902_v15  ;;  %v5153_v31 = vpop.f32.mrb[18].mxu1  ;;  %v5235_v33 = vpop.f32.mrb[14].mxu0 }
 0x679   :  { %v6168_v22 = vmul.f32 -1.442695, %v6229_v24  ;;  %v6170_v34 = vmul.f32 -1.442695, %v6231_v20  ;;  %v5154_v59 = vpop.f32.mrb[19].mxu1  ;;  %v5236_v10 = vpop.f32.mrb[15].mxu0 }
 0x67a   :  { %v6169_v35 = vmul.f32 -1.442695, %v6230_v30  ;;  %v6171_v36 = vmul.f32 -1.442695, %v6232_v32 }
 0x67b   :  { %7294 = vpow2.f32 %v6168_v22 }
 0x67c   :  { %7296 = vpow2.f32 %v6170_v34 }
 0x67d   :  { %7298 = vpow2.f32 %v6169_v35 }
 0x67e   :  { %7300 = vpow2.f32 %v6171_v36 }
 0x685   :  { %v7295_v25 = vpop.eup %7294 }
 0x686   :  { %v7297_v26 = vpop.eup %7296  ;;  %v5421_v37 = vadd.f32 1.0, %v7295_v25 }
 0x687   :  { %v7299_v38 = vpop.eup %7298  ;;  %v5423_v0 = vadd.f32 1.0, %v7297_v26 }
 0x688   :  { %v7301_v39 = vpop.eup %7300  ;;  %7302 = vrcp.f32 %v5421_v37  ;;  %v5422_v40 = vadd.f32 1.0, %v7299_v38 }
 0x689   :  { %7304 = vrcp.f32 %v5423_v0  ;;  %v5424_v41 = vadd.f32 1.0, %v7301_v39 }
 0x68a   :  { %7306 = vrcp.f32 %v5422_v40 }
 0x68b   :  { %7308 = vrcp.f32 %v5424_v41 }
 0x692   :  { %v7303_v42 = vpop.eup %7302 }
 0x693   :  { %v7305_v43 = vpop.eup %7304  ;;  %5442 = vst [vmem:[#allocation14] sm:$0xff] %v7303_v42 }
 0x694   :  { %v7307_v44 = vpop.eup %7306  ;;  %5444 = vst [vmem:[#allocation14 + $0x10] sm:$0xff] %v7305_v43 }
 0x695   :  { %v7309_v45 = vpop.eup %7308  ;;  %5443 = vst [vmem:[#allocation14 + $0x8] sm:$0xff] %v7307_v44 }
 0x696   :  { %5445 = vst [vmem:[#allocation14 + $0x18] sm:$0xff] %v7309_v45 }
 0x697   :  { %7487 = shalt.err (!%p7484_p4)
}
 0x698   :  { %s7488_s22 = scalar_lea.hbm %s7916_s13, 128 }
 0x699   :  { %p7489_p5 = scmp.ne.s32.totalorder %s7916_s13, %s7488_s22  ;;  %p7492_p6 = scmp.lt.u32.totalorder %s7488_s22, %s7916_s13 }
 0x69b   :  { %p7494_p7 = pnand %p7492_p6, %p7489_p5 }
 0x69d   :  { %7497 = shalt.err (!%p7494_p7)
}
 0x69e   :  { %5470 = dma.vmem_to_hbm [thread:$0]  %s5468_s30, 128, %s7916_s13, [#allocation16]   ;;  %v6191_v46 = vpop.f32.mrb[16].mxu0 }
 0x69f   :  { %v6192_v47 = vpop.f32.mrb[17].mxu0  ;;  %s7569_s29 = smov [#allocation17]  }
 0x6a0   :  { %s5477_s15 = sshll.u32 %s7569_s29, 4  ;;  %v6193_v48 = vadd.f32 %v6192_v47, %v6191_v46  ;;  %v6194_v16 = vpop.f32.mrb[18].mxu0  ;;  %s5478_s15 = int_to_ptr.vmem [resolvable:$true] %s5477_s15 }
 0x6a1   :  { %v6195_v49 = vpop.f32.mrb[19].mxu0  ;;  %s7498_s6 = scalar_lea.vmem %s5478_s15, 128  ;;  %p7503_p9 = scmp.lt.s32.totalorder %s5478_s15, %s5478_s15 }
 0x6a2   :  { %p7499_p8 = scmp.ne.s32.totalorder %s5478_s15, %s7498_s6  ;;  %p7504_p10 = scmp.lt.s32.totalorder %s7498_s6, %s7498_s6 }
 0x6a4   :  { %p7505_p11 = por %p7504_p10, %p7503_p9 }
 0x6a6   :  { %p7506_p12 = pnand %p7505_p11, %p7499_p8 }
 0x6a8   :  { %7509 = shalt.err (!%p7506_p12)
}
 0x6a9   :  { %s7510_s4 = scalar_lea.hbm %s7917_s14, 128 }
 0x6aa   :  { %p7511_p13 = scmp.ne.s32.totalorder %s7917_s14, %s7510_s4  ;;  %p7514_p0 = scmp.lt.u32.totalorder %s7510_s4, %s7917_s14 }
 0x6ac   :  { %p7516_p1 = pnand %p7514_p0, %p7511_p13 }
 0x6ae   :  { %7519 = shalt.err (!%p7516_p1)
}
 0x6af   :  { %5480 = dma.vmem_to_hbm [thread:$0]  %s5478_s15, 128, %s7917_s14, [#allocation16]   ;;  %v3913_v50 = vsub.s32 6, %v7756_v21  ;;  %v3905_v61 = vsub.s32 4, %v7756_v21  ;;  %v3909_v62 = vsub.s32 5, %v7756_v21 }
 0x6b0   :  { %s7570_s14 = smov [#allocation14]  }
 0x6b1   :  { %v3914_v51 = vrot.slane %v7851_v11, %v3913_v50  ;;  %v3906_v63 = vrot.slane %v7851_v11, %v3905_v61  ;;  %v3910_v1 = vrot.slane %v7851_v11, %v3909_v62  ;;  %s5457_s17 = sshll.u32 %s7570_s14, 4  ;;  %s5458_s17 = int_to_ptr.vmem [resolvable:$true] %s5457_s17 }
 0x6b2   :  { %s7520_s7 = scalar_lea.vmem %s5458_s17, 896  ;;  %p7525_p3 = scmp.lt.s32.totalorder %s5458_s17, %s5458_s17 }
 0x6b3   :  { %v5355_v52 = vadd.f32 %v6193_v48, %v3914_v51  ;;  %p7521_p2 = scmp.ne.s32.totalorder %s5458_s17, %s7520_s7  ;;  %p7526_p4 = scmp.lt.s32.totalorder %s7520_s7, %s7520_s7 }
 0x6b5   :  { %p7527_p5 = por %p7526_p4, %p7525_p3 }
 0x6b7   :  { %v6213_v17 = vpop.f32.mrb[20].mxu0  ;;  %p7528_p6 = pnand %p7527_p5, %p7521_p2 }
 0x6b8   :  { %v6214_v27 = vpop.f32.mrb[21].mxu0 }
 0x6b9   :  { %v6215_v53 = vadd.f32 %v6214_v27, %v6213_v17  ;;  %v6216_v29 = vpop.f32.mrb[22].mxu0 }
 0x6ba   :  { %v6217_v54 = vpop.f32.mrb[23].mxu0 }
 0x6bb   :  { %v5395_v55 = vadd.f32 %v6215_v53, %v5355_v52 }
 0x6bd   :  { %v6174_v56 = vmul.f32 -1.442695, %v5395_v55 }
 0x6bf   :  { %7310 = vpow2.f32 %v6174_v56 }
 0x6c9   :  { %v7311_v57 = vpop.eup %7310 }
 0x6ca   :  { %v5427_v58 = vadd.f32 1.0, %v7311_v57 }
 0x6cc   :  { %7312 = vrcp.f32 %v5427_v58 }
 0x6d6   :  { %v7313_v60 = vpop.eup %7312 }
 0x6d7   :  { %5448 = vst [vmem:[#allocation14 + $0x30] sm:$0xff] %v7313_v60 }
 0x6f6   :  { %v5313_v2 = vpop.f32.mrb[20].mxu1 }
 0x6f7   :  { %v6233_v3 = vadd.f32 %v5313_v2, %v3906_v63  ;;  %v5315_v4 = vpop.f32.mrb[21].mxu1 }
 0x6f8   :  { %v6234_v5 = vadd.f32 %v5315_v4, %v3910_v1  ;;  %v5317_v6 = vpop.f32.mrb[22].mxu1 }
 0x6f9   :  { %v6172_v7 = vmul.f32 -1.442695, %v6233_v3  ;;  %v5318_v8 = vpop.f32.mrb[23].mxu1 }
 0x6fa   :  { %v6173_v9 = vmul.f32 -1.442695, %v6234_v5 }
 0x6fb   :  { %7314 = vpow2.f32 %v6172_v7 }
 0x6fc   :  { %7316 = vpow2.f32 %v6173_v9 }
 0x705   :  { %v7315_v12 = vpop.eup %7314 }
 0x706   :  { %v7317_v13 = vpop.eup %7316  ;;  %v5425_v14 = vadd.f32 1.0, %v7315_v12 }
 0x707   :  { %v5426_v15 = vadd.f32 1.0, %v7317_v13 }
 0x708   :  { %7318 = vrcp.f32 %v5425_v14 }
 0x709   :  { %7320 = vrcp.f32 %v5426_v15 }
 0x712   :  { %v7319_v21 = vpop.eup %7318 }
 0x713   :  { %v7321_v11 = vpop.eup %7320  ;;  %5446 = vst [vmem:[#allocation14 + $0x20] sm:$0xff] %v7319_v21 }
 0x714   :  { %5447 = vst [vmem:[#allocation14 + $0x28] sm:$0xff] %v7321_v11 }
 0x715   :  { %7531 = shalt.err (!%p7528_p6)
}
 0x716   :  { %s7532_s1 = scalar_lea.hbm %s7915_s12, 896 }
 0x717   :  { %p7533_p7 = scmp.ne.s32.totalorder %s7915_s12, %s7532_s1  ;;  %p7536_p8 = scmp.lt.u32.totalorder %s7532_s1, %s7915_s12 }
 0x719   :  { %p7538_p9 = pnand %p7536_p8, %p7533_p7 }
 0x71b   :  { %7541 = shalt.err (!%p7538_p9)
}
 0x71c   :  { %5460 = dma.vmem_to_hbm [thread:$0]  %s5458_s17, 896, %s7915_s12, [#allocation4]  }
 0x71d   :  { %7550 = dma.done.wait [#allocation4], 896  }
 0x71e   :  { %7551 = vsyncadd [#allocation4], 4294966400 }
 0x71f   :  { %7552 = dma.done.wait [#allocation16], 256  }
 0x720   :  { %7553 = vsyncadd [#allocation16], 4294967040 }
 0x721   :  { %5490 = vsyncpa [#allocation3], 1 }
 0x722   :  { %5491 = vsyncpa [#allocation6], 1 }
 0x723   :  { %5492 = vsyncpa [#allocation9], 1 }
 0x724   :  { %5493 = vsyncpa [#allocation12], 1 }
 0x725   :  { %5494 = vsyncpa [#allocation4], 1 }
 0x726   :  { %5495 = vsyncpa [#allocation16], 1 }

</bundles_post_ra>
